<compile_context>
chip_gen: v7x
topology: tpu7x:2x2x1
jax: 0.10.0
libtpu: 0.0.40
codegen_flags: <defaults>
</compile_context>

<pallas_src>
import functools

import jax
import jax.numpy as jnp
from jax.experimental import pallas as pl
from jax.experimental.pallas import tpu as pltpu


def _round_up(x, m):
    return (x + m - 1) // m * m


# ------------------------------ fused kernel --------------------------------

def _convnet_kernel(xp_ref, w1_ref, b1_ref, w2_ref, b2_ref, w3_ref, b3_ref,
                    wl_ref, sc_ref, out_ref, h1_ref, h2_ref, *, l2):
    """Full ConvNet forward for one batch tile.

    xp_ref : (TB, LP)              f32   spatially pre-padded input (C_in == 1)
    w1_ref : (LP, (l1+2)*128)      f32   conv1 Toeplitz weight (zero edge blocks)
    b1_ref : (1, (l1+2)*128)       f32   conv1 bias tiled per position, zero edges
    w2_ref : (384, 512)            bf16  conv2 weight, taps concatenated on K
    w3_ref : (1536, 1024)          bf16  conv3 weight, taps concatenated on K
    wl_ref : (1, 1024)             f32   final linear weight
    sc_ref : (4,)                  f32   SMEM scalars [alpha1, alpha2, alpha3, b_lin]
    out_ref: (TB, 1)               f32
    h1_ref : (TB, (l1+2)*128)      bf16  VMEM scratch (conv1 output, padded layout)
    h2_ref : (TB, l2*512)          bf16  VMEM scratch (conv2 output)
    """
    a1 = sc_ref[0]
    a2 = sc_ref[1]
    a3 = sc_ref[2]
    b_lin = sc_ref[3]

    # ---- conv1 + PReLU: one Toeplitz MXU matmul, written in scratch layout --
    # Edge blocks get exactly 0 (zero weight columns + zero bias -> prelu(0)=0),
    # re-zeroed every grid step, so conv2's padded windows read true zeros.
    h1 = jnp.dot(xp_ref[...], w1_ref[...], preferred_element_type=jnp.float32)
    h1 = h1 + b1_ref[...]
    h1 = jnp.where(h1 > 0, h1, a1 * h1)
    h1_ref[...] = h1.astype(jnp.bfloat16)

    # ---- conv2 + PReLU: stride 2, pad 1.  One K=384 dot per output position;
    # the 3-tap lane window is a static, 128-aligned slice of the h1 scratch.
    for p in range(l2):
        win = h1_ref[:, 2 * p * 128:(2 * p + 3) * 128]          # (TB, 384) bf16
        y = jnp.dot(win, w2_ref[...], preferred_element_type=jnp.float32)
        y = y + b2_ref[...]
        y = jnp.where(y > 0, y, a2 * y)
        h2_ref[:, p * 512:(p + 1) * 512] = y.astype(jnp.bfloat16)

    # ---- conv3 + PReLU: stride 1, no pad, single output position -> ONE
    # K = l2*512 = 1536 contraction (MXU accumulates all taps internally).
    h3 = jnp.dot(h2_ref[...], w3_ref[...], preferred_element_type=jnp.float32)
    h3 = h3 + b3_ref[...]
    h3 = jnp.where(h3 > 0, h3, a3 * h3)                          # (TB, 1024) f32

    # ---- Linear(1024 -> 1) + Sigmoid: lane reduction + EUP, no N=1 MXU pass --
    logit = jnp.sum(h3 * wl_ref[...], axis=-1, keepdims=True) + b_lin
    out_ref[...] = jax.nn.sigmoid(logit)


# ------------------------------- wrapper ------------------------------------

def convnet_forward(params, x, *, batch_tile=512):
    # x: (N, 1, L) float32
    n, c_in, l = x.shape
    assert c_in == 1, "ConvNet expects a single input channel"

    # Spatial extents of the conv stack (PyTorch Conv1d arithmetic).
    l1 = (l + 2 * 1 - 3) // 2 + 1
    l2 = (l1 + 2 * 1 - 3) // 2 + 1
    l3 = (l2 - 3) // 1 + 1
    # TODO(synk): like the module's reshape(-1, 1024), the fused kernel only
    # supports inputs whose conv stack reduces the spatial length to exactly 1.
    assert l3 == 1, f"input length {l} does not reduce to a single position"

    w1, b1, a1 = params["conv1"]
    w2, b2, a2 = params["conv2"]
    w3, b3, a3 = params["conv3"]
    wl, bl = params["linear"]

    # Spatially pre-padded, channel-squeezed input; width rounded up to a
    # sublane multiple (extra zero columns contribute nothing).
    lp = _round_up(l + 2, 8)
    xp = jnp.zeros((n, lp), jnp.float32).at[:, 1:l + 1].set(
        x[:, 0, :].astype(jnp.float32))

    # Batch tile: multiple of 8; cap so the grid has >= 2 steps when possible
    # (keeps both v7x TensorCores busy via dimension_semantics=("parallel",)).
    tb = max(8, min(batch_tile, _round_up(-(-n // 2), 8)))
    n_pad = _round_up(n, tb)
    if n_pad != n:
        xp = jnp.pad(xp, ((0, n_pad - n), (0, 0)))

    # conv1 as a Toeplitz matmul writing directly into the h1 scratch layout:
    # output lane-block p+1 (128 lanes) reads xp columns 2p..2p+2; lane-blocks
    # 0 and l1+1 stay zero and absorb conv2's zero padding.
    w1_taps = jnp.transpose(w1[:, 0, :], (1, 0)).astype(jnp.float32)  # (3, 128)
    w1_toe = jnp.zeros((lp, (l1 + 2) * 128), jnp.float32)
    for p in range(l1):
        w1_toe = w1_toe.at[2 * p:2 * p + 3, (p + 1) * 128:(p + 2) * 128].set(w1_taps)
    b1_tiled = jnp.concatenate(
        [jnp.zeros((128,), jnp.float32),
         jnp.tile(b1.astype(jnp.float32), l1),
         jnp.zeros((128,), jnp.float32)]).reshape(1, -1)

    # conv2/conv3 weights tap-major, taps concatenated along the contraction
    # dim, stored bf16 (f32 accumulation in-kernel).
    w2_flat = jnp.transpose(w2, (2, 1, 0)).reshape(3 * 128, 512).astype(jnp.bfloat16)
    w3_flat = jnp.transpose(w3, (2, 1, 0)).reshape(3 * 512, 1024).astype(jnp.bfloat16)
    scalars = jnp.stack([a1, a2, a3, bl[0]]).astype(jnp.float32)      # (4,)

    out = pl.pallas_call(
        functools.partial(_convnet_kernel, l2=l2),
        out_shape=jax.ShapeDtypeStruct((n_pad, 1), jnp.float32),
        grid=(n_pad // tb,),
        in_specs=[
            pl.BlockSpec((tb, lp), lambda i: (i, 0)),
            pl.BlockSpec((lp, (l1 + 2) * 128), lambda i: (0, 0)),
            pl.BlockSpec((1, (l1 + 2) * 128), lambda i: (0, 0)),
            pl.BlockSpec((3 * 128, 512), lambda i: (0, 0)),
            pl.BlockSpec((1, 512), lambda i: (0, 0)),
            pl.BlockSpec((3 * 512, 1024), lambda i: (0, 0)),
            pl.BlockSpec((1, 1024), lambda i: (0, 0)),
            pl.BlockSpec((1, 1024), lambda i: (0, 0)),
            pl.BlockSpec(memory_space=pltpu.MemorySpace.SMEM),
        ],
        out_specs=pl.BlockSpec((tb, 1), lambda i: (i, 0)),
        scratch_shapes=[
            pltpu.VMEM((tb, (l1 + 2) * 128), jnp.bfloat16),   # h1 (padded layout)
            pltpu.VMEM((tb, l2 * 512), jnp.bfloat16),         # h2
        ],
        compiler_params=pltpu.CompilerParams(
            dimension_semantics=("parallel",),
            vmem_limit_bytes=32 * 1024 * 1024),
    )(xp, w1_toe, b1_tiled, w2_flat, b2.reshape(1, -1).astype(jnp.float32),
      w3_flat, b3.reshape(1, -1).astype(jnp.float32),
      wl.reshape(1, -1).astype(jnp.float32), scalars)

    return out[:n]


# ------------------------------ parameters ----------------------------------

def _init_conv(key, c_out, c_in, k):
    fan_in = c_in * k
    bound = 1.0 / jnp.sqrt(jnp.float32(fan_in))
    kw, kb = jax.random.split(key)
    w = jax.random.uniform(kw, (c_out, c_in, k), jnp.float32, -bound, bound)
    b = jax.random.uniform(kb, (c_out,), jnp.float32, -bound, bound)
    return w, b


def _init_linear(key, out_f, in_f):
    bound = 1.0 / jnp.sqrt(jnp.float32(in_f))
    kw, kb = jax.random.split(key)
    w = jax.random.uniform(kw, (out_f, in_f), jnp.float32, -bound, bound)
    b = jax.random.uniform(kb, (out_f,), jnp.float32, -bound, bound)
    return w, b


def init_convnet_params(key):
    k1, k2, k3, k4 = jax.random.split(key, 4)
    w1, b1 = _init_conv(k1, 128, 1, 3)
    w2, b2 = _init_conv(k2, 512, 128, 3)
    w3, b3 = _init_conv(k3, 1024, 512, 3)
    wl, bl = _init_linear(k4, 1, 1024)
    prelu = jnp.float32(0.25)                      # torch PReLU default
    return {
        "conv1": (w1, b1, prelu), "conv2": (w2, b2, prelu),
        "conv3": (w3, b3, prelu), "linear": (wl, bl),
    }


# ------------------------ pure-JAX reference (check) -------------------------

def _conv1d_ref(x, w, b, stride, pad):
    y = jax.lax.conv_general_dilated(
        x, w, window_strides=(stride,), padding=[(pad, pad)],
        dimension_numbers=("NCH", "OIH", "NCH"))
    return y + b[None, :, None]


def _prelu_ref(y, a):
    return jnp.where(y > 0, y, a * y)


def convnet_forward_ref(params, x):
    w1, b1, a1 = params["conv1"]
    w2, b2, a2 = params["conv2"]
    w3, b3, a3 = params["conv3"]
    wl, bl = params["linear"]
    h = _prelu_ref(_conv1d_ref(x, w1, b1, 2, 1), a1)
    h = _prelu_ref(_conv1d_ref(h, w2, b2, 2, 1), a2)
    h = _prelu_ref(_conv1d_ref(h, w3, b3, 1, 0), a3)
    h = h.reshape(-1, 1024)
    return jax.nn.sigmoid(h @ wl.T + bl)


# --------------------------------- main --------------------------------------

if __name__ == "__main__":
    key = jax.random.PRNGKey(0)
    kp, kx = jax.random.split(key)
    params = init_convnet_params(kp)

    # L=12 -> conv stack reduces the spatial length to exactly 1, matching the
    # module's reshape(-1, 1024).
    x = jax.random.normal(kx, (2, 1, 12), dtype=jnp.float32)

    out = jax.block_until_ready(convnet_forward(params, x))
    ref = jax.block_until_ready(convnet_forward_ref(params, x))

    assert out.shape == (2, 1), out.shape
    # bf16 MXU operands (f32 accumulation) -> slightly looser tolerance.
    assert jnp.allclose(out, ref, rtol=2e-2, atol=1e-2), (out, ref)

    print("KERNEL_OK")
</pallas_src>

<mosaic_0001>
module attributes {stable_mosaic.version = 11 : i64} {
  func.func @_convnet_kernel(%arg0: i32, %arg1: memref<8x16xf32, #tpu.memory_space<vmem>>, %arg2: memref<16x1024xf32, #tpu.memory_space<vmem>>, %arg3: memref<1x1024xf32, #tpu.memory_space<vmem>>, %arg4: memref<384x512xbf16, #tpu.memory_space<vmem>>, %arg5: memref<1x512xf32, #tpu.memory_space<vmem>>, %arg6: memref<1536x1024xbf16, #tpu.memory_space<vmem>>, %arg7: memref<1x1024xf32, #tpu.memory_space<vmem>>, %arg8: memref<1x1024xf32, #tpu.memory_space<vmem>>, %arg9: memref<4xf32, #tpu.memory_space<smem>>, %arg10: memref<8x1xf32, #tpu.memory_space<vmem>>, %arg11: memref<8x1024xbf16, #tpu.memory_space<vmem>>, %arg12: memref<8x1536xbf16, #tpu.memory_space<vmem>>) attributes {dimension_semantics = [#tpu.dimension_semantics<parallel>], iteration_bounds = array<i64: 1>, scalar_prefetch = 0 : i64, scratch_operands = 2 : i64, tpu.core_type = #tpu.core_type<tc>, window_params = [{transform_indices = @transform_0, window_bounds = array<i64: 8, 16>}, {pipeline_mode = #tpu.pipeline_mode<synchronous>, transform_indices = @transform_1, window_bounds = array<i64: 16, 1024>}, {pipeline_mode = #tpu.pipeline_mode<synchronous>, transform_indices = @transform_2, window_bounds = array<i64: 1, 1024>}, {pipeline_mode = #tpu.pipeline_mode<synchronous>, transform_indices = @transform_3, window_bounds = array<i64: 384, 512>}, {pipeline_mode = #tpu.pipeline_mode<synchronous>, transform_indices = @transform_4, window_bounds = array<i64: 1, 512>}, {pipeline_mode = #tpu.pipeline_mode<synchronous>, transform_indices = @transform_5, window_bounds = array<i64: 1536, 1024>}, {pipeline_mode = #tpu.pipeline_mode<synchronous>, transform_indices = @transform_6, window_bounds = array<i64: 1, 1024>}, {pipeline_mode = #tpu.pipeline_mode<synchronous>, transform_indices = @transform_7, window_bounds = array<i64: 1, 1024>}, {transform_indices = @transform_8, window_bounds = array<i64: 4>}, {transform_indices = @transform_9, window_bounds = array<i64: 8, 1>}]} {
    %c0 = arith.constant 0 : index
    %0 = memref.load %arg9[%c0] : memref<4xf32, #tpu.memory_space<smem>>
    %c1 = arith.constant 1 : index
    %1 = memref.load %arg9[%c1] : memref<4xf32, #tpu.memory_space<smem>>
    %c2 = arith.constant 2 : index
    %2 = memref.load %arg9[%c2] : memref<4xf32, #tpu.memory_space<smem>>
    %c3 = arith.constant 3 : index
    %3 = memref.load %arg9[%c3] : memref<4xf32, #tpu.memory_space<smem>>
    %c0_0 = arith.constant 0 : index
    %c0_1 = arith.constant 0 : index
    %4 = vector.load %arg1[%c0_0, %c0_1] : memref<8x16xf32, #tpu.memory_space<vmem>>, vector<8x16xf32>
    %c0_2 = arith.constant 0 : index
    %c0_3 = arith.constant 0 : index
    %5 = vector.load %arg2[%c0_2, %c0_3] : memref<16x1024xf32, #tpu.memory_space<vmem>>, vector<16x1024xf32>
    %cst = arith.constant dense<0.000000e+00> : vector<8x1024xf32>
    %6 = tpu.matmul %4, %5, %cst {dimension_numbers = #tpu.dot_dimension_numbers<[1], [0], [0], [1], [0, 0, 1, 1], [], []>} : vector<8x16xf32>, vector<16x1024xf32>, vector<8x1024xf32> -> vector<8x1024xf32>
    %c0_4 = arith.constant 0 : index
    %c0_5 = arith.constant 0 : index
    %7 = vector.load %arg3[%c0_4, %c0_5] : memref<1x1024xf32, #tpu.memory_space<vmem>>, vector<1x1024xf32>
    %8 = vector.broadcast %7 : vector<1x1024xf32> to vector<8x1024xf32>
    %9 = arith.addf %6, %8 : vector<8x1024xf32>
    %cst_6 = arith.constant 0.000000e+00 : f32
    %10 = vector.broadcast %cst_6 : f32 to vector<8x1024xf32>
    %11 = arith.cmpf ogt, %9, %10 : vector<8x1024xf32>
    %12 = vector.broadcast %0 : f32 to vector<8x1024xf32>
    %13 = arith.mulf %12, %9 : vector<8x1024xf32>
    %14 = arith.select %11, %9, %13 : vector<8x1024xi1>, vector<8x1024xf32>
    %15 = arith.truncf %14 : vector<8x1024xf32> to vector<8x1024xbf16>
    %c0_7 = arith.constant 0 : index
    %c0_8 = arith.constant 0 : index
    %16 = vector.load %arg11[%c0_7, %c0_8] : memref<8x1024xbf16, #tpu.memory_space<vmem>>, vector<8x1024xbf16>
    tpu.vector_store %arg11[%c0_7, %c0_8], %15 {strides = array<i32>} : memref<8x1024xbf16, #tpu.memory_space<vmem>>, vector<8x1024xbf16>,
    %c0_9 = arith.constant 0 : index
    %c0_10 = arith.constant 0 : index
    %17 = vector.load %arg11[%c0_9, %c0_10] : memref<8x1024xbf16, #tpu.memory_space<vmem>>, vector<8x384xbf16>
    %c0_11 = arith.constant 0 : index
    %c0_12 = arith.constant 0 : index
    %18 = vector.load %arg4[%c0_11, %c0_12] : memref<384x512xbf16, #tpu.memory_space<vmem>>, vector<384x512xbf16>
    %cst_13 = arith.constant dense<0.000000e+00> : vector<8x512xf32>
    %19 = tpu.matmul %17, %18, %cst_13 {dimension_numbers = #tpu.dot_dimension_numbers<[1], [0], [0], [1], [0, 0, 1, 1], [], []>} : vector<8x384xbf16>, vector<384x512xbf16>, vector<8x512xf32> -> vector<8x512xf32>
    %c0_14 = arith.constant 0 : index
    %c0_15 = arith.constant 0 : index
    %20 = vector.load %arg5[%c0_14, %c0_15] : memref<1x512xf32, #tpu.memory_space<vmem>>, vector<1x512xf32>
    %21 = vector.broadcast %20 : vector<1x512xf32> to vector<8x512xf32>
    %22 = arith.addf %19, %21 : vector<8x512xf32>
    %cst_16 = arith.constant 0.000000e+00 : f32
    %23 = vector.broadcast %cst_16 : f32 to vector<8x512xf32>
    %24 = arith.cmpf ogt, %22, %23 : vector<8x512xf32>
    %25 = vector.broadcast %1 : f32 to vector<8x512xf32>
    %26 = arith.mulf %25, %22 : vector<8x512xf32>
    %27 = arith.select %24, %22, %26 : vector<8x512xi1>, vector<8x512xf32>
    %28 = arith.truncf %27 : vector<8x512xf32> to vector<8x512xbf16>
    %c0_17 = arith.constant 0 : index
    %c0_18 = arith.constant 0 : index
    %29 = vector.load %arg12[%c0_17, %c0_18] : memref<8x1536xbf16, #tpu.memory_space<vmem>>, vector<8x512xbf16>
    tpu.vector_store %arg12[%c0_17, %c0_18], %28 {strides = array<i32>} : memref<8x1536xbf16, #tpu.memory_space<vmem>>, vector<8x512xbf16>,
    %c0_19 = arith.constant 0 : index
    %c256 = arith.constant 256 : index
    %30 = vector.load %arg11[%c0_19, %c256] : memref<8x1024xbf16, #tpu.memory_space<vmem>>, vector<8x384xbf16>
    %c0_20 = arith.constant 0 : index
    %c0_21 = arith.constant 0 : index
    %31 = vector.load %arg4[%c0_20, %c0_21] : memref<384x512xbf16, #tpu.memory_space<vmem>>, vector<384x512xbf16>
    %cst_22 = arith.constant dense<0.000000e+00> : vector<8x512xf32>
    %32 = tpu.matmul %30, %31, %cst_22 {dimension_numbers = #tpu.dot_dimension_numbers<[1], [0], [0], [1], [0, 0, 1, 1], [], []>} : vector<8x384xbf16>, vector<384x512xbf16>, vector<8x512xf32> -> vector<8x512xf32>
    %c0_23 = arith.constant 0 : index
    %c0_24 = arith.constant 0 : index
    %33 = vector.load %arg5[%c0_23, %c0_24] : memref<1x512xf32, #tpu.memory_space<vmem>>, vector<1x512xf32>
    %34 = vector.broadcast %33 : vector<1x512xf32> to vector<8x512xf32>
    %35 = arith.addf %32, %34 : vector<8x512xf32>
    %cst_25 = arith.constant 0.000000e+00 : f32
    %36 = vector.broadcast %cst_25 : f32 to vector<8x512xf32>
    %37 = arith.cmpf ogt, %35, %36 : vector<8x512xf32>
    %38 = vector.broadcast %1 : f32 to vector<8x512xf32>
    %39 = arith.mulf %38, %35 : vector<8x512xf32>
    %40 = arith.select %37, %35, %39 : vector<8x512xi1>, vector<8x512xf32>
    %41 = arith.truncf %40 : vector<8x512xf32> to vector<8x512xbf16>
    %c0_26 = arith.constant 0 : index
    %c512 = arith.constant 512 : index
    %42 = vector.load %arg12[%c0_26, %c512] : memref<8x1536xbf16, #tpu.memory_space<vmem>>, vector<8x512xbf16>
    tpu.vector_store %arg12[%c0_26, %c512], %41 {strides = array<i32>} : memref<8x1536xbf16, #tpu.memory_space<vmem>>, vector<8x512xbf16>,
    %c0_27 = arith.constant 0 : index
    %c512_28 = arith.constant 512 : index
    %43 = vector.load %arg11[%c0_27, %c512_28] : memref<8x1024xbf16, #tpu.memory_space<vmem>>, vector<8x384xbf16>
    %c0_29 = arith.constant 0 : index
    %c0_30 = arith.constant 0 : index
    %44 = vector.load %arg4[%c0_29, %c0_30] : memref<384x512xbf16, #tpu.memory_space<vmem>>, vector<384x512xbf16>
    %cst_31 = arith.constant dense<0.000000e+00> : vector<8x512xf32>
    %45 = tpu.matmul %43, %44, %cst_31 {dimension_numbers = #tpu.dot_dimension_numbers<[1], [0], [0], [1], [0, 0, 1, 1], [], []>} : vector<8x384xbf16>, vector<384x512xbf16>, vector<8x512xf32> -> vector<8x512xf32>
    %c0_32 = arith.constant 0 : index
    %c0_33 = arith.constant 0 : index
    %46 = vector.load %arg5[%c0_32, %c0_33] : memref<1x512xf32, #tpu.memory_space<vmem>>, vector<1x512xf32>
    %47 = vector.broadcast %46 : vector<1x512xf32> to vector<8x512xf32>
    %48 = arith.addf %45, %47 : vector<8x512xf32>
    %cst_34 = arith.constant 0.000000e+00 : f32
    %49 = vector.broadcast %cst_34 : f32 to vector<8x512xf32>
    %50 = arith.cmpf ogt, %48, %49 : vector<8x512xf32>
    %51 = vector.broadcast %1 : f32 to vector<8x512xf32>
    %52 = arith.mulf %51, %48 : vector<8x512xf32>
    %53 = arith.select %50, %48, %52 : vector<8x512xi1>, vector<8x512xf32>
    %54 = arith.truncf %53 : vector<8x512xf32> to vector<8x512xbf16>
    %c0_35 = arith.constant 0 : index
    %c1024 = arith.constant 1024 : index
    %55 = vector.load %arg12[%c0_35, %c1024] : memref<8x1536xbf16, #tpu.memory_space<vmem>>, vector<8x512xbf16>
    tpu.vector_store %arg12[%c0_35, %c1024], %54 {strides = array<i32>} : memref<8x1536xbf16, #tpu.memory_space<vmem>>, vector<8x512xbf16>,
    %c0_36 = arith.constant 0 : index
    %c0_37 = arith.constant 0 : index
    %56 = vector.load %arg12[%c0_36, %c0_37] : memref<8x1536xbf16, #tpu.memory_space<vmem>>, vector<8x1536xbf16>
    %c0_38 = arith.constant 0 : index
    %c0_39 = arith.constant 0 : index
    %57 = vector.load %arg6[%c0_38, %c0_39] : memref<1536x1024xbf16, #tpu.memory_space<vmem>>, vector<1536x1024xbf16>
    %cst_40 = arith.constant dense<0.000000e+00> : vector<8x1024xf32>
    %58 = tpu.matmul %56, %57, %cst_40 {dimension_numbers = #tpu.dot_dimension_numbers<[1], [0], [0], [1], [0, 0, 1, 1], [], []>} : vector<8x1536xbf16>, vector<1536x1024xbf16>, vector<8x1024xf32> -> vector<8x1024xf32>
    %c0_41 = arith.constant 0 : index
    %c0_42 = arith.constant 0 : index
    %59 = vector.load %arg7[%c0_41, %c0_42] : memref<1x1024xf32, #tpu.memory_space<vmem>>, vector<1x1024xf32>
    %60 = vector.broadcast %59 : vector<1x1024xf32> to vector<8x1024xf32>
    %61 = arith.addf %58, %60 : vector<8x1024xf32>
    %cst_43 = arith.constant 0.000000e+00 : f32
    %62 = vector.broadcast %cst_43 : f32 to vector<8x1024xf32>
    %63 = arith.cmpf ogt, %61, %62 : vector<8x1024xf32>
    %64 = vector.broadcast %2 : f32 to vector<8x1024xf32>
    %65 = arith.mulf %64, %61 : vector<8x1024xf32>
    %66 = arith.select %63, %61, %65 : vector<8x1024xi1>, vector<8x1024xf32>
    %c0_44 = arith.constant 0 : index
    %c0_45 = arith.constant 0 : index
    %67 = vector.load %arg8[%c0_44, %c0_45] : memref<1x1024xf32, #tpu.memory_space<vmem>>, vector<1x1024xf32>
    %68 = vector.broadcast %67 : vector<1x1024xf32> to vector<8x1024xf32>
    %69 = arith.mulf %66, %68 : vector<8x1024xf32>
    %cst_46 = arith.constant dense<0.000000e+00> : vector<8xf32>
    %70 = vector.multi_reduction <add>, %69, %cst_46 [1] : vector<8x1024xf32> to vector<8xf32>
    %71 = vector.shape_cast %70 : vector<8xf32> to vector<8x1xf32>
    %72 = vector.broadcast %3 : f32 to vector<8x1xf32>
    %73 = arith.addf %71, %72 : vector<8x1xf32>
    %74 = arith.negf %73 : vector<8x1xf32>
    %75 = math.exp %74 : vector<8x1xf32>
    %cst_47 = arith.constant 1.000000e+00 : f32
    %76 = vector.broadcast %cst_47 : f32 to vector<8x1xf32>
    %77 = arith.addf %76, %75 : vector<8x1xf32>
    %78 = arith.divf %76, %77 : vector<8x1xf32>
    %c0_48 = arith.constant 0 : index
    %c0_49 = arith.constant 0 : index
    %79 = vector.load %arg10[%c0_48, %c0_49] : memref<8x1xf32, #tpu.memory_space<vmem>>, vector<8x1xf32>
    tpu.vector_store %arg10[%c0_48, %c0_49], %78 {strides = array<i32>} : memref<8x1xf32, #tpu.memory_space<vmem>>, vector<8x1xf32>,
    return
  }
  func.func @transform_0(%arg0: i32) -> (i32, i32) {
    %c0_i32 = arith.constant 0 : i32
    %c0_i32_0 = arith.constant 0 : i32
    return %arg0, %c0_i32 : i32, i32
  }
  func.func @transform_1(%arg0: i32) -> (i32, i32) {
    %c0_i32 = arith.constant 0 : i32
    %c0_i32_0 = arith.constant 0 : i32
    %c0_i32_1 = arith.constant 0 : i32
    return %c0_i32, %c0_i32_0 : i32, i32
  }
  func.func @transform_2(%arg0: i32) -> (i32, i32) {
    %c0_i32 = arith.constant 0 : i32
    %c0_i32_0 = arith.constant 0 : i32
    %c0_i32_1 = arith.constant 0 : i32
    return %c0_i32, %c0_i32_0 : i32, i32
  }
  func.func @transform_3(%arg0: i32) -> (i32, i32) {
    %c0_i32 = arith.constant 0 : i32
    %c0_i32_0 = arith.constant 0 : i32
    %c0_i32_1 = arith.constant 0 : i32
    return %c0_i32, %c0_i32_0 : i32, i32
  }
  func.func @transform_4(%arg0: i32) -> (i32, i32) {
    %c0_i32 = arith.constant 0 : i32
    %c0_i32_0 = arith.constant 0 : i32
    %c0_i32_1 = arith.constant 0 : i32
    return %c0_i32, %c0_i32_0 : i32, i32
  }
  func.func @transform_5(%arg0: i32) -> (i32, i32) {
    %c0_i32 = arith.constant 0 : i32
    %c0_i32_0 = arith.constant 0 : i32
    %c0_i32_1 = arith.constant 0 : i32
    return %c0_i32, %c0_i32_0 : i32, i32
  }
  func.func @transform_6(%arg0: i32) -> (i32, i32) {
    %c0_i32 = arith.constant 0 : i32
    %c0_i32_0 = arith.constant 0 : i32
    %c0_i32_1 = arith.constant 0 : i32
    return %c0_i32, %c0_i32_0 : i32, i32
  }
  func.func @transform_7(%arg0: i32) -> (i32, i32) {
    %c0_i32 = arith.constant 0 : i32
    %c0_i32_0 = arith.constant 0 : i32
    %c0_i32_1 = arith.constant 0 : i32
    return %c0_i32, %c0_i32_0 : i32, i32
  }
  func.func @transform_8(%arg0: i32) -> i32 {
    %c0_i32 = arith.constant 0 : i32
    %c0_i32_0 = arith.constant 0 : i32
    return %c0_i32 : i32
  }
  func.func @transform_9(%arg0: i32) -> (i32, i32) {
    %c0_i32 = arith.constant 0 : i32
    %c0_i32_0 = arith.constant 0 : i32
    return %arg0, %c0_i32 : i32, i32
  }
}

</mosaic_0001>

<bundles_post_ra>
// kernel: tpu_custom_call.1
= control target key start
LH: loop header
LB: loop body
LE: loop exit
PB: predicated region body
PF: predicated region fallthrough
CT: control target
= control target key end

     0   :  { %14 = vsyncpa [#allocation5], 0  ;;  %s11381_s0 = inlined_call_operand.hbm [shape: f32[8,16], index: 0, kind: input, shape index: {}]   ;;  %s11382_s1 = inlined_call_operand.hbm [shape: f32[16,1024], index: 1, kind: input, shape index: {}]   ;;  %s11383_s2 = inlined_call_operand.hbm [shape: f32[1,1024], index: 2, kind: input, shape index: {}]   ;;  %s11384_s3 = inlined_call_operand.hbm [shape: bf16[384,512], index: 3, kind: input, shape index: {}]   ;;  %s11385_s4 = inlined_call_operand.hbm [shape: f32[1,512], index: 4, kind: input, shape index: {}]   ;;  %s11386_s5 = inlined_call_operand.hbm [shape: bf16[1536,1024], index: 5, kind: input, shape index: {}]   ;;  %s11387_s6 = inlined_call_operand.hbm [shape: f32[1,1024], index: 6, kind: input, shape index: {}]   ;;  %s11388_s7 = inlined_call_operand.hbm [shape: f32[1,1024], index: 7, kind: input, shape index: {}]   ;;  %s11389_s8 = inlined_call_operand.hbm [shape: f32[4], index: 8, kind: input, shape index: {}]   ;;  %s11390_s9 = inlined_call_operand.vmem [shape: f32[8,1], index: 9, kind: output, shape index: {}]  }
   0x1   :  { %15 = vsyncpa [#allocation8], 0 }
   0x2   :  { %16 = vsyncpa [#allocation11], 0 }
   0x3   :  { %17 = vsyncpa [#allocation14], 0 }
   0x4   :  { %18 = vsyncpa [#allocation17], 0 }
   0x5   :  { %19 = vsyncpa [#allocation6], 0  ;;  %s10532_s30 = smov [#allocation7]   ;;  %s10334_s13 = scalar_lea.hbm %s11382_s1, 2048 }
   0x6   :  { %s35_s10 = sshll.u32 %s10532_s30, 4  ;;  %p10335_p0 = scmp.ne.s32.totalorder %s11382_s1, %s10334_s13  ;;  %s36_s10 = int_to_ptr.vmem [resolvable:$true] %s35_s10 }
   0x7   :  { %p10338_p1 = scmp.lt.u32.totalorder %s10334_s13, %s11382_s1 }
   0x9   :  { %p10340_p2 = pnand %p10338_p1, %p10335_p0 }
   0xb   :  { %10343 = shalt.err (!%p10340_p2)
}
   0xc   :  { %s10344_s18 = scalar_lea.vmem %s36_s10, 2048  ;;  %p10349_p4 = scmp.lt.s32.totalorder %s36_s10, %s36_s10 }
   0xd   :  { %p10345_p3 = scmp.ne.s32.totalorder %s36_s10, %s10344_s18  ;;  %p10350_p5 = scmp.lt.s32.totalorder %s10344_s18, %s10344_s18 }
   0xf   :  { %p10351_p6 = por %p10350_p5, %p10349_p4 }
  0x11   :  { %p10352_p7 = pnand %p10351_p6, %p10345_p3 }
  0x13   :  { %10355 = shalt.err (!%p10352_p7)
}
  0x14   :  { %s10533_s19 = smov 1024   ;;  %s10534_s20 = smov 64  }
  0x15   :  { %41 = dma.hbm_to_vmem [thread:$0]  %s11382_s1, 2048, %s36_s10, [#allocation8], %s10533_s19, %s10533_s19, %s10534_s20  }
  0x16   :  { %s10535_s23 = smov [#allocation10]   ;;  %s10356_s27 = scalar_lea.hbm %s11384_s3, 12288 }
  0x17   :  { %s57_s24 = sshll.u32 %s10535_s23, 4  ;;  %p10357_p8 = scmp.ne.s32.totalorder %s11384_s3, %s10356_s27  ;;  %s58_s24 = int_to_ptr.vmem [resolvable:$true] %s57_s24 }
  0x18   :  { %p10360_p9 = scmp.lt.u32.totalorder %s10356_s27, %s11384_s3 }
  0x1a   :  { %p10362_p10 = pnand %p10360_p9, %p10357_p8 }
  0x1c   :  { %10365 = shalt.err (!%p10362_p10)
}
  0x1d   :  { %s10366_s12 = scalar_lea.vmem %s58_s24, 12288  ;;  %p10371_p12 = scmp.lt.s32.totalorder %s58_s24, %s58_s24 }
  0x1e   :  { %p10367_p11 = scmp.ne.s32.totalorder %s58_s24, %s10366_s12  ;;  %p10372_p13 = scmp.lt.s32.totalorder %s10366_s12, %s10366_s12 }
  0x20   :  { %p10373_p0 = por %p10372_p13, %p10371_p12 }
  0x22   :  { %p10374_p1 = pnand %p10373_p0, %p10367_p11 }
  0x24   :  { %10377 = shalt.err (!%p10374_p1)
}
  0x25   :  { %s10536_s1 = smov 256   ;;  %s10537_s10 = smov 16  }
  0x26   :  { %63 = dma.hbm_to_vmem [thread:$0]  %s11384_s3, 12288, %s58_s24, [#allocation11], %s10536_s1, %s10536_s1, %s10537_s10  }
  0x27   :  { %s10538_s15 = smov [#allocation13]   ;;  %s10378_s19 = scalar_lea.hbm %s11386_s5, 98304 }
  0x28   :  { %s79_s16 = sshll.u32 %s10538_s15, 4  ;;  %p10379_p2 = scmp.ne.s32.totalorder %s11386_s5, %s10378_s19  ;;  %s80_s16 = int_to_ptr.vmem [resolvable:$true] %s79_s16 }
  0x29   :  { %p10382_p3 = scmp.lt.u32.totalorder %s10378_s19, %s11386_s5 }
  0x2b   :  { %p10384_p4 = pnand %p10382_p3, %p10379_p2 }
  0x2d   :  { %10387 = shalt.err (!%p10384_p4)
}
  0x2e   :  { %s10388_s25 = scalar_lea.vmem %s80_s16, 98304  ;;  %p10393_p6 = scmp.lt.s32.totalorder %s80_s16, %s80_s16 }
  0x2f   :  { %p10389_p5 = scmp.ne.s32.totalorder %s80_s16, %s10388_s25  ;;  %p10394_p7 = scmp.lt.s32.totalorder %s10388_s25, %s10388_s25 }
  0x31   :  { %p10395_p8 = por %p10394_p7, %p10393_p6 }
  0x33   :  { %p10396_p9 = pnand %p10395_p8, %p10389_p5 }
  0x35   :  { %10399 = shalt.err (!%p10396_p9)
}
  0x36   :  { %s10539_s3 = smov 512   ;;  %s10540_s24 = smov 32  }
  0x37   :  { %85 = dma.hbm_to_vmem [thread:$0]  %s11386_s5, 98304, %s80_s16, [#allocation14], %s10539_s3, %s10539_s3, %s10540_s24  }
  0x38   :  { %s10541_s28 = smov [#allocation4]   ;;  %s10542_s30 = smov [#allocation9]  }
  0x39   :  { %s26_s29 = sshll.u32 %s10541_s28, 4  ;;  %s48_s11 = sshll.u32 %s10542_s30, 4  ;;  %s27_s29 = int_to_ptr.vmem [resolvable:$true] %s26_s29  ;;  %s49_s11 = int_to_ptr.vmem [resolvable:$true] %s48_s11 }
  0x3a   :  { %s10400_s10 = scalar_lea.hbm %s11381_s0, 128 }
  0x3b   :  { %p10401_p10 = scmp.ne.s32.totalorder %s11381_s0, %s10400_s10  ;;  %p10404_p11 = scmp.lt.u32.totalorder %s10400_s10, %s11381_s0 }
  0x3d   :  { %p10406_p12 = pnand %p10404_p11, %p10401_p10 }
  0x3f   :  { %10409 = shalt.err (!%p10406_p12)
}
  0x40   :  { %s10410_s5 = scalar_lea.vmem %s27_s29, 128  ;;  %p10415_p0 = scmp.lt.s32.totalorder %s27_s29, %s27_s29 }
  0x41   :  { %p10411_p13 = scmp.ne.s32.totalorder %s27_s29, %s10410_s5  ;;  %p10416_p1 = scmp.lt.s32.totalorder %s10410_s5, %s10410_s5 }
  0x43   :  { %p10417_p2 = por %p10416_p1, %p10415_p0 }
  0x45   :  { %p10418_p3 = pnand %p10417_p2, %p10411_p13 }
  0x47   :  { %10421 = shalt.err (!%p10418_p3)
}
  0x48   :  { %29 = dma.hbm_to_vmem [thread:$0]  %s11381_s0, 128, %s27_s29, [#allocation5]  }
  0x49   :  { %s10422_s21 = scalar_lea.hbm %s11383_s2, 128 }
  0x4a   :  { %p10423_p4 = scmp.ne.s32.totalorder %s11383_s2, %s10422_s21  ;;  %p10426_p5 = scmp.lt.u32.totalorder %s10422_s21, %s11383_s2 }
  0x4c   :  { %p10428_p6 = pnand %p10426_p5, %p10423_p4 }
  0x4e   :  { %10431 = shalt.err (!%p10428_p6)
}
  0x4f   :  { %s10432_s24 = scalar_lea.vmem %s49_s11, 128  ;;  %p10437_p8 = scmp.lt.s32.totalorder %s49_s11, %s49_s11 }
  0x50   :  { %p10433_p7 = scmp.ne.s32.totalorder %s49_s11, %s10432_s24  ;;  %p10438_p9 = scmp.lt.s32.totalorder %s10432_s24, %s10432_s24 }
  0x52   :  { %p10439_p10 = por %p10438_p9, %p10437_p8 }
  0x54   :  { %p10440_p11 = pnand %p10439_p10, %p10433_p7 }
  0x56   :  { %10443 = shalt.err (!%p10440_p11)
}
  0x57   :  { %51 = dma.hbm_to_vmem [thread:$0]  %s11383_s2, 128, %s49_s11, [#allocation8]  }
  0x58   :  { %s10543_s27 = smov [#allocation12]   ;;  %s10544_s29 = smov [#allocation15]  }
  0x59   :  { %s70_s28 = sshll.u32 %s10543_s27, 4  ;;  %s92_s30 = sshll.u32 %s10544_s29, 4  ;;  %s71_s28 = int_to_ptr.vmem [resolvable:$true] %s70_s28  ;;  %s93_s30 = int_to_ptr.vmem [resolvable:$true] %s92_s30 }
  0x5a   :  { %s10444_s10 = scalar_lea.hbm %s11385_s4, 64 }
  0x5b   :  { %p10445_p12 = scmp.ne.s32.totalorder %s11385_s4, %s10444_s10  ;;  %p10448_p13 = scmp.lt.u32.totalorder %s10444_s10, %s11385_s4 }
  0x5d   :  { %p10450_p0 = pnand %p10448_p13, %p10445_p12 }
  0x5f   :  { %10453 = shalt.err (!%p10450_p0)
}
  0x60   :  { %s10454_s2 = scalar_lea.vmem %s71_s28, 64  ;;  %p10459_p2 = scmp.lt.s32.totalorder %s71_s28, %s71_s28 }
  0x61   :  { %p10455_p1 = scmp.ne.s32.totalorder %s71_s28, %s10454_s2  ;;  %p10460_p3 = scmp.lt.s32.totalorder %s10454_s2, %s10454_s2 }
  0x63   :  { %p10461_p4 = por %p10460_p3, %p10459_p2 }
  0x65   :  { %p10462_p5 = pnand %p10461_p4, %p10455_p1 }
  0x67   :  { %10465 = shalt.err (!%p10462_p5)
}
  0x68   :  { %73 = dma.hbm_to_vmem [thread:$0]  %s11385_s4, 64, %s71_s28, [#allocation11]  }
  0x69   :  { %s10466_s19 = scalar_lea.hbm %s11387_s6, 128 }
  0x6a   :  { %p10467_p6 = scmp.ne.s32.totalorder %s11387_s6, %s10466_s19  ;;  %p10470_p7 = scmp.lt.u32.totalorder %s10466_s19, %s11387_s6 }
  0x6c   :  { %p10472_p8 = pnand %p10470_p7, %p10467_p6 }
  0x6e   :  { %10475 = shalt.err (!%p10472_p8)
}
  0x6f   :  { %s10476_s25 = scalar_lea.vmem %s93_s30, 128  ;;  %p10481_p10 = scmp.lt.s32.totalorder %s93_s30, %s93_s30 }
  0x70   :  { %p10477_p9 = scmp.ne.s32.totalorder %s93_s30, %s10476_s25  ;;  %p10482_p11 = scmp.lt.s32.totalorder %s10476_s25, %s10476_s25 }
  0x72   :  { %p10483_p12 = por %p10482_p11, %p10481_p10 }
  0x74   :  { %p10484_p13 = pnand %p10483_p12, %p10477_p9 }
  0x76   :  { %10487 = shalt.err (!%p10484_p13)
}
  0x77   :  { %95 = dma.hbm_to_vmem [thread:$0]  %s11387_s6, 128, %s93_s30, [#allocation14]  }
  0x78   :  { %s10545_s24 = smov [#allocation16]   ;;  %s10488_s28 = scalar_lea.hbm %s11388_s7, 128 }
  0x79   :  { %s102_s0 = sshll.u32 %s10545_s24, 4  ;;  %p10489_p0 = scmp.ne.s32.totalorder %s11388_s7, %s10488_s28  ;;  %s103_s0 = int_to_ptr.vmem [resolvable:$true] %s102_s0 }
  0x7a   :  { %p10492_p1 = scmp.lt.u32.totalorder %s10488_s28, %s11388_s7 }
  0x7c   :  { %p10494_p2 = pnand %p10492_p1, %p10489_p0 }
  0x7e   :  { %10497 = shalt.err (!%p10494_p2)
}
  0x7f   :  { %s10498_s13 = scalar_lea.vmem %s103_s0, 128  ;;  %p10503_p4 = scmp.lt.s32.totalorder %s103_s0, %s103_s0 }
  0x80   :  { %p10499_p3 = scmp.ne.s32.totalorder %s103_s0, %s10498_s13  ;;  %p10504_p5 = scmp.lt.s32.totalorder %s10498_s13, %s10498_s13 }
  0x82   :  { %p10505_p6 = por %p10504_p5, %p10503_p4 }
  0x84   :  { %p10506_p7 = pnand %p10505_p6, %p10499_p3 }
  0x86   :  { %10509 = shalt.err (!%p10506_p7)
}
  0x87   :  { %105 = dma.hbm_to_vmem [thread:$0]  %s11388_s7, 128, %s103_s0, [#allocation17]  }
  0x88   :  { %s10510_s17 = scalar_lea.hbm %s11389_s8, 16 }
  0x89   :  { %p10511_p8 = scmp.ne.s32.totalorder %s11389_s8, %s10510_s17  ;;  %p10514_p9 = scmp.lt.u32.totalorder %s10510_s17, %s11389_s8 }
  0x8b   :  { %p10516_p10 = pnand %p10514_p9, %p10511_p8 }
  0x8d   :  { %10519 = shalt.err (!%p10516_p10)
}
  0x8e   :  { %s10546_s18 = smov [#allocation18]  }
  0x8f   :  { %113 = dma.hbm_to_smem %s11389_s8, 16, %s10546_s18, [#allocation6]  }
  0x90   :  { %10520 = dma.done.wait [#allocation5], 128  }
  0x91   :  { %10521 = vsyncadd [#allocation5], 4294967168 }
  0x92   :  { %10522 = dma.done.wait [#allocation8], 2176  }
  0x93   :  { %10523 = vsyncadd [#allocation8], 4294965120 }
  0x94   :  { %10524 = dma.done.wait [#allocation11], 12352  }
  0x95   :  { %10525 = vsyncadd [#allocation11], 4294954944 }
  0x96   :  { %10526 = dma.done.wait [#allocation14], 98432  }
  0x97   :  { %10527 = vsyncadd [#allocation14], 4294868864 }
  0x98   :  { %10528 = dma.done.wait [#allocation17], 128  }
  0x99   :  { %10529 = vsyncadd [#allocation17], 4294967168 }
  0x9a   :  { %10530 = dma.done.wait [#allocation6], 16  }
  0x9b   :  { %10531 = vsyncadd [#allocation6], 4294967280 }
  0x9c   :  { %141 = sfence }
  0x9d   :  { %v149_v0 = vld [vmem:[#allocation7 + $0x8] sm:$0xff]  ;;  %v148_v2 = vld [vmem:[#allocation7] sm:$0xff]  ;;  %v10547_v5 = vmov 0.0   ;;  %v151_v6 = vld [vmem:[#allocation7 + $0x18] sm:$0xff]  ;;  %vm206_vm0 = vcmask 130048   ;;  %s143_s7 = sld [smem:[#allocation18]] }
  0x9e   :  { %v157_v1 = vld [vmem:[#allocation7 + $0x48] sm:$0xff]  ;;  %v156_v4 = vld [vmem:[#allocation7 + $0x40] sm:$0xff]  ;;  %274 = vmatprep.mubr.f32.mxu0 %v10547_v5  ;;  %345 = vmatprep.mubr.f32.mxu1 %v10547_v5  ;;  %v147_v8 = vld [vmem:[#allocation4] sm:$0xff]  ;;  %s8757_s8 = sld [smem:[#allocation18 + $0x1]]  ;;  %s11321_s21 = sld [smem:[#allocation18 + $0x2]] }
  0x9f   :  { %v9874_v3 = vpack.c.bf16 %v157_v1, %v149_v0  ;;  %v9876_v7 = vpack.c.bf16 %v156_v4, %v148_v2  ;;  %v159_v9 = vld [vmem:[#allocation7 + $0x58] sm:$0xff]  ;;  %v150_v10 = vld [vmem:[#allocation7 + $0x10] sm:$0xff]  ;;  %v153_v14 = vld [vmem:[#allocation7 + $0x28] sm:$0xff]  ;;  %s8759_s22 = sld [smem:[#allocation18 + $0x3]] }
  0xa0   :  { %v158_v11 = vld [vmem:[#allocation7 + $0x50] sm:$0xff]  ;;  %v9878_v12 = vpack.c.bf16 %v159_v9, %v151_v6  ;;  %v161_v15 = vld [vmem:[#allocation7 + $0x68] sm:$0xff]  ;;  %v152_v16 = vld [vmem:[#allocation7 + $0x20] sm:$0xff] }
  0xa1   :  { %9875 = vmatprep.subr.bf16.mxu0 %v9874_v3  ;;  %v9880_v13 = vpack.c.bf16 %v158_v11, %v150_v10  ;;  %v9882_v17 = vpack.c.bf16 %v161_v15, %v153_v14  ;;  %v160_v18 = vld [vmem:[#allocation7 + $0x60] sm:$0xff]  ;;  %v155_v19 = vld [vmem:[#allocation7 + $0x38] sm:$0xff]  ;;  %v154_v23 = vld [vmem:[#allocation7 + $0x30] sm:$0xff] }
  0xa2   :  { %9877 = vmatpush1.bf16.msra.mxu0 %v9876_v7  ;;  %v163_v20 = vld [vmem:[#allocation7 + $0x78] sm:$0xff]  ;;  %9879 = vmatprep.subr.bf16.mxu1 %v9878_v12  ;;  %v9884_v21 = vpack.c.bf16 %v160_v18, %v152_v16  ;;  %v162_v24 = vld [vmem:[#allocation7 + $0x70] sm:$0xff] }
  0xa3   :  { %v9886_v22 = vpack.c.bf16 %v163_v20, %v155_v19  ;;  %9881 = vmatpush1.bf16.msra.mxu1 %v9880_v13  ;;  %9883 = vmatprep.subr.bf16.mxu0 %v9882_v17  ;;  %v9888_v25 = vpack.c.bf16 %v162_v24, %v154_v23  ;;  %v10707_v26 = vld [vmem:[#allocation10 + $0x4] ss:$16 sps:$4 sm:$0xff]   ;;  %v10710_v27 = vld [vmem:[#allocation10] ss:$16 sps:$4 sm:$0xff]   ;;  %v10712_v28 = vld [vmem:[#allocation10 + $0xc] ss:$16 sps:$4 sm:$0xff]  }
  0xa4   :  { %v10716_v29 = vld [vmem:[#allocation10 + $0x24] ss:$16 sps:$4 sm:$0xff]   ;;  %v10718_v30 = vld [vmem:[#allocation10 + $0x8] ss:$16 sps:$4 sm:$0xff]   ;;  %v10722_v31 = vld [vmem:[#allocation10 + $0x2c] ss:$16 sps:$4 sm:$0xff]  }
  0xa5   :  { %8760 = vmatmul.mubr.msk.f32.vlgmr.msra.gmra.mrb[0].mxu0 %vm206_vm0, %v147_v8  ;;  %9887 = vmatprep.subr.bf16.mxu1 %v9886_v22  ;;  %v10725_v32 = vld [vmem:[#allocation10 + $0x20] ss:$16 sps:$4 sm:$0xff]   ;;  %v10729_v33 = vld [vmem:[#allocation10 + $0x44] ss:$16 sps:$4 sm:$0xff]   ;;  %v10732_v34 = vld [vmem:[#allocation10 + $0x28] ss:$16 sps:$4 sm:$0xff]  }
  0xa6   :  { %9885 = vmatpush1.bf16.msra.mxu0 %v9884_v21  ;;  %416 = vmatprep.mubr.f32.mxu0 %v10547_v5  ;;  %v10735_v35 = vld [vmem:[#allocation10 + $0x4c] ss:$16 sps:$4 sm:$0xff]   ;;  %v10738_v36 = vld [vmem:[#allocation10 + $0x40] ss:$16 sps:$4 sm:$0xff]   ;;  %v10741_v37 = vld [vmem:[#allocation10 + $0x64] ss:$16 sps:$4 sm:$0xff]  }
  0xa7   :  { %8761 = vmatmul.mubr.msk.f32.vlgmr.msra.gmra.mrb[0].mxu1 %vm206_vm0, %v147_v8  ;;  %1166 = vmatprep.subr.bf16.mxu0 %v10707_v26  ;;  %v10744_v38 = vld [vmem:[#allocation10 + $0x48] ss:$16 sps:$4 sm:$0xff]   ;;  %v10747_v39 = vld [vmem:[#allocation10 + $0x6c] ss:$16 sps:$4 sm:$0xff]   ;;  %v10750_v40 = vld [vmem:[#allocation10 + $0x60] ss:$16 sps:$4 sm:$0xff]  }
  0xa8   :  { %9889 = vmatpush1.bf16.msra.mxu1 %v9888_v25  ;;  %487 = vmatprep.mubr.f32.mxu1 %v10547_v5  ;;  %v10753_v41 = vld [vmem:[#allocation10 + $0x84] ss:$16 sps:$4 sm:$0xff]   ;;  %v10756_v42 = vld [vmem:[#allocation10 + $0x68] ss:$16 sps:$4 sm:$0xff]   ;;  %v10759_v43 = vld [vmem:[#allocation10 + $0x8c] ss:$16 sps:$4 sm:$0xff]  }
  0xa9   :  { %8762 = vmatmul.mubr.msk.f32.vlgmr.msra.gmra.mrb[2].mxu0 %vm206_vm0, %v147_v8  ;;  %1248 = vmatprep.subr.bf16.mxu1 %v10712_v28  ;;  %v10762_v44 = vld [vmem:[#allocation10 + $0x80] ss:$16 sps:$4 sm:$0xff]   ;;  %v10765_v45 = vld [vmem:[#allocation10 + $0xa4] ss:$16 sps:$4 sm:$0xff]   ;;  %v10768_v46 = vld [vmem:[#allocation10 + $0x88] ss:$16 sps:$4 sm:$0xff]  }
  0xaa   :  { %1167 = vmatpush1.bf16.msra.mxu0 %v10710_v27  ;;  %v10771_v47 = vld [vmem:[#allocation10 + $0xac] ss:$16 sps:$4 sm:$0xff]   ;;  %v10774_v48 = vld [vmem:[#allocation10 + $0xa0] ss:$16 sps:$4 sm:$0xff]   ;;  %v10777_v49 = vld [vmem:[#allocation10 + $0xc4] ss:$16 sps:$4 sm:$0xff]  }
  0xab   :  { %8763 = vmatmul.mubr.msk.f32.vlgmr.msra.gmra.mrb[2].mxu1 %vm206_vm0, %v147_v8  ;;  %1168 = vmatprep.subr.bf16.mxu0 %v10716_v29  ;;  %v10780_v50 = vld [vmem:[#allocation10 + $0xa8] ss:$16 sps:$4 sm:$0xff]   ;;  %v10783_v51 = vld [vmem:[#allocation10 + $0xcc] ss:$16 sps:$4 sm:$0xff]   ;;  %v10786_v52 = vld [vmem:[#allocation10 + $0xc0] ss:$16 sps:$4 sm:$0xff]  }
  0xac   :  { %1249 = vmatpush1.bf16.msra.mxu1 %v10718_v30  ;;  %v10789_v53 = vld [vmem:[#allocation10 + $0xe4] ss:$16 sps:$4 sm:$0xff]   ;;  %v10792_v54 = vld [vmem:[#allocation10 + $0xc8] ss:$16 sps:$4 sm:$0xff]   ;;  %v10795_v55 = vld [vmem:[#allocation10 + $0xec] ss:$16 sps:$4 sm:$0xff]  }
  0xad   :  { %1250 = vmatprep.subr.bf16.mxu1 %v10722_v31  ;;  %v10798_v56 = vld [vmem:[#allocation10 + $0xe0] ss:$16 sps:$4 sm:$0xff]   ;;  %v10801_v57 = vld [vmem:[#allocation10 + $0xe8] ss:$16 sps:$4 sm:$0xff]   ;;  %v10803_v58 = vld [vmem:[#allocation10 + $0x104] ss:$16 sps:$4 sm:$0xff]  }
  0xae   :  { %1169 = vmatpush1.bf16.msra.mxu0 %v10725_v32  ;;  %v10805_v59 = vld [vmem:[#allocation10 + $0x10c] ss:$16 sps:$4 sm:$0xff]   ;;  %v10808_v60 = vld [vmem:[#allocation10 + $0x100] ss:$16 sps:$4 sm:$0xff]   ;;  %v10811_v61 = vld [vmem:[#allocation10 + $0x124] ss:$16 sps:$4 sm:$0xff]  }
  0xaf   :  { %1170 = vmatprep.subr.bf16.mxu0 %v10729_v33  ;;  %v10814_v62 = vld [vmem:[#allocation10 + $0x108] ss:$16 sps:$4 sm:$0xff]   ;;  %v10817_v63 = vld [vmem:[#allocation10 + $0x12c] ss:$16 sps:$4 sm:$0xff]   ;;  %v10820_v0 = vld [vmem:[#allocation10 + $0x120] ss:$16 sps:$4 sm:$0xff]  }
  0xb0   :  { %1251 = vmatpush1.bf16.msra.mxu1 %v10732_v34  ;;  %v10823_v1 = vld [vmem:[#allocation10 + $0x144] ss:$16 sps:$4 sm:$0xff]   ;;  %v10826_v2 = vld [vmem:[#allocation10 + $0x128] ss:$16 sps:$4 sm:$0xff]   ;;  %v10829_v3 = vld [vmem:[#allocation10 + $0x14c] ss:$16 sps:$4 sm:$0xff]  }
  0xb1   :  { %1252 = vmatprep.subr.bf16.mxu1 %v10735_v35  ;;  %11456 = vst [vmem:[#allocation25_spill] sm:$0xff] %v10823_v1  ;;  %11457 = vst [vmem:[#allocation26_spill] sm:$0xff] %v10829_v3  ;;  %v10832_v4 = vld [vmem:[#allocation10 + $0x140] ss:$16 sps:$4 sm:$0xff]   ;;  %v10835_v5 = vld [vmem:[#allocation10 + $0x164] ss:$16 sps:$4 sm:$0xff]  }
  0xb2   :  { %1171 = vmatpush1.bf16.msra.mxu0 %v10738_v36  ;;  %11458 = vst [vmem:[#allocation27_spill] sm:$0xff] %v10832_v4  ;;  %11459 = vst [vmem:[#allocation28_spill] sm:$0xff] %v10835_v5  ;;  %v10838_v6 = vld [vmem:[#allocation10 + $0x148] ss:$16 sps:$4 sm:$0xff]   ;;  %v10841_v7 = vld [vmem:[#allocation10 + $0x16c] ss:$16 sps:$4 sm:$0xff]  }
  0xb3   :  { %1172 = vmatprep.subr.bf16.mxu0 %v10741_v37  ;;  %11460 = vst [vmem:[#allocation29_spill] sm:$0xff] %v10838_v6  ;;  %11461 = vst [vmem:[#allocation30_spill] sm:$0xff] %v10841_v7  ;;  %v10844_v8 = vld [vmem:[#allocation10 + $0x160] ss:$16 sps:$4 sm:$0xff]   ;;  %v10848_v9 = vld [vmem:[#allocation10 + $0x168] ss:$16 sps:$4 sm:$0xff]  }
  0xb4   :  { %1253 = vmatpush1.bf16.msra.mxu1 %v10744_v38  ;;  %11462 = vst [vmem:[#allocation31_spill] sm:$0xff] %v10844_v8  ;;  %11463 = vst [vmem:[#allocation32_spill] sm:$0xff] %v10848_v9  ;;  %v10855_v10 = vld [vmem:[#allocation10 + $0x184] ss:$16 sps:$4 sm:$0xff]   ;;  %v10857_v11 = vld [vmem:[#allocation10 + $0x18c] ss:$16 sps:$4 sm:$0xff]  }
  0xb5   :  { %1254 = vmatprep.subr.bf16.mxu1 %v10747_v39  ;;  %11464 = vst [vmem:[#allocation33_spill] sm:$0xff] %v10855_v10  ;;  %11465 = vst [vmem:[#allocation34_spill] sm:$0xff] %v10857_v11  ;;  %v10859_v12 = vld [vmem:[#allocation10 + $0x180] ss:$16 sps:$4 sm:$0xff]   ;;  %v10861_v13 = vld [vmem:[#allocation10 + $0x188] ss:$16 sps:$4 sm:$0xff]  }
  0xb6   :  { %1173 = vmatpush1.bf16.msra.mxu0 %v10750_v40  ;;  %11466 = vst [vmem:[#allocation35_spill] sm:$0xff] %v10859_v12  ;;  %11467 = vst [vmem:[#allocation36_spill] sm:$0xff] %v10861_v13  ;;  %v10867_v14 = vld [vmem:[#allocation10 + $0x1a4] ss:$16 sps:$4 sm:$0xff]   ;;  %v10869_v15 = vld [vmem:[#allocation10 + $0x1ac] ss:$16 sps:$4 sm:$0xff]  }
  0xb7   :  { %1174 = vmatprep.subr.bf16.mxu0 %v10753_v41  ;;  %11468 = vst [vmem:[#allocation37_spill] sm:$0xff] %v10867_v14  ;;  %11469 = vst [vmem:[#allocation38_spill] sm:$0xff] %v10869_v15  ;;  %v10871_v16 = vld [vmem:[#allocation10 + $0x1a0] ss:$16 sps:$4 sm:$0xff]   ;;  %v10873_v17 = vld [vmem:[#allocation10 + $0x1a8] ss:$16 sps:$4 sm:$0xff]  }
  0xb8   :  { %1255 = vmatpush1.bf16.msra.mxu1 %v10756_v42  ;;  %11470 = vst [vmem:[#allocation39_spill] sm:$0xff] %v10871_v16  ;;  %11471 = vst [vmem:[#allocation40_spill] sm:$0xff] %v10873_v17  ;;  %v10879_v18 = vld [vmem:[#allocation10 + $0x1c4] ss:$16 sps:$4 sm:$0xff]   ;;  %v10881_v19 = vld [vmem:[#allocation10 + $0x1cc] ss:$16 sps:$4 sm:$0xff]  }
  0xb9   :  { %1256 = vmatprep.subr.bf16.mxu1 %v10759_v43  ;;  %11472 = vst [vmem:[#allocation41_spill] sm:$0xff] %v10879_v18  ;;  %11473 = vst [vmem:[#allocation42_spill] sm:$0xff] %v10881_v19  ;;  %v10883_v20 = vld [vmem:[#allocation10 + $0x1c0] ss:$16 sps:$4 sm:$0xff]   ;;  %v10885_v21 = vld [vmem:[#allocation10 + $0x1c8] ss:$16 sps:$4 sm:$0xff]  }
  0xba   :  { %1175 = vmatpush1.bf16.msra.mxu0 %v10762_v44  ;;  %11474 = vst [vmem:[#allocation43_spill] sm:$0xff] %v10883_v20  ;;  %11475 = vst [vmem:[#allocation44_spill] sm:$0xff] %v10885_v21  ;;  %v10891_v22 = vld [vmem:[#allocation10 + $0x1e4] ss:$16 sps:$4 sm:$0xff]   ;;  %v10893_v23 = vld [vmem:[#allocation10 + $0x1ec] ss:$16 sps:$4 sm:$0xff]  }
  0xbb   :  { %1176 = vmatprep.subr.bf16.mxu0 %v10765_v45  ;;  %11476 = vst [vmem:[#allocation45_spill] sm:$0xff] %v10891_v22  ;;  %11477 = vst [vmem:[#allocation46_spill] sm:$0xff] %v10893_v23  ;;  %v10895_v24 = vld [vmem:[#allocation10 + $0x1e0] ss:$16 sps:$4 sm:$0xff]   ;;  %v10897_v25 = vld [vmem:[#allocation10 + $0x1e8] ss:$16 sps:$4 sm:$0xff]  }
  0xbc   :  { %1257 = vmatpush1.bf16.msra.mxu1 %v10768_v46  ;;  %11478 = vst [vmem:[#allocation47_spill] sm:$0xff] %v10895_v24  ;;  %11479 = vst [vmem:[#allocation48_spill] sm:$0xff] %v10897_v25 }
  0xbd   :  { %1258 = vmatprep.subr.bf16.mxu1 %v10771_v47 }
  0xbe   :  { %1177 = vmatpush1.bf16.msra.mxu0 %v10774_v48 }
  0xbf   :  { %1178 = vmatprep.subr.bf16.mxu0 %v10777_v49 }
  0xc0   :  { %1259 = vmatpush1.bf16.msra.mxu1 %v10780_v50 }
  0xc1   :  { %1260 = vmatprep.subr.bf16.mxu1 %v10783_v51 }
  0xc2   :  { %1179 = vmatpush1.bf16.msra.mxu0 %v10786_v52 }
  0xc3   :  { %1180 = vmatprep.subr.bf16.mxu0 %v10789_v53 }
  0xc4   :  { %1261 = vmatpush1.bf16.msra.mxu1 %v10792_v54 }
  0xc5   :  { %1262 = vmatprep.subr.bf16.mxu1 %v10795_v55 }
  0xc6   :  { %1181 = vmatpush1.bf16.msra.mxu0 %v10798_v56 }
  0xc7   :  { %1182 = vmatprep.subr.bf16.mxu0 %v10803_v58 }
  0xc8   :  { %1263 = vmatpush1.bf16.msra.mxu1 %v10801_v57 }
  0xc9   :  { %1264 = vmatprep.subr.bf16.mxu1 %v10805_v59 }
  0xca   :  { %1183 = vmatpush1.bf16.msra.mxu0 %v10808_v60 }
  0xcb   :  { %1184 = vmatprep.subr.bf16.mxu0 %v10811_v61 }
  0xcc   :  { %1265 = vmatpush1.bf16.msra.mxu1 %v10814_v62 }
  0xcd   :  { %1266 = vmatprep.subr.bf16.mxu1 %v10817_v63 }
  0xce   :  { %1185 = vmatpush1.bf16.msra.mxu0 %v10820_v0 }
  0xcf   :  { %1186 = vmatprep.subr.bf16.mxu0 %v10823_v1 }
  0xd0   :  { %1267 = vmatpush1.bf16.msra.mxu1 %v10826_v2 }
  0xd1   :  { %1268 = vmatprep.subr.bf16.mxu1 %v10829_v3 }
  0xd2   :  { %1187 = vmatpush1.bf16.msra.mxu0 %v10832_v4 }
  0xd3   :  { %1188 = vmatprep.subr.bf16.mxu0 %v10835_v5 }
  0xd4   :  { %1269 = vmatpush1.bf16.msra.mxu1 %v10838_v6 }
  0xd5   :  { %1270 = vmatprep.subr.bf16.mxu1 %v10841_v7 }
  0xd6   :  { %1189 = vmatpush1.bf16.msra.mxu0 %v10844_v8 }
  0xd7   :  { %1190 = vmatprep.subr.bf16.mxu0 %v10855_v10 }
  0xd8   :  { %1271 = vmatpush1.bf16.msra.mxu1 %v10848_v9 }
  0xd9   :  { %1272 = vmatprep.subr.bf16.mxu1 %v10857_v11 }
  0xda   :  { %1191 = vmatpush1.bf16.msra.mxu0 %v10859_v12 }
  0xdb   :  { %1192 = vmatprep.subr.bf16.mxu0 %v10867_v14 }
  0xdc   :  { %1273 = vmatpush1.bf16.msra.mxu1 %v10861_v13  ;;  %v10937_v13 = vstv %s143_s7 }
  0xdd   :  { %1274 = vmatprep.subr.bf16.mxu1 %v10869_v15 }
  0xde   :  { %1193 = vmatpush1.bf16.msra.mxu0 %v10871_v16 }
  0xdf   :  { %1194 = vmatprep.subr.bf16.mxu0 %v10879_v18 }
  0xe0   :  { %1275 = vmatpush1.bf16.msra.mxu1 %v10873_v17 }
  0xe1   :  { %1276 = vmatprep.subr.bf16.mxu1 %v10881_v19  ;;  %v10903_v19 = vld [vmem:[#allocation10 + $0x204] ss:$16 sps:$4 sm:$0xff]  }
  0xe2   :  { %1195 = vmatpush1.bf16.msra.mxu0 %v10883_v20  ;;  %11480 = vst [vmem:[#allocation49_spill] sm:$0xff] %v10903_v19  ;;  %v10905_v20 = vld [vmem:[#allocation10 + $0x20c] ss:$16 sps:$4 sm:$0xff]  }
  0xe3   :  { %1196 = vmatprep.subr.bf16.mxu0 %v10891_v22  ;;  %11481 = vst [vmem:[#allocation50_spill] sm:$0xff] %v10905_v20 }
  0xe4   :  { %1277 = vmatpush1.bf16.msra.mxu1 %v10885_v21  ;;  %v166_v21 = vlaneseq }
  0xe5   :  { %1278 = vmatprep.subr.bf16.mxu1 %v10893_v23  ;;  %v10914_v23 = vld [vmem:[#allocation9] sm:$0xff] }
  0xe6   :  { %1197 = vmatpush1.bf16.msra.mxu0 %v10895_v24  ;;  %v10909_v18 = vshrl.u32 %v166_v21, 7 }
  0xe7   :  { %1207 = vmatprep.subr.bf16.mxu0 %v10903_v19 }
  0xe8   :  { %1279 = vmatpush1.bf16.msra.mxu1 %v10897_v25  ;;  %v10912_v22 = vsub.s32 0, %v10909_v18  ;;  %v10917_v24 = vsub.s32 1, %v10909_v18  ;;  %v10920_v25 = vsub.s32 2, %v10909_v18  ;;  %v10923_v17 = vsub.s32 3, %v10909_v18 }
  0xe9   :  { %1289 = vmatprep.subr.bf16.mxu1 %v10905_v20  ;;  %v10928_v21 = vsub.s32 4, %v10909_v18  ;;  %v10933_v16 = vsub.s32 5, %v10909_v18 }
  0xea   :  { %11482 = vst [vmem:[#allocation51_spill] sm:$0xff] %v10912_v22  ;;  %11483 = vst [vmem:[#allocation52_spill] sm:$0xff] %v10917_v24  ;;  %v169_v20 = vrot.slane %v10914_v23, %v10912_v22  ;;  %v173_v19 = vrot.slane %v10914_v23, %v10917_v24  ;;  %v177_v15 = vrot.slane %v10914_v23, %v10920_v25 }
  0xeb   :  { %11484 = vst [vmem:[#allocation53_spill] sm:$0xff] %v10920_v25  ;;  %11485 = vst [vmem:[#allocation54_spill] sm:$0xff] %v10923_v17  ;;  %v181_v12 = vrot.slane %v10914_v23, %v10923_v17  ;;  %v185_v10 = vrot.slane %v10914_v23, %v10928_v21  ;;  %v189_v24 = vrot.slane %v10914_v23, %v10933_v16 }
  0xec   :  { %11486 = vst [vmem:[#allocation55_spill] sm:$0xff] %v10928_v21  ;;  %11487 = vst [vmem:[#allocation56_spill] sm:$0xff] %v10933_v16 }
 0x178   :  { %v276_v14 = vpop.f32.mrb[0].mxu0 }
 0x179   :  { %v277_v11 = vadd.f32 %v276_v14, %v169_v20  ;;  %v278_v22 = vpop.f32.mrb[1].mxu0 }
 0x17a   :  { %v279_v9 = vadd.f32 %v278_v22, %v173_v19  ;;  %v347_v8 = vpop.f32.mrb[0].mxu1 }
 0x17b   :  { %vm494_vm1 = vcmp.gt.f32.partialorder %v277_v11, 0.0  ;;  %v503_v7 = vmul.f32 %v10937_v13, %v277_v11  ;;  %v348_v25 = vadd.f32 %v347_v8, %v177_v15  ;;  %v349_v5 = vpop.f32.mrb[1].mxu1 }
 0x17c   :  { %vm495_vm2 = vcmp.gt.f32.partialorder %v279_v9, 0.0  ;;  %v504_v6 = vmul.f32 %v10937_v13, %v279_v9  ;;  %v350_v4 = vadd.f32 %v349_v5, %v181_v12  ;;  %v418_v17 = vpop.f32.mrb[2].mxu0  ;;  %v10955_v12 = vld [vmem:[#allocation10 + $0x200] ss:$16 sps:$4 sm:$0xff]  }
 0x17d   :  { %v511_v14 = vsel %vm494_vm1, %v277_v11, %v503_v7  ;;  %vm496_vm3 = vcmp.gt.f32.partialorder %v348_v25, 0.0  ;;  %v505_v20 = vmul.f32 %v10937_v13, %v348_v25  ;;  %v419_v21 = vadd.f32 %v418_v17, %v185_v10  ;;  %v420_v19 = vpop.f32.mrb[3].mxu0  ;;  %v10957_v10 = vld [vmem:[#allocation10 + $0x208] ss:$16 sps:$4 sm:$0xff]   ;;  %v10963_v17 = vld [vmem:[#allocation10 + $0x224] ss:$16 sps:$4 sm:$0xff]  }
 0x17e   :  { %v512_v22 = vsel %vm495_vm2, %v279_v9, %v504_v6  ;;  %vm497_vm4 = vcmp.gt.f32.partialorder %v350_v4, 0.0  ;;  %v506_v16 = vmul.f32 %v10937_v13, %v350_v4  ;;  %v421_v3 = vadd.f32 %v420_v19, %v189_v24  ;;  %v10965_v24 = vld [vmem:[#allocation10 + $0x22c] ss:$16 sps:$4 sm:$0xff]   ;;  %v10987_v19 = vld [vmem:[#allocation10 + $0x240] ss:$16 sps:$4 sm:$0xff]  }
 0x17f   :  { %v10949_v1 = vsel %vm496_vm3, %v348_v25, %v505_v20  ;;  %vm498_vm5 = vcmp.gt.f32.partialorder %v419_v21, 0.0  ;;  %v507_v8 = vmul.f32 %v10937_v13, %v419_v21  ;;  %v10328_v7 = vpack.c.bf16 %v511_v14, %v511_v14  ;;  %v10973_v25 = vld [vmem:[#allocation10 + $0x220] ss:$16 sps:$4 sm:$0xff]   ;;  %v10981_v14 = vld [vmem:[#allocation10 + $0x24c] ss:$16 sps:$4 sm:$0xff]   ;;  %11492 = vst [vmem:[#allocation61_spill] sm:$0xff] %v10987_v19 }
 0x180   :  { %v10952_v15 = vsel %vm497_vm4, %v350_v4, %v506_v16  ;;  %vm499_vm6 = vcmp.gt.f32.partialorder %v421_v3, 0.0  ;;  %v508_v5 = vmul.f32 %v10937_v13, %v421_v3  ;;  %v10329_v11 = vpack.c.bf16 %v512_v22, %v512_v22  ;;  %11491 = vst [vmem:[#allocation60_spill] sm:$0xff] %v10981_v14  ;;  %v10989_v22 = vld [vmem:[#allocation10 + $0x248] ss:$16 sps:$4 sm:$0xff]  }
 0x181   :  { %v9853_v6 = vpack.c.bf16 %v10952_v15, %v10949_v1  ;;  %v10961_v9 = vsel %vm498_vm5, %v419_v21, %v507_v8  ;;  %v10975_v21 = vld [vmem:[#allocation10 + $0x228] ss:$16 sps:$4 sm:$0xff]   ;;  %v11429_v20 = vmov 0   ;;  %11493 = vst [vmem:[#allocation62_spill] sm:$0xff] %v10989_v22  ;;  %v10993_v8 = vld [vmem:[#allocation10 + $0x264] ss:$16 sps:$4 sm:$0xff]  }
 0x182   :  { %11488 = vst [vmem:[#allocation57_spill] sm:$0xff] %v10961_v9  ;;  %v10967_v4 = vsel %vm499_vm6, %v421_v3, %v508_v5  ;;  %1198 = vmatprep.mubr.bf16.mxu0 %v10329_v11  ;;  %1280 = vmatprep.mubr.bf16.mxu1 %v10329_v11  ;;  %v10979_v3 = vld [vmem:[#allocation10 + $0x244] ss:$16 sps:$4 sm:$0xff]   ;;  %11494 = vst [vmem:[#allocation63_spill] sm:$0xff] %v10993_v8  ;;  %v10995_v5 = vld [vmem:[#allocation10 + $0x26c] ss:$16 sps:$4 sm:$0xff]  }
 0x183   :  { %11489 = vst [vmem:[#allocation58_spill] sm:$0xff] %v10967_v4  ;;  %552 = vst [vmem:[#allocation2 + $0x8] sm:$0xff] %v9853_v6  ;;  %v9854_v16 = vpack.c.bf16 %v10967_v4, %v10961_v9  ;;  %1199 = vmatmul.mubr.bf16.vlgmr.msra.gmra.mrb[4].mxu0 %v10328_v7  ;;  %1281 = vmatmul.mubr.bf16.vlgmr.msra.gmra.mrb[4].mxu1 %v10328_v7  ;;  %v10999_v7 = vld [vmem:[#allocation10 + $0x260] ss:$16 sps:$4 sm:$0xff]   ;;  %v11001_v11 = vld [vmem:[#allocation10 + $0x268] ss:$16 sps:$4 sm:$0xff]  }
 0x184   :  { %1208 = vmatpush1.bf16.msra.mxu0 %v10955_v12  ;;  %1290 = vmatpush1.bf16.msra.mxu1 %v10957_v10  ;;  %11490 = vst [vmem:[#allocation59_spill] sm:$0xff] %v10979_v3  ;;  %11495 = vst [vmem:[#allocation64_spill] sm:$0xff] %v10995_v5  ;;  %v11005_v6 = vld [vmem:[#allocation10 + $0x284] ss:$16 sps:$4 sm:$0xff]   ;;  %v11013_v9 = vld [vmem:[#allocation10 + $0x288] ss:$16 sps:$4 sm:$0xff]  }
 0x185   :  { %553 = vst [vmem:[#allocation2 + $0x10] sm:$0xff] %v9854_v16  ;;  %1209 = vmatprep.subr.bf16.mxu0 %v10963_v17  ;;  %1291 = vmatprep.subr.bf16.mxu1 %v10965_v24  ;;  %11496 = vst [vmem:[#allocation65_spill] sm:$0xff] %v10999_v7  ;;  %v11007_v16 = vld [vmem:[#allocation10 + $0x28c] ss:$16 sps:$4 sm:$0xff]   ;;  %v11017_v4 = vld [vmem:[#allocation10 + $0x2a4] ss:$16 sps:$4 sm:$0xff]  }
 0x186   :  { %1239 = vmatprep.mubr.bf16.mxu0 %v11429_v20  ;;  %1321 = vmatprep.mubr.bf16.mxu1 %v11429_v20  ;;  %11497 = vst [vmem:[#allocation66_spill] sm:$0xff] %v11001_v11  ;;  %11498 = vst [vmem:[#allocation67_spill] sm:$0xff] %v11005_v6  ;;  %v11011_v20 = vld [vmem:[#allocation10 + $0x280] ss:$16 sps:$4 sm:$0xff]  }
 0x187   :  { %11499 = vst [vmem:[#allocation68_spill] sm:$0xff] %v11007_v16  ;;  %11500 = vst [vmem:[#allocation69_spill] sm:$0xff] %v11011_v20 }
 0x188   :  { %1210 = vmatpush1.bf16.msra.mxu0 %v10973_v25  ;;  %1292 = vmatpush1.bf16.msra.mxu1 %v10975_v21  ;;  %11501 = vst [vmem:[#allocation70_spill] sm:$0xff] %v11013_v9  ;;  %11502 = vst [vmem:[#allocation71_spill] sm:$0xff] %v11017_v4 }
 0x189   :  { %1211 = vmatprep.subr.bf16.mxu0 %v10979_v3  ;;  %1293 = vmatprep.subr.bf16.mxu1 %v10981_v14  ;;  %v11051_v14 = vld [vmem:[#allocation10 + $0x2ec] ss:$16 sps:$4 sm:$0xff]  }
 0x18c   :  { %1212 = vmatpush1.bf16.msra.mxu0 %v10987_v19  ;;  %1294 = vmatpush1.bf16.msra.mxu1 %v10989_v22  ;;  %v489_v22 = vpop.f32.mrb[2].mxu1  ;;  %v11049_v19 = vld [vmem:[#allocation10 + $0x2e4] ss:$16 sps:$4 sm:$0xff]  }
 0x18d   :  { %1213 = vmatprep.subr.bf16.mxu0 %v10993_v8  ;;  %1295 = vmatprep.subr.bf16.mxu1 %v10995_v5  ;;  %v11019_v8 = vld [vmem:[#allocation10 + $0x2ac] ss:$16 sps:$4 sm:$0xff]   ;;  %v11023_v5 = vld [vmem:[#allocation10 + $0x2a0] ss:$16 sps:$4 sm:$0xff]  }
 0x18e   :  { %11503 = vst [vmem:[#allocation72_spill] sm:$0xff] %v11019_v8  ;;  %11504 = vst [vmem:[#allocation73_spill] sm:$0xff] %v11023_v5 }
 0x190   :  { %1214 = vmatpush1.bf16.msra.mxu0 %v10999_v7  ;;  %1296 = vmatpush1.bf16.msra.mxu1 %v11001_v11  ;;  %v11025_v7 = vld [vmem:[#allocation10 + $0x2a8] ss:$16 sps:$4 sm:$0xff]   ;;  %v11029_v11 = vld [vmem:[#allocation10 + $0x2c4] ss:$16 sps:$4 sm:$0xff]  }
 0x191   :  { %1215 = vmatprep.subr.bf16.mxu0 %v11005_v6  ;;  %1297 = vmatprep.subr.bf16.mxu1 %v11007_v16  ;;  %11505 = vst [vmem:[#allocation74_spill] sm:$0xff] %v11025_v7  ;;  %11506 = vst [vmem:[#allocation75_spill] sm:$0xff] %v11029_v11  ;;  %v11031_v6 = vld [vmem:[#allocation10 + $0x2cc] ss:$16 sps:$4 sm:$0xff]   ;;  %v11034_v16 = vsub.s32 6, %v10909_v18 }
 0x192   :  { %11507 = vst [vmem:[#allocation76_spill] sm:$0xff] %v11031_v6 }
 0x193   :  { %11508 = vst [vmem:[#allocation77_spill] sm:$0xff] %v11034_v16 }
 0x194   :  { %1216 = vmatpush1.bf16.msra.mxu0 %v11011_v20  ;;  %1298 = vmatpush1.bf16.msra.mxu1 %v11013_v9  ;;  %v11038_v9 = vld [vmem:[#allocation10 + $0x2c0] ss:$16 sps:$4 sm:$0xff]   ;;  %v11040_v20 = vld [vmem:[#allocation10 + $0x2c8] ss:$16 sps:$4 sm:$0xff]  }
 0x195   :  { %1217 = vmatprep.subr.bf16.mxu0 %v11017_v4  ;;  %1299 = vmatprep.subr.bf16.mxu1 %v11019_v8  ;;  %11509 = vst [vmem:[#allocation78_spill] sm:$0xff] %v11040_v20  ;;  %v193_v4 = vrot.slane %v10914_v23, %v11034_v16  ;;  %v11045_v8 = vsub.s32 7, %v10909_v18  ;;  %v11057_v16 = vld [vmem:[#allocation10 + $0x2e0] ss:$16 sps:$4 sm:$0xff]   ;;  %v11059_v18 = vld [vmem:[#allocation10 + $0x2e8] ss:$16 sps:$4 sm:$0xff]  }
 0x197   :  { %11510 = vst [vmem:[#allocation79_spill] sm:$0xff] %v11045_v8  ;;  %v197_v3 = vrot.slane %v10914_v23, %v11045_v8  ;;  %v10175_v8 = vld [vmem:[#allocation2 + $0x8] ss:$0 sps:$4 sm:$0xff]  }
 0x198   :  { %1218 = vmatpush1.bf16.msra.mxu0 %v11023_v5  ;;  %1300 = vmatpush1.bf16.msra.mxu1 %v11025_v7  ;;  %v491_v5 = vpop.f32.mrb[3].mxu1  ;;  %v490_v7 = vadd.f32 %v489_v22, %v193_v4 }
 0x199   :  { %1219 = vmatprep.subr.bf16.mxu0 %v11029_v11  ;;  %1301 = vmatprep.subr.bf16.mxu1 %v11031_v6  ;;  %v492_v11 = vadd.f32 %v491_v5, %v197_v3  ;;  %v10330_v3 = vpack.c.bf16 %v10952_v15, %v10952_v15  ;;  %v11552_v15 = vld [vmem:[#allocation73_spill] sm:$0xff] }
 0x19a   :  { %vm500_vm7 = vcmp.gt.f32.partialorder %v490_v7, 0.0  ;;  %v509_v6 = vmul.f32 %v10937_v13, %v490_v7  ;;  %v10180_v5 = vld [vmem:[#allocation10 + $0x8] ss:$16 sps:$4 sm:$0xff]  }
 0x19b   :  { %vm501_vm8 = vcmp.gt.f32.partialorder %v492_v11, 0.0  ;;  %v510_v23 = vmul.f32 %v10937_v13, %v492_v11  ;;  %v11551_v13 = vld [vmem:[#allocation72_spill] sm:$0xff] }
 0x19c   :  { %1220 = vmatpush1.bf16.msra.mxu0 %v11038_v9  ;;  %1302 = vmatpush1.bf16.msra.mxu1 %v11040_v20  ;;  %v517_v4 = vsel %vm500_vm7, %v490_v7, %v509_v6  ;;  %v10185_v7 = vld [vmem:[#allocation10 + $0x24] ss:$16 sps:$4 sm:$0xff]   ;;  %v10188_v6 = vld [vmem:[#allocation10 + $0x2c] ss:$16 sps:$4 sm:$0xff]  }
 0x19d   :  { %1221 = vmatprep.subr.bf16.mxu0 %v11049_v19  ;;  %1303 = vmatprep.subr.bf16.mxu1 %v11051_v14  ;;  %v518_v22 = vsel %vm501_vm8, %v492_v11, %v510_v23  ;;  %v10192_v23 = vld [vmem:[#allocation10 + $0x48] ss:$16 sps:$4 sm:$0xff]  }
 0x19e   :  { %v9855_v20 = vpack.c.bf16 %v518_v22, %v517_v4  ;;  %v10189_v4 = vld [vmem:[#allocation10 + $0x40] ss:$16 sps:$4 sm:$0xff]   ;;  %v10197_v22 = vld [vmem:[#allocation10 + $0x64] ss:$16 sps:$4 sm:$0xff]  }
 0x1a0   :  { %1222 = vmatpush1.bf16.msra.mxu0 %v11057_v16  ;;  %1304 = vmatpush1.bf16.msra.mxu1 %v11059_v18  ;;  %554 = vst [vmem:[#allocation2 + $0x18] sm:$0xff] %v9855_v20  ;;  %v10177_v20 = vld [vmem:[#allocation10] ss:$16 sps:$4 sm:$0xff]  }
 0x1a1   :  { %1972 = vmatprep.subr.bf16.mxu0 %v10707_v26  ;;  %2054 = vmatprep.subr.bf16.mxu1 %v10712_v28  ;;  %v11511_v26 = vld [vmem:[#allocation25_spill] sm:$0xff]  ;;  %v11513_v28 = vld [vmem:[#allocation27_spill] sm:$0xff] }
 0x1a3   :  { %1240 = vmatmul.mubr.bf16.vlgmr.msra.gmra.mrb[4].mxu0 %v10175_v8  ;;  %1322 = vmatmul.mubr.bf16.vlgmr.msra.gmra.mrb[4].mxu1 %v10175_v8  ;;  %v10176_v8 = vld [vmem:[#allocation2 + $0x10] ss:$0 sps:$4 sm:$0xff]  }
 0x1a4   :  { %1973 = vmatpush1.bf16.msra.mxu0 %v10710_v27  ;;  %2004 = vmatprep.mubr.bf16.mxu0 %v10330_v3  ;;  %v11512_v27 = vld [vmem:[#allocation26_spill] sm:$0xff] }
 0x1a5   :  { %2055 = vmatpush1.bf16.msra.mxu1 %v10718_v30  ;;  %2086 = vmatprep.mubr.bf16.mxu1 %v10330_v3  ;;  %v11515_v30 = vld [vmem:[#allocation28_spill] sm:$0xff] }
 0x1a6   :  { %1974 = vmatprep.subr.bf16.mxu0 %v10716_v29  ;;  %2056 = vmatprep.subr.bf16.mxu1 %v10722_v31  ;;  %v11514_v29 = vld [vmem:[#allocation29_spill] sm:$0xff]  ;;  %v11516_v31 = vld [vmem:[#allocation30_spill] sm:$0xff] }
 0x1a7   :  { %v10200_v3 = vld [vmem:[#allocation10 + $0x6c] ss:$16 sps:$4 sm:$0xff]  }
 0x1a8   :  { %1975 = vmatpush1.bf16.msra.mxu0 %v10725_v32  ;;  %v11517_v32 = vld [vmem:[#allocation31_spill] sm:$0xff] }
 0x1a9   :  { %2057 = vmatpush1.bf16.msra.mxu1 %v10732_v34  ;;  %1976 = vmatprep.subr.bf16.mxu0 %v10729_v33  ;;  %v11518_v33 = vld [vmem:[#allocation32_spill] sm:$0xff]  ;;  %v11519_v34 = vld [vmem:[#allocation33_spill] sm:$0xff] }
 0x1aa   :  { %2058 = vmatprep.subr.bf16.mxu1 %v10735_v35  ;;  %v11520_v35 = vld [vmem:[#allocation34_spill] sm:$0xff] }
 0x1ac   :  { %1977 = vmatpush1.bf16.msra.mxu0 %v10738_v36  ;;  %v11521_v36 = vld [vmem:[#allocation35_spill] sm:$0xff] }
 0x1ad   :  { %2059 = vmatpush1.bf16.msra.mxu1 %v10744_v38  ;;  %1978 = vmatprep.subr.bf16.mxu0 %v10741_v37  ;;  %v11522_v37 = vld [vmem:[#allocation36_spill] sm:$0xff]  ;;  %v11523_v38 = vld [vmem:[#allocation37_spill] sm:$0xff] }
 0x1ae   :  { %2060 = vmatprep.subr.bf16.mxu1 %v10747_v39  ;;  %v11524_v39 = vld [vmem:[#allocation38_spill] sm:$0xff] }
 0x1b0   :  { %1979 = vmatpush1.bf16.msra.mxu0 %v10750_v40  ;;  %v11525_v40 = vld [vmem:[#allocation39_spill] sm:$0xff] }
 0x1b1   :  { %2061 = vmatpush1.bf16.msra.mxu1 %v10756_v42  ;;  %1980 = vmatprep.subr.bf16.mxu0 %v10753_v41  ;;  %v11526_v41 = vld [vmem:[#allocation40_spill] sm:$0xff]  ;;  %v11527_v42 = vld [vmem:[#allocation41_spill] sm:$0xff] }
 0x1b2   :  { %2062 = vmatprep.subr.bf16.mxu1 %v10759_v43  ;;  %v11528_v43 = vld [vmem:[#allocation42_spill] sm:$0xff] }
 0x1b4   :  { %1981 = vmatpush1.bf16.msra.mxu0 %v10762_v44  ;;  %v11529_v44 = vld [vmem:[#allocation43_spill] sm:$0xff] }
 0x1b5   :  { %2063 = vmatpush1.bf16.msra.mxu1 %v10768_v46  ;;  %1982 = vmatprep.subr.bf16.mxu0 %v10765_v45  ;;  %v11530_v45 = vld [vmem:[#allocation44_spill] sm:$0xff]  ;;  %v11531_v46 = vld [vmem:[#allocation45_spill] sm:$0xff] }
 0x1b6   :  { %2064 = vmatprep.subr.bf16.mxu1 %v10771_v47  ;;  %v11532_v47 = vld [vmem:[#allocation46_spill] sm:$0xff] }
 0x1b8   :  { %1983 = vmatpush1.bf16.msra.mxu0 %v10774_v48  ;;  %v11533_v48 = vld [vmem:[#allocation47_spill] sm:$0xff] }
 0x1b9   :  { %2065 = vmatpush1.bf16.msra.mxu1 %v10780_v50  ;;  %1984 = vmatprep.subr.bf16.mxu0 %v10777_v49  ;;  %v10331_v49 = vpack.c.bf16 %v10949_v1, %v10949_v1  ;;  %v11534_v50 = vld [vmem:[#allocation48_spill] sm:$0xff]  ;;  %v11549_v1 = vld [vmem:[#allocation70_spill] sm:$0xff] }
 0x1ba   :  { %2066 = vmatprep.subr.bf16.mxu1 %v10783_v51  ;;  %v11535_v51 = vld [vmem:[#allocation49_spill] sm:$0xff] }
 0x1bc   :  { %1985 = vmatpush1.bf16.msra.mxu0 %v10786_v52  ;;  %v11536_v52 = vld [vmem:[#allocation50_spill] sm:$0xff] }
 0x1bd   :  { %2067 = vmatpush1.bf16.msra.mxu1 %v10792_v54  ;;  %1986 = vmatprep.subr.bf16.mxu0 %v10789_v53  ;;  %v11537_v53 = vmov 0   ;;  %v11538_v54 = vld [vmem:[#allocation59_spill] sm:$0xff] }
 0x1be   :  { %2068 = vmatprep.subr.bf16.mxu1 %v10795_v55  ;;  %v11539_v55 = vld [vmem:[#allocation60_spill] sm:$0xff] }
 0x1c0   :  { %1987 = vmatpush1.bf16.msra.mxu0 %v10798_v56  ;;  %v11540_v56 = vld [vmem:[#allocation61_spill] sm:$0xff] }
 0x1c1   :  { %2069 = vmatpush1.bf16.msra.mxu1 %v10801_v57  ;;  %1988 = vmatprep.subr.bf16.mxu0 %v10803_v58  ;;  %v11541_v57 = vld [vmem:[#allocation62_spill] sm:$0xff]  ;;  %v11542_v58 = vld [vmem:[#allocation63_spill] sm:$0xff] }
 0x1c2   :  { %2070 = vmatprep.subr.bf16.mxu1 %v10805_v59  ;;  %v11543_v59 = vld [vmem:[#allocation64_spill] sm:$0xff] }
 0x1c4   :  { %1989 = vmatpush1.bf16.msra.mxu0 %v10808_v60  ;;  %v11544_v60 = vld [vmem:[#allocation65_spill] sm:$0xff] }
 0x1c5   :  { %2071 = vmatpush1.bf16.msra.mxu1 %v10814_v62  ;;  %1990 = vmatprep.subr.bf16.mxu0 %v10811_v61  ;;  %v11545_v61 = vld [vmem:[#allocation66_spill] sm:$0xff]  ;;  %v11546_v62 = vld [vmem:[#allocation67_spill] sm:$0xff] }
 0x1c6   :  { %2072 = vmatprep.subr.bf16.mxu1 %v10817_v63  ;;  %v11547_v63 = vld [vmem:[#allocation68_spill] sm:$0xff] }
 0x1c8   :  { %1991 = vmatpush1.bf16.msra.mxu0 %v10820_v0  ;;  %v11548_v0 = vld [vmem:[#allocation69_spill] sm:$0xff] }
 0x1c9   :  { %2073 = vmatpush1.bf16.msra.mxu1 %v10826_v2  ;;  %1992 = vmatprep.subr.bf16.mxu0 %v11511_v26  ;;  %v11550_v2 = vld [vmem:[#allocation71_spill] sm:$0xff]  ;;  %v10195_v26 = vld [vmem:[#allocation10 + $0x60] ss:$16 sps:$4 sm:$0xff]  }
 0x1ca   :  { %2074 = vmatprep.subr.bf16.mxu1 %v11512_v27  ;;  %v10198_v27 = vld [vmem:[#allocation10 + $0x68] ss:$16 sps:$4 sm:$0xff]  }
 0x1cc   :  { %1993 = vmatpush1.bf16.msra.mxu0 %v11513_v28  ;;  %v10203_v28 = vld [vmem:[#allocation10 + $0x84] ss:$16 sps:$4 sm:$0xff]  }
 0x1cd   :  { %2075 = vmatpush1.bf16.msra.mxu1 %v11514_v29  ;;  %1994 = vmatprep.subr.bf16.mxu0 %v11515_v30  ;;  %v10206_v29 = vld [vmem:[#allocation10 + $0x8c] ss:$16 sps:$4 sm:$0xff]   ;;  %v10201_v30 = vld [vmem:[#allocation10 + $0x80] ss:$16 sps:$4 sm:$0xff]  }
 0x1ce   :  { %2076 = vmatprep.subr.bf16.mxu1 %v11516_v31  ;;  %v10204_v31 = vld [vmem:[#allocation10 + $0x88] ss:$16 sps:$4 sm:$0xff]  }
 0x1d0   :  { %1995 = vmatpush1.bf16.msra.mxu0 %v11517_v32  ;;  %v10209_v32 = vld [vmem:[#allocation10 + $0xa4] ss:$16 sps:$4 sm:$0xff]  }
 0x1d1   :  { %2077 = vmatpush1.bf16.msra.mxu1 %v11518_v33  ;;  %1996 = vmatprep.subr.bf16.mxu0 %v11519_v34  ;;  %v10212_v33 = vld [vmem:[#allocation10 + $0xac] ss:$16 sps:$4 sm:$0xff]   ;;  %v10207_v34 = vld [vmem:[#allocation10 + $0xa0] ss:$16 sps:$4 sm:$0xff]  }
 0x1d2   :  { %2078 = vmatprep.subr.bf16.mxu1 %v11520_v35  ;;  %v10210_v35 = vld [vmem:[#allocation10 + $0xa8] ss:$16 sps:$4 sm:$0xff]  }
 0x1d4   :  { %1997 = vmatpush1.bf16.msra.mxu0 %v11521_v36  ;;  %v10215_v36 = vld [vmem:[#allocation10 + $0xc4] ss:$16 sps:$4 sm:$0xff]  }
 0x1d5   :  { %2079 = vmatpush1.bf16.msra.mxu1 %v11522_v37  ;;  %1998 = vmatprep.subr.bf16.mxu0 %v11523_v38  ;;  %v10218_v37 = vld [vmem:[#allocation10 + $0xcc] ss:$16 sps:$4 sm:$0xff]   ;;  %v10213_v38 = vld [vmem:[#allocation10 + $0xc0] ss:$16 sps:$4 sm:$0xff]  }
 0x1d6   :  { %2080 = vmatprep.subr.bf16.mxu1 %v11524_v39  ;;  %v10216_v39 = vld [vmem:[#allocation10 + $0xc8] ss:$16 sps:$4 sm:$0xff]  }
 0x1d8   :  { %1999 = vmatpush1.bf16.msra.mxu0 %v11525_v40  ;;  %v10221_v40 = vld [vmem:[#allocation10 + $0xe4] ss:$16 sps:$4 sm:$0xff]  }
 0x1d9   :  { %2081 = vmatpush1.bf16.msra.mxu1 %v11526_v41  ;;  %2000 = vmatprep.subr.bf16.mxu0 %v11527_v42  ;;  %v10224_v41 = vld [vmem:[#allocation10 + $0xec] ss:$16 sps:$4 sm:$0xff]   ;;  %v10219_v42 = vld [vmem:[#allocation10 + $0xe0] ss:$16 sps:$4 sm:$0xff]  }
 0x1da   :  { %2082 = vmatprep.subr.bf16.mxu1 %v11528_v43  ;;  %v10222_v43 = vld [vmem:[#allocation10 + $0xe8] ss:$16 sps:$4 sm:$0xff]  }
 0x1dc   :  { %2001 = vmatpush1.bf16.msra.mxu0 %v11529_v44  ;;  %v10227_v44 = vld [vmem:[#allocation10 + $0x104] ss:$16 sps:$4 sm:$0xff]  }
 0x1dd   :  { %2083 = vmatpush1.bf16.msra.mxu1 %v11530_v45  ;;  %2002 = vmatprep.subr.bf16.mxu0 %v11531_v46  ;;  %v10230_v45 = vld [vmem:[#allocation10 + $0x10c] ss:$16 sps:$4 sm:$0xff]   ;;  %v10225_v46 = vld [vmem:[#allocation10 + $0x100] ss:$16 sps:$4 sm:$0xff]  }
 0x1de   :  { %2084 = vmatprep.subr.bf16.mxu1 %v11532_v47  ;;  %v10228_v47 = vld [vmem:[#allocation10 + $0x108] ss:$16 sps:$4 sm:$0xff]  }
 0x1e0   :  { %2003 = vmatpush1.bf16.msra.mxu0 %v11533_v48  ;;  %v10233_v48 = vld [vmem:[#allocation10 + $0x124] ss:$16 sps:$4 sm:$0xff]  }
 0x1e1   :  { %2085 = vmatpush1.bf16.msra.mxu1 %v11534_v50  ;;  %2013 = vmatprep.subr.bf16.mxu0 %v11535_v51  ;;  %v10231_v50 = vld [vmem:[#allocation10 + $0x120] ss:$16 sps:$4 sm:$0xff]   ;;  %v10234_v51 = vld [vmem:[#allocation10 + $0x128] ss:$16 sps:$4 sm:$0xff]  }
 0x1e2   :  { %2095 = vmatprep.subr.bf16.mxu1 %v11536_v52  ;;  %v10239_v52 = vld [vmem:[#allocation10 + $0x144] ss:$16 sps:$4 sm:$0xff]  }
 0x1e3   :  { %2005 = vmatmul.mubr.bf16.vlgmr.msra.gmra.mrb[8].mxu0 %v10331_v49 }
 0x1e4   :  { %2087 = vmatmul.mubr.bf16.vlgmr.msra.gmra.mrb[8].mxu1 %v10331_v49  ;;  %2014 = vmatpush1.bf16.msra.mxu0 %v10955_v12  ;;  %v11553_v12 = vld [vmem:[#allocation74_spill] sm:$0xff] }
 0x1e5   :  { %2096 = vmatpush1.bf16.msra.mxu1 %v10957_v10  ;;  %2015 = vmatprep.subr.bf16.mxu0 %v10963_v17  ;;  %v11554_v10 = vld [vmem:[#allocation75_spill] sm:$0xff]  ;;  %v11555_v17 = vld [vmem:[#allocation76_spill] sm:$0xff] }
 0x1e6   :  { %2097 = vmatprep.subr.bf16.mxu1 %v10965_v24  ;;  %2045 = vmatprep.mubr.bf16.mxu0 %v11537_v53  ;;  %v11556_v24 = vld [vmem:[#allocation78_spill] sm:$0xff] }
 0x1e7   :  { %2127 = vmatprep.mubr.bf16.mxu1 %v11537_v53  ;;  %v10236_v49 = vld [vmem:[#allocation10 + $0x12c] ss:$16 sps:$4 sm:$0xff]  }
 0x1e8   :  { %2016 = vmatpush1.bf16.msra.mxu0 %v10973_v25  ;;  %v10179_v25 = vld [vmem:[#allocation10 + $0x4] ss:$16 sps:$4 sm:$0xff]  }
 0x1e9   :  { %2098 = vmatpush1.bf16.msra.mxu1 %v10975_v21  ;;  %2017 = vmatprep.subr.bf16.mxu0 %v11538_v54  ;;  %v10182_v21 = vld [vmem:[#allocation10 + $0xc] ss:$16 sps:$4 sm:$0xff]  }
 0x1ea   :  { %2099 = vmatprep.subr.bf16.mxu1 %v11539_v55  ;;  %v10242_v54 = vld [vmem:[#allocation10 + $0x14c] ss:$16 sps:$4 sm:$0xff]   ;;  %v10237_v55 = vld [vmem:[#allocation10 + $0x140] ss:$16 sps:$4 sm:$0xff]  }
 0x1ec   :  { %2018 = vmatpush1.bf16.msra.mxu0 %v11540_v56  ;;  %v10240_v56 = vld [vmem:[#allocation10 + $0x148] ss:$16 sps:$4 sm:$0xff]  }
 0x1ed   :  { %2100 = vmatpush1.bf16.msra.mxu1 %v11541_v57  ;;  %2019 = vmatprep.subr.bf16.mxu0 %v11542_v58  ;;  %v10245_v57 = vld [vmem:[#allocation10 + $0x164] ss:$16 sps:$4 sm:$0xff]   ;;  %v10248_v58 = vld [vmem:[#allocation10 + $0x16c] ss:$16 sps:$4 sm:$0xff]  }
 0x1ee   :  { %2101 = vmatprep.subr.bf16.mxu1 %v11543_v59  ;;  %v10243_v59 = vld [vmem:[#allocation10 + $0x160] ss:$16 sps:$4 sm:$0xff]  }
 0x1f0   :  { %2020 = vmatpush1.bf16.msra.mxu0 %v11544_v60  ;;  %v10246_v60 = vld [vmem:[#allocation10 + $0x168] ss:$16 sps:$4 sm:$0xff]  }
 0x1f1   :  { %2102 = vmatpush1.bf16.msra.mxu1 %v11545_v61  ;;  %2021 = vmatprep.subr.bf16.mxu0 %v11546_v62  ;;  %v10251_v61 = vld [vmem:[#allocation10 + $0x184] ss:$16 sps:$4 sm:$0xff]   ;;  %v10254_v62 = vld [vmem:[#allocation10 + $0x18c] ss:$16 sps:$4 sm:$0xff]  }
 0x1f2   :  { %2103 = vmatprep.subr.bf16.mxu1 %v11547_v63  ;;  %v10249_v63 = vld [vmem:[#allocation10 + $0x180] ss:$16 sps:$4 sm:$0xff]  }
 0x1f4   :  { %2022 = vmatpush1.bf16.msra.mxu0 %v11548_v0  ;;  %v10252_v0 = vld [vmem:[#allocation10 + $0x188] ss:$16 sps:$4 sm:$0xff]  }
 0x1f5   :  { %2104 = vmatpush1.bf16.msra.mxu1 %v11549_v1  ;;  %2023 = vmatprep.subr.bf16.mxu0 %v11550_v2  ;;  %v10257_v1 = vld [vmem:[#allocation10 + $0x1a4] ss:$16 sps:$4 sm:$0xff]   ;;  %v10260_v2 = vld [vmem:[#allocation10 + $0x1ac] ss:$16 sps:$4 sm:$0xff]  }
 0x1f6   :  { %2105 = vmatprep.subr.bf16.mxu1 %v11551_v13  ;;  %v10255_v13 = vld [vmem:[#allocation10 + $0x1a0] ss:$16 sps:$4 sm:$0xff]  }
 0x1f8   :  { %2024 = vmatpush1.bf16.msra.mxu0 %v11552_v15  ;;  %v10258_v15 = vld [vmem:[#allocation10 + $0x1a8] ss:$16 sps:$4 sm:$0xff]  }
 0x1f9   :  { %2106 = vmatpush1.bf16.msra.mxu1 %v11553_v12  ;;  %2025 = vmatprep.subr.bf16.mxu0 %v11554_v10  ;;  %v10263_v12 = vld [vmem:[#allocation10 + $0x1c4] ss:$16 sps:$4 sm:$0xff]   ;;  %v10266_v10 = vld [vmem:[#allocation10 + $0x1cc] ss:$16 sps:$4 sm:$0xff]  }
 0x1fa   :  { %2107 = vmatprep.subr.bf16.mxu1 %v11555_v17  ;;  %v10261_v17 = vld [vmem:[#allocation10 + $0x1c0] ss:$16 sps:$4 sm:$0xff]  }
 0x1fc   :  { %2026 = vmatpush1.bf16.msra.mxu0 %v11038_v9  ;;  %v11557_v9 = vld [vmem:[#allocation58_spill] sm:$0xff] }
 0x1fd   :  { %2108 = vmatpush1.bf16.msra.mxu1 %v11556_v24  ;;  %2027 = vmatprep.subr.bf16.mxu0 %v11049_v19  ;;  %v10332_v11 = vpack.c.bf16 %v11557_v9, %v11557_v9  ;;  %v10183_v19 = vld [vmem:[#allocation10 + $0x20] ss:$16 sps:$4 sm:$0xff]   ;;  %v10264_v24 = vld [vmem:[#allocation10 + $0x1c8] ss:$16 sps:$4 sm:$0xff]  }
 0x1fe   :  { %2109 = vmatprep.subr.bf16.mxu1 %v11051_v14  ;;  %v10186_v14 = vld [vmem:[#allocation10 + $0x28] ss:$16 sps:$4 sm:$0xff]   ;;  %v10273_v9 = vld [vmem:[#allocation10 + $0x200] ss:$16 sps:$4 sm:$0xff]  }
 0x200   :  { %2028 = vmatpush1.bf16.msra.mxu0 %v11057_v16  ;;  %v10191_v16 = vld [vmem:[#allocation10 + $0x44] ss:$16 sps:$4 sm:$0xff]  }
 0x201   :  { %2110 = vmatpush1.bf16.msra.mxu1 %v11059_v18  ;;  %2777 = vmatprep.subr.bf16.mxu0 %v10179_v25  ;;  %v10194_v18 = vld [vmem:[#allocation10 + $0x4c] ss:$16 sps:$4 sm:$0xff]   ;;  %v10269_v25 = vld [vmem:[#allocation10 + $0x1e4] ss:$16 sps:$4 sm:$0xff]  }
 0x202   :  { %2859 = vmatprep.subr.bf16.mxu1 %v10182_v21  ;;  %v10272_v21 = vld [vmem:[#allocation10 + $0x1ec] ss:$16 sps:$4 sm:$0xff]  }
 0x203   :  { %2046 = vmatmul.mubr.bf16.vlgmr.msra.gmra.mrb[8].mxu0 %v10176_v8 }
 0x204   :  { %2128 = vmatmul.mubr.bf16.vlgmr.msra.gmra.mrb[8].mxu1 %v10176_v8  ;;  %2778 = vmatpush1.bf16.msra.mxu0 %v10177_v20  ;;  %v10267_v20 = vld [vmem:[#allocation10 + $0x1e0] ss:$16 sps:$4 sm:$0xff]   ;;  %v10270_v8 = vld [vmem:[#allocation10 + $0x1e8] ss:$16 sps:$4 sm:$0xff]  }
 0x205   :  { %2809 = vmatprep.mubr.bf16.mxu0 %v10332_v11  ;;  %2860 = vmatpush1.bf16.msra.mxu1 %v10180_v5  ;;  %v10275_v5 = vld [vmem:[#allocation10 + $0x204] ss:$16 sps:$4 sm:$0xff]  }
 0x206   :  { %2891 = vmatprep.mubr.bf16.mxu1 %v10332_v11  ;;  %2779 = vmatprep.subr.bf16.mxu0 %v10185_v7  ;;  %v10278_v7 = vld [vmem:[#allocation10 + $0x20c] ss:$16 sps:$4 sm:$0xff]   ;;  %v11558_v11 = vld [vmem:[#allocation57_spill] sm:$0xff] }
 0x207   :  { %2861 = vmatprep.subr.bf16.mxu1 %v10188_v6  ;;  %v10333_v6 = vpack.c.bf16 %v11558_v11, %v11558_v11  ;;  %v3010_v11 = vld [vmem:[#allocation13 + $0x108] sm:$0xff] }
 0x208   :  { %2780 = vmatpush1.bf16.msra.mxu0 %v10183_v19  ;;  %v10276_v19 = vld [vmem:[#allocation10 + $0x208] ss:$16 sps:$4 sm:$0xff]  }
 0x209   :  { %2862 = vmatpush1.bf16.msra.mxu1 %v10186_v14  ;;  %2781 = vmatprep.subr.bf16.mxu0 %v10191_v16  ;;  %v10281_v14 = vld [vmem:[#allocation10 + $0x224] ss:$16 sps:$4 sm:$0xff]   ;;  %v10284_v16 = vld [vmem:[#allocation10 + $0x22c] ss:$16 sps:$4 sm:$0xff]  }
 0x20a   :  { %2863 = vmatprep.subr.bf16.mxu1 %v10194_v18  ;;  %v10279_v18 = vld [vmem:[#allocation10 + $0x220] ss:$16 sps:$4 sm:$0xff]  }
 0x20c   :  { %2782 = vmatpush1.bf16.msra.mxu0 %v10189_v4  ;;  %v10282_v4 = vld [vmem:[#allocation10 + $0x228] ss:$16 sps:$4 sm:$0xff]  }
 0x20d   :  { %2864 = vmatpush1.bf16.msra.mxu1 %v10192_v23  ;;  %2783 = vmatprep.subr.bf16.mxu0 %v10197_v22  ;;  %v10287_v23 = vld [vmem:[#allocation10 + $0x244] ss:$16 sps:$4 sm:$0xff]   ;;  %v10290_v22 = vld [vmem:[#allocation10 + $0x24c] ss:$16 sps:$4 sm:$0xff]  }
 0x20e   :  { %2865 = vmatprep.subr.bf16.mxu1 %v10200_v3  ;;  %v10285_v3 = vld [vmem:[#allocation10 + $0x240] ss:$16 sps:$4 sm:$0xff]  }
 0x210   :  { %2784 = vmatpush1.bf16.msra.mxu0 %v10195_v26  ;;  %v10288_v26 = vld [vmem:[#allocation10 + $0x248] ss:$16 sps:$4 sm:$0xff]  }
 0x211   :  { %2866 = vmatpush1.bf16.msra.mxu1 %v10198_v27  ;;  %2785 = vmatprep.subr.bf16.mxu0 %v10203_v28  ;;  %v10293_v27 = vld [vmem:[#allocation10 + $0x264] ss:$16 sps:$4 sm:$0xff]   ;;  %v10296_v28 = vld [vmem:[#allocation10 + $0x26c] ss:$16 sps:$4 sm:$0xff]  }
 0x212   :  { %2867 = vmatprep.subr.bf16.mxu1 %v10206_v29  ;;  %v10291_v29 = vld [vmem:[#allocation10 + $0x260] ss:$16 sps:$4 sm:$0xff]  }
 0x214   :  { %2786 = vmatpush1.bf16.msra.mxu0 %v10201_v30  ;;  %v10294_v30 = vld [vmem:[#allocation10 + $0x268] ss:$16 sps:$4 sm:$0xff]  }
 0x215   :  { %2868 = vmatpush1.bf16.msra.mxu1 %v10204_v31  ;;  %2787 = vmatprep.subr.bf16.mxu0 %v10209_v32  ;;  %v10299_v31 = vld [vmem:[#allocation10 + $0x284] ss:$16 sps:$4 sm:$0xff]   ;;  %v10302_v32 = vld [vmem:[#allocation10 + $0x28c] ss:$16 sps:$4 sm:$0xff]  }
 0x216   :  { %2869 = vmatprep.subr.bf16.mxu1 %v10212_v33  ;;  %v10297_v33 = vld [vmem:[#allocation10 + $0x280] ss:$16 sps:$4 sm:$0xff]  }
 0x218   :  { %2788 = vmatpush1.bf16.msra.mxu0 %v10207_v34  ;;  %v10305_v34 = vld [vmem:[#allocation10 + $0x2a4] ss:$16 sps:$4 sm:$0xff]  }
 0x219   :  { %2870 = vmatpush1.bf16.msra.mxu1 %v10210_v35  ;;  %2789 = vmatprep.subr.bf16.mxu0 %v10215_v36  ;;  %v10308_v35 = vld [vmem:[#allocation10 + $0x2ac] ss:$16 sps:$4 sm:$0xff]   ;;  %v10303_v36 = vld [vmem:[#allocation10 + $0x2a0] ss:$16 sps:$4 sm:$0xff]  }
 0x21a   :  { %2871 = vmatprep.subr.bf16.mxu1 %v10218_v37  ;;  %v10306_v37 = vld [vmem:[#allocation10 + $0x2a8] ss:$16 sps:$4 sm:$0xff]  }
 0x21c   :  { %2790 = vmatpush1.bf16.msra.mxu0 %v10213_v38  ;;  %v10311_v38 = vld [vmem:[#allocation10 + $0x2c4] ss:$16 sps:$4 sm:$0xff]  }
 0x21d   :  { %2872 = vmatpush1.bf16.msra.mxu1 %v10216_v39  ;;  %2791 = vmatprep.subr.bf16.mxu0 %v10221_v40  ;;  %v10314_v39 = vld [vmem:[#allocation10 + $0x2cc] ss:$16 sps:$4 sm:$0xff]   ;;  %v10309_v40 = vld [vmem:[#allocation10 + $0x2c0] ss:$16 sps:$4 sm:$0xff]  }
 0x21e   :  { %2873 = vmatprep.subr.bf16.mxu1 %v10224_v41  ;;  %v10312_v41 = vld [vmem:[#allocation10 + $0x2c8] ss:$16 sps:$4 sm:$0xff]  }
 0x220   :  { %2792 = vmatpush1.bf16.msra.mxu0 %v10219_v42  ;;  %v10317_v42 = vld [vmem:[#allocation10 + $0x2e4] ss:$16 sps:$4 sm:$0xff]  }
 0x221   :  { %2874 = vmatpush1.bf16.msra.mxu1 %v10222_v43  ;;  %2793 = vmatprep.subr.bf16.mxu0 %v10227_v44  ;;  %v10320_v43 = vld [vmem:[#allocation10 + $0x2ec] ss:$16 sps:$4 sm:$0xff]   ;;  %v2977_v44 = vld [vmem:[#allocation13] sm:$0xff] }
 0x222   :  { %2875 = vmatprep.subr.bf16.mxu1 %v10230_v45  ;;  %v2981_v45 = vld [vmem:[#allocation13 + $0x20] sm:$0xff] }
 0x224   :  { %2794 = vmatpush1.bf16.msra.mxu0 %v10225_v46  ;;  %v2978_v46 = vld [vmem:[#allocation13 + $0x8] sm:$0xff] }
 0x225   :  { %2876 = vmatpush1.bf16.msra.mxu1 %v10228_v47  ;;  %2795 = vmatprep.subr.bf16.mxu0 %v10233_v48  ;;  %v2982_v47 = vld [vmem:[#allocation13 + $0x28] sm:$0xff] }
 0x226   :  { %2877 = vmatprep.subr.bf16.mxu1 %v10236_v49  ;;  %v10315_v48 = vld [vmem:[#allocation10 + $0x2e0] ss:$16 sps:$4 sm:$0xff]   ;;  %v10318_v49 = vld [vmem:[#allocation10 + $0x2e8] ss:$16 sps:$4 sm:$0xff]  }
 0x228   :  { %2796 = vmatpush1.bf16.msra.mxu0 %v10231_v50  ;;  %v9084_v50 = vcombine.high %v2977_v44, %v2981_v45 }
 0x229   :  { %2878 = vmatpush1.bf16.msra.mxu1 %v10234_v51  ;;  %2797 = vmatprep.subr.bf16.mxu0 %v10239_v52  ;;  %v9086_v51 = vcombine.high %v2978_v46, %v2982_v47  ;;  %v2985_v52 = vld [vmem:[#allocation13 + $0x40] sm:$0xff] }
 0x22a   :  { %2879 = vmatprep.subr.bf16.mxu1 %v10242_v54  ;;  %v2989_v54 = vld [vmem:[#allocation13 + $0x60] sm:$0xff] }
 0x22c   :  { %2798 = vmatpush1.bf16.msra.mxu0 %v10237_v55  ;;  %v2986_v55 = vld [vmem:[#allocation13 + $0x48] sm:$0xff] }
 0x22d   :  { %2880 = vmatpush1.bf16.msra.mxu1 %v10240_v56  ;;  %2799 = vmatprep.subr.bf16.mxu0 %v10245_v57  ;;  %v2990_v56 = vld [vmem:[#allocation13 + $0x68] sm:$0xff]  ;;  %v9083_v57 = vcombine.low %v2977_v44, %v2981_v45  ;;  %v3033_v44 = vld [vmem:[#allocation13 + $0x1c0] sm:$0xff] }
 0x22e   :  { %2881 = vmatprep.subr.bf16.mxu1 %v10248_v58  ;;  %v10321_v58 = vld [vmem:[#allocation2 + $0x18] ss:$0 sps:$4 sm:$0xff]  }
 0x22f   :  { %v3037_v45 = vld [vmem:[#allocation13 + $0x1e0] sm:$0xff] }
 0x230   :  { %2800 = vmatpush1.bf16.msra.mxu0 %v10243_v59  ;;  %v9085_v59 = vcombine.low %v2978_v46, %v2982_v47  ;;  %v11183_v46 = vstv %s8757_s8 }
 0x231   :  { %2882 = vmatpush1.bf16.msra.mxu1 %v10246_v60  ;;  %2801 = vmatprep.subr.bf16.mxu0 %v10251_v61  ;;  %v9092_v60 = vcombine.high %v2985_v52, %v2989_v54  ;;  %v9094_v61 = vcombine.high %v2986_v55, %v2990_v56 }
 0x232   :  { %2883 = vmatprep.subr.bf16.mxu1 %v10254_v62  ;;  %v2993_v62 = vld [vmem:[#allocation13 + $0x80] sm:$0xff] }
 0x234   :  { %2802 = vmatpush1.bf16.msra.mxu0 %v10249_v63  ;;  %v2997_v63 = vld [vmem:[#allocation13 + $0xa0] sm:$0xff] }
 0x235   :  { %2884 = vmatpush1.bf16.msra.mxu1 %v10252_v0  ;;  %2803 = vmatprep.subr.bf16.mxu0 %v10257_v1  ;;  %v2994_v0 = vld [vmem:[#allocation13 + $0x88] sm:$0xff] }
 0x236   :  { %2885 = vmatprep.subr.bf16.mxu1 %v10260_v2  ;;  %v2998_v1 = vld [vmem:[#allocation13 + $0xa8] sm:$0xff]  ;;  %v9091_v2 = vcombine.low %v2985_v52, %v2989_v54 }
 0x238   :  { %2804 = vmatpush1.bf16.msra.mxu0 %v10255_v13  ;;  %v9093_v13 = vcombine.low %v2986_v55, %v2990_v56 }
 0x239   :  { %2886 = vmatpush1.bf16.msra.mxu1 %v10258_v15  ;;  %2805 = vmatprep.subr.bf16.mxu0 %v10263_v12  ;;  %v9100_v15 = vcombine.high %v2993_v62, %v2997_v63  ;;  %v9102_v12 = vcombine.high %v2994_v0, %v2998_v1 }
 0x23a   :  { %2887 = vmatprep.subr.bf16.mxu1 %v10266_v10  ;;  %v3001_v10 = vld [vmem:[#allocation13 + $0xc0] sm:$0xff] }
 0x23c   :  { %2806 = vmatpush1.bf16.msra.mxu0 %v10261_v17  ;;  %v3005_v17 = vld [vmem:[#allocation13 + $0xe0] sm:$0xff] }
 0x23d   :  { %2888 = vmatpush1.bf16.msra.mxu1 %v10264_v24  ;;  %2807 = vmatprep.subr.bf16.mxu0 %v10269_v25  ;;  %v3002_v24 = vld [vmem:[#allocation13 + $0xc8] sm:$0xff] }
 0x23e   :  { %2889 = vmatprep.subr.bf16.mxu1 %v10272_v21  ;;  %v3006_v25 = vld [vmem:[#allocation13 + $0xe8] sm:$0xff]  ;;  %v9099_v21 = vcombine.low %v2993_v62, %v2997_v63  ;;  %v3041_v63 = vld [vmem:[#allocation13 + $0x200] sm:$0xff] }
 0x240   :  { %2808 = vmatpush1.bf16.msra.mxu0 %v10267_v20  ;;  %v9101_v20 = vcombine.low %v2994_v0, %v2998_v1  ;;  %v3045_v0 = vld [vmem:[#allocation13 + $0x220] sm:$0xff]  ;;  %v3042_v1 = vld [vmem:[#allocation13 + $0x208] sm:$0xff] }
 0x241   :  { %2890 = vmatpush1.bf16.msra.mxu1 %v10270_v8  ;;  %2818 = vmatprep.subr.bf16.mxu0 %v10275_v5  ;;  %v9108_v8 = vcombine.high %v3001_v10, %v3005_v17  ;;  %v9110_v5 = vcombine.high %v3002_v24, %v3006_v25 }
 0x242   :  { %2900 = vmatprep.subr.bf16.mxu1 %v10278_v7  ;;  %v3009_v7 = vld [vmem:[#allocation13 + $0x100] sm:$0xff] }
 0x243   :  { %2810 = vmatmul.mubr.bf16.vlgmr.msra.gmra.mrb[12].mxu0 %v10333_v6 }
 0x244   :  { %2892 = vmatmul.mubr.bf16.vlgmr.msra.gmra.mrb[12].mxu1 %v10333_v6  ;;  %2819 = vmatpush1.bf16.msra.mxu0 %v10273_v9  ;;  %v3013_v9 = vld [vmem:[#allocation13 + $0x120] sm:$0xff]  ;;  %v3014_v6 = vld [vmem:[#allocation13 + $0x128] sm:$0xff] }
 0x245   :  { %2901 = vmatpush1.bf16.msra.mxu1 %v10276_v19  ;;  %2820 = vmatprep.subr.bf16.mxu0 %v10281_v14  ;;  %v9107_v19 = vcombine.low %v3001_v10, %v3005_v17  ;;  %v9109_v14 = vcombine.low %v3002_v24, %v3006_v25  ;;  %v9148_v17 = vcombine.high %v3041_v63, %v3045_v0  ;;  %v3049_v25 = vld [vmem:[#allocation13 + $0x240] sm:$0xff] }
 0x246   :  { %2902 = vmatprep.subr.bf16.mxu1 %v10284_v16  ;;  %2850 = vmatprep.mubr.bf16.mxu0 %v11537_v53  ;;  %v9116_v16 = vcombine.high %v3009_v7, %v3013_v9 }
 0x247   :  { %2932 = vmatprep.mubr.bf16.mxu1 %v11537_v53  ;;  %v10300_v53 = vld [vmem:[#allocation10 + $0x288] ss:$16 sps:$4 sm:$0xff]  }
 0x248   :  { %2821 = vmatpush1.bf16.msra.mxu0 %v10279_v18  ;;  %v9118_v18 = vcombine.high %v3010_v11, %v3014_v6 }
 0x249   :  { %2903 = vmatpush1.bf16.msra.mxu1 %v10282_v4  ;;  %2822 = vmatprep.subr.bf16.mxu0 %v10287_v23  ;;  %v3017_v4 = vld [vmem:[#allocation13 + $0x140] sm:$0xff] }
 0x24a   :  { %2904 = vmatprep.subr.bf16.mxu1 %v10290_v22  ;;  %v3021_v23 = vld [vmem:[#allocation13 + $0x160] sm:$0xff]  ;;  %v3018_v22 = vld [vmem:[#allocation13 + $0x148] sm:$0xff] }
 0x24c   :  { %2823 = vmatpush1.bf16.msra.mxu0 %v10285_v3  ;;  %v3022_v3 = vld [vmem:[#allocation13 + $0x168] sm:$0xff] }
 0x24d   :  { %2905 = vmatpush1.bf16.msra.mxu1 %v10288_v26  ;;  %2824 = vmatprep.subr.bf16.mxu0 %v10293_v27  ;;  %v9115_v26 = vcombine.low %v3009_v7, %v3013_v9  ;;  %v11175_v27 = vld [vmem:[#allocation12] sm:$0xf] }
 0x24e   :  { %2906 = vmatprep.subr.bf16.mxu1 %v10296_v28  ;;  %v9117_v28 = vcombine.low %v3010_v11, %v3014_v6  ;;  %v3057_v6 = vld [vmem:[#allocation13 + $0x280] sm:$0xff] }
 0x250   :  { %2825 = vmatpush1.bf16.msra.mxu0 %v10291_v29  ;;  %v9124_v29 = vcombine.high %v3017_v4, %v3021_v23 }
 0x251   :  { %2907 = vmatpush1.bf16.msra.mxu1 %v10294_v30  ;;  %2826 = vmatprep.subr.bf16.mxu0 %v10299_v31  ;;  %v9126_v30 = vcombine.high %v3018_v22, %v3022_v3  ;;  %v3025_v31 = vld [vmem:[#allocation13 + $0x180] sm:$0xff] }
 0x252   :  { %2908 = vmatprep.subr.bf16.mxu1 %v10302_v32  ;;  %v3029_v32 = vld [vmem:[#allocation13 + $0x1a0] sm:$0xff] }
 0x253   :  { %v9131_v56 = vcombine.low %v3025_v31, %v3029_v32 }
 0x254   :  { %2827 = vmatpush1.bf16.msra.mxu0 %v10297_v33  ;;  %v11559_v33 = vld [vmem:[#allocation53_spill] sm:$0xff] }
 0x255   :  { %2909 = vmatpush1.bf16.msra.mxu1 %v10300_v53  ;;  %2828 = vmatprep.subr.bf16.mxu0 %v10305_v34  ;;  %v666_v53 = vrot.slane %v11175_v27, %v11559_v33  ;;  %v3026_v34 = vld [vmem:[#allocation13 + $0x188] sm:$0xff] }
 0x256   :  { %2910 = vmatprep.subr.bf16.mxu1 %v10308_v35  ;;  %v3030_v35 = vld [vmem:[#allocation13 + $0x1a8] sm:$0xff] }
 0x258   :  { %2829 = vmatpush1.bf16.msra.mxu0 %v10303_v36  ;;  %v11560_v36 = vld [vmem:[#allocation52_spill] sm:$0xff] }
 0x259   :  { %2911 = vmatpush1.bf16.msra.mxu1 %v10306_v37  ;;  %2830 = vmatprep.subr.bf16.mxu0 %v10311_v38  ;;  %v662_v37 = vrot.slane %v11175_v27, %v11560_v36  ;;  %v9123_v38 = vcombine.low %v3017_v4, %v3021_v23 }
 0x25a   :  { %2912 = vmatprep.subr.bf16.mxu1 %v10314_v39  ;;  %v9125_v39 = vcombine.low %v3018_v22, %v3022_v3  ;;  %v3065_v3 = vld [vmem:[#allocation13 + $0x2c0] sm:$0xff] }
 0x25c   :  { %2831 = vmatpush1.bf16.msra.mxu0 %v10309_v40  ;;  %v9132_v40 = vcombine.high %v3025_v31, %v3029_v32 }
 0x25d   :  { %2913 = vmatpush1.bf16.msra.mxu1 %v10312_v41  ;;  %2832 = vmatprep.subr.bf16.mxu0 %v10317_v42 }
 0x25e   :  { %2914 = vmatprep.subr.bf16.mxu1 %v10320_v43  ;;  %v9134_v43 = vcombine.high %v3026_v34, %v3030_v35 }
 0x260   :  { %2833 = vmatpush1.bf16.msra.mxu0 %v10315_v48 }
 0x261   :  { %2915 = vmatpush1.bf16.msra.mxu1 %v10318_v49  ;;  %7669 = vmatprep.subr.bf16.mxu0 %v9084_v50  ;;  %v3034_v50 = vld [vmem:[#allocation13 + $0x1c8] sm:$0xff] }
 0x262   :  { %7915 = vmatprep.subr.bf16.mxu1 %v9086_v51  ;;  %v3038_v51 = vld [vmem:[#allocation13 + $0x1e8] sm:$0xff] }
 0x263   :  { %2851 = vmatmul.mubr.bf16.vlgmr.msra.gmra.mrb[12].mxu0 %v10321_v58  ;;  %v9142_v62 = vcombine.high %v3034_v50, %v3038_v51  ;;  %v9141_v10 = vcombine.low %v3034_v50, %v3038_v51  ;;  %v3086_v50 = vld [vmem:[#allocation13 + $0x368] sm:$0xff] }
 0x264   :  { %2933 = vmatmul.mubr.bf16.vlgmr.msra.gmra.mrb[12].mxu1 %v10321_v58  ;;  %7670 = vmatpush1.bf16.msra.mxu0 %v9083_v57 }
 0x265   :  { %7916 = vmatpush1.bf16.msra.mxu1 %v9085_v59  ;;  %7671 = vmatprep.subr.bf16.mxu0 %v9092_v60  ;;  %v9133_v59 = vcombine.low %v3026_v34, %v3030_v35  ;;  %v9140_v60 = vcombine.high %v3033_v44, %v3037_v45  ;;  %v3073_v34 = vld [vmem:[#allocation13 + $0x300] sm:$0xff] }
 0x266   :  { %7917 = vmatprep.subr.bf16.mxu1 %v9094_v61  ;;  %v3077_v35 = vld [vmem:[#allocation13 + $0x320] sm:$0xff] }
 0x267   :  { %v9179_v51 = vcombine.low %v3073_v34, %v3077_v35 }
 0x268   :  { %7672 = vmatpush1.bf16.msra.mxu0 %v9091_v2  ;;  %v3046_v2 = vld [vmem:[#allocation13 + $0x228] sm:$0xff] }
 0x269   :  { %7918 = vmatpush1.bf16.msra.mxu1 %v9093_v13  ;;  %7673 = vmatprep.subr.bf16.mxu0 %v9100_v15  ;;  %v9139_v15 = vcombine.low %v3033_v44, %v3037_v45  ;;  %v9150_v24 = vcombine.high %v3042_v1, %v3046_v2  ;;  %v9149_v7 = vcombine.low %v3042_v1, %v3046_v2  ;;  %v3081_v44 = vld [vmem:[#allocation13 + $0x340] sm:$0xff] }
 0x26a   :  { %7919 = vmatprep.subr.bf16.mxu1 %v9102_v12  ;;  %v3085_v45 = vld [vmem:[#allocation13 + $0x360] sm:$0xff] }
 0x26c   :  { %7674 = vmatpush1.bf16.msra.mxu0 %v9099_v21  ;;  %v3053_v21 = vld [vmem:[#allocation13 + $0x260] sm:$0xff] }
 0x26d   :  { %7920 = vmatpush1.bf16.msra.mxu1 %v9101_v20  ;;  %7675 = vmatprep.subr.bf16.mxu0 %v9108_v8  ;;  %v3050_v20 = vld [vmem:[#allocation13 + $0x248] sm:$0xff]  ;;  %v9156_v9 = vcombine.high %v3049_v25, %v3053_v21 }
 0x26e   :  { %7921 = vmatprep.subr.bf16.mxu1 %v9110_v5  ;;  %v3054_v8 = vld [vmem:[#allocation13 + $0x268] sm:$0xff]  ;;  %v9147_v5 = vcombine.low %v3041_v63, %v3045_v0  ;;  %v9187_v0 = vcombine.low %v3081_v44, %v3085_v45 }
 0x26f   :  { %v9158_v11 = vcombine.high %v3050_v20, %v3054_v8  ;;  %v9157_v4 = vcombine.low %v3050_v20, %v3054_v8 }
 0x270   :  { %7676 = vmatpush1.bf16.msra.mxu0 %v9107_v19  ;;  %v3061_v19 = vld [vmem:[#allocation13 + $0x2a0] sm:$0xff] }
 0x271   :  { %7922 = vmatpush1.bf16.msra.mxu1 %v9109_v14  ;;  %7677 = vmatprep.subr.bf16.mxu0 %v9116_v16  ;;  %v3058_v14 = vld [vmem:[#allocation13 + $0x288] sm:$0xff]  ;;  %v9164_v23 = vcombine.high %v3057_v6, %v3061_v19 }
 0x272   :  { %7923 = vmatprep.subr.bf16.mxu1 %v9118_v18  ;;  %v3062_v16 = vld [vmem:[#allocation13 + $0x2a8] sm:$0xff]  ;;  %v9155_v18 = vcombine.low %v3049_v25, %v3053_v21 }
 0x273   :  { %v9166_v22 = vcombine.high %v3058_v14, %v3062_v16  ;;  %v9165_v31 = vcombine.low %v3058_v14, %v3062_v16  ;;  %v3102_v25 = vld [vmem:[#allocation13 + $0x3e8] sm:$0xff] }
 0x274   :  { %7678 = vmatpush1.bf16.msra.mxu0 %v9115_v26  ;;  %v3069_v26 = vld [vmem:[#allocation13 + $0x2e0] sm:$0xff] }
 0x275   :  { %7924 = vmatpush1.bf16.msra.mxu1 %v9117_v28  ;;  %7679 = vmatprep.subr.bf16.mxu0 %v9124_v29  ;;  %v3066_v28 = vld [vmem:[#allocation13 + $0x2c8] sm:$0xff]  ;;  %v9172_v32 = vcombine.high %v3065_v3, %v3069_v26 }
 0x276   :  { %v11181_v41 = vpop.f32.mrb[4].mxu0  ;;  %v1323_v42 = vpop.f32.mrb[4].mxu1  ;;  %7925 = vmatprep.subr.bf16.mxu1 %v9126_v30  ;;  %v3070_v29 = vld [vmem:[#allocation13 + $0x2e8] sm:$0xff]  ;;  %v9163_v30 = vcombine.low %v3057_v6, %v3061_v19 }
 0x277   :  { %v11185_v47 = vadd.f32 %v1323_v42, %v666_v53  ;;  %v1243_v48 = vpop.f32.mrb[5].mxu0  ;;  %v11187_v49 = vpop.f32.mrb[5].mxu1  ;;  %v9174_v53 = vcombine.high %v3066_v28, %v3070_v29  ;;  %v9180_v42 = vcombine.high %v3073_v34, %v3077_v35  ;;  %v3110_v6 = vld [vmem:[#allocation13 + $0x428] sm:$0xff]  ;;  %v3125_v34 = vld [vmem:[#allocation13 + $0x4a0] sm:$0xff] }
 0x278   :  { %v9891_v52 = vadd.f32 %v1243_v48, %v662_v37  ;;  %v1245_v54 = vpop.f32.mrb[6].mxu0  ;;  %v1327_v55 = vpop.f32.mrb[6].mxu1  ;;  %7680 = vmatpush1.bf16.msra.mxu0 %v9123_v38  ;;  %v3074_v37 = vld [vmem:[#allocation13 + $0x308] sm:$0xff] }
 0x279   :  { %7926 = vmatpush1.bf16.msra.mxu1 %v9125_v39  ;;  %v1246_v57 = vpop.f32.mrb[7].mxu0  ;;  %v1328_v58 = vpop.f32.mrb[7].mxu1  ;;  %7681 = vmatprep.subr.bf16.mxu0 %v9132_v40  ;;  %v3078_v38 = vld [vmem:[#allocation13 + $0x328] sm:$0xff]  ;;  %v9171_v39 = vcombine.low %v3065_v3, %v3069_v26  ;;  %v9173_v40 = vcombine.low %v3066_v28, %v3070_v29  ;;  %v9188_v54 = vcombine.high %v3081_v44, %v3085_v45  ;;  %v11561_v55 = vld [vmem:[#allocation51_spill] sm:$0xff]  ;;  %vm1332_vm12 = vcmp.gt.f32.partialorder %v11185_v47, 0.0 }
 0x27a   :  { %vm1331_vm9 = vcmp.gt.f32.partialorder %v9891_v52, 0.0  ;;  %v1336_v61 = vmul.f32 %v9891_v52, %v11183_v46  ;;  %7927 = vmatprep.subr.bf16.mxu1 %v9134_v43  ;;  %v9182_v43 = vcombine.high %v3074_v37, %v3078_v38  ;;  %v3082_v48 = vld [vmem:[#allocation13 + $0x348] sm:$0xff]  ;;  %v3089_v58 = vld [vmem:[#allocation13 + $0x380] sm:$0xff] }
 0x27b   :  { %v9190_v57 = vcombine.high %v3082_v48, %v3086_v50  ;;  %v9189_v1 = vcombine.low %v3082_v48, %v3086_v50  ;;  %v3114_v28 = vld [vmem:[#allocation13 + $0x448] sm:$0xff]  ;;  %v3129_v45 = vld [vmem:[#allocation13 + $0x4c0] sm:$0xff] }
 0x27c   :  { %v1340_v13 = vsel %vm1331_vm9, %v9891_v52, %v1336_v61  ;;  %7682 = vmatpush1.bf16.msra.mxu0 %v9131_v56  ;;  %v9181_v52 = vcombine.low %v3074_v37, %v3078_v38  ;;  %v658_v56 = vrot.slane %v11175_v27, %v11561_v55  ;;  %v3094_v61 = vld [vmem:[#allocation13 + $0x3a8] sm:$0xff]  ;;  %v3133_v48 = vld [vmem:[#allocation13 + $0x4e0] sm:$0xff] }
 0x27d   :  { %v11190_v12 = vpack.c.bf16 %v1340_v13, %v1340_v13  ;;  %7928 = vmatpush1.bf16.msra.mxu1 %v9133_v59  ;;  %7683 = vmatprep.subr.bf16.mxu0 %v9140_v60  ;;  %v3093_v59 = vld [vmem:[#allocation13 + $0x3a0] sm:$0xff]  ;;  %v3090_v60 = vld [vmem:[#allocation13 + $0x388] sm:$0xff] }
 0x27e   :  { %7929 = vmatprep.subr.bf16.mxu1 %v9142_v62  ;;  %v11562_v62 = vld [vmem:[#allocation54_spill] sm:$0xff]  ;;  %v9196_v2 = vcombine.high %v3089_v58, %v3093_v59  ;;  %v9890_v13 = vadd.f32 %v11181_v41, %v658_v56  ;;  %v9195_v20 = vcombine.low %v3089_v58, %v3093_v59  ;;  %v3109_v41 = vld [vmem:[#allocation13 + $0x420] sm:$0xff]  ;;  %v3118_v29 = vld [vmem:[#allocation13 + $0x468] sm:$0xff]  ;;  %v9236_v56 = vcombine.high %v3129_v45, %v3133_v48 }
 0x27f   :  { %7701 = vmatprep.mubr.bf16.mxu0 %v11190_v12  ;;  %7947 = vmatprep.mubr.bf16.mxu1 %v11190_v12  ;;  %v670_v63 = vrot.slane %v11175_v27, %v11562_v62  ;;  %v9197_v27 = vcombine.low %v3090_v60, %v3094_v61  ;;  %v9222_v37 = vcombine.high %v3114_v28, %v3118_v29  ;;  %v3122_v38 = vld [vmem:[#allocation13 + $0x488] sm:$0xff]  ;;  %v3137_v58 = vld [vmem:[#allocation13 + $0x500] sm:$0xff] }
 0x280   :  { %7684 = vmatpush1.bf16.msra.mxu0 %v9139_v15  ;;  %v9198_v15 = vcombine.high %v3090_v60, %v3094_v61  ;;  %vm1330_vm10 = vcmp.gt.f32.partialorder %v9890_v13, 0.0  ;;  %v3130_v50 = vld [vmem:[#allocation13 + $0x4c8] sm:$0xff]  ;;  %v3141_v59 = vld [vmem:[#allocation13 + $0x520] sm:$0xff] }
 0x281   :  { %7930 = vmatpush1.bf16.msra.mxu1 %v9141_v10  ;;  %7685 = vmatprep.subr.bf16.mxu0 %v9148_v17  ;;  %v3097_v10 = vld [vmem:[#allocation13 + $0x3c0] sm:$0xff]  ;;  %v9893_v21 = vadd.f32 %v11187_v49, %v670_v63  ;;  %v3138_v60 = vld [vmem:[#allocation13 + $0x508] sm:$0xff]  ;;  %v9235_v63 = vcombine.low %v3129_v45, %v3133_v48 }
 0x282   :  { %7931 = vmatprep.subr.bf16.mxu1 %v9150_v24  ;;  %v3101_v17 = vld [vmem:[#allocation13 + $0x3e0] sm:$0xff]  ;;  %v3098_v24 = vld [vmem:[#allocation13 + $0x3c8] sm:$0xff] }
 0x283   :  { %v9204_v8 = vcombine.high %v3097_v10, %v3101_v17  ;;  %v1338_v19 = vmul.f32 %v9893_v21, %v11183_v46  ;;  %v9203_v14 = vcombine.low %v3097_v10, %v3101_v17  ;;  %vm1333_vm11 = vcmp.gt.f32.partialorder %v9893_v21, 0.0  ;;  %v3142_v61 = vld [vmem:[#allocation13 + $0x528] sm:$0xff]  ;;  %v3185_v48 = vld [vmem:[#allocation13 + $0x680] sm:$0xff] }
 0x284   :  { %7686 = vmatpush1.bf16.msra.mxu0 %v9147_v5  ;;  %v1335_v5 = vmul.f32 %v9890_v13, %v11183_v46  ;;  %v9205_v49 = vcombine.low %v3098_v24, %v3102_v25  ;;  %v3146_v10 = vld [vmem:[#allocation13 + $0x548] sm:$0xff] }
 0x285   :  { %7932 = vmatpush1.bf16.msra.mxu1 %v9149_v7  ;;  %7687 = vmatprep.subr.bf16.mxu0 %v9156_v9  ;;  %v9206_v7 = vcombine.high %v3098_v24, %v3102_v25  ;;  %v3105_v9 = vld [vmem:[#allocation13 + $0x400] sm:$0xff]  ;;  %v1342_v3 = vsel %vm1333_vm11, %v9893_v21, %v1338_v19  ;;  %v3150_v17 = vld [vmem:[#allocation13 + $0x568] sm:$0xff]  ;;  %v9243_v24 = vcombine.low %v3137_v58, %v3141_v59 }
 0x286   :  { %7933 = vmatprep.subr.bf16.mxu1 %v9158_v11  ;;  %v3106_v11 = vld [vmem:[#allocation13 + $0x408] sm:$0xff]  ;;  %v9212_v16 = vcombine.high %v3105_v9, %v3109_v41  ;;  %v9211_v26 = vcombine.low %v3105_v9, %v3109_v41  ;;  %v11204_v35 = vpack.c.bf16 %v1342_v3, %v1342_v3  ;;  %v9245_v25 = vcombine.low %v3138_v60, %v3142_v61  ;;  %v3161_v19 = vld [vmem:[#allocation13 + $0x5c0] sm:$0xff] }
 0x287   :  { %v9253_v41 = vcombine.low %v3146_v10, %v3150_v17  ;;  %v3169_v3 = vld [vmem:[#allocation13 + $0x600] sm:$0xff] }
 0x288   :  { %7688 = vmatpush1.bf16.msra.mxu0 %v9155_v18  ;;  %v1339_v18 = vsel %vm1330_vm10, %v9890_v13, %v1335_v5  ;;  %v3145_v13 = vld [vmem:[#allocation13 + $0x540] sm:$0xff]  ;;  %v3154_v5 = vld [vmem:[#allocation13 + $0x588] sm:$0xff] }
 0x289   :  { %7934 = vmatpush1.bf16.msra.mxu1 %v9157_v4  ;;  %7689 = vmatprep.subr.bf16.mxu0 %v9164_v23  ;;  %v9214_v4 = vcombine.high %v3106_v11, %v3110_v6  ;;  %v3113_v23 = vld [vmem:[#allocation13 + $0x440] sm:$0xff] }
 0x28a   :  { %7935 = vmatprep.subr.bf16.mxu1 %v9166_v22  ;;  %v3117_v22 = vld [vmem:[#allocation13 + $0x460] sm:$0xff] }
 0x28c   :  { %7690 = vmatpush1.bf16.msra.mxu0 %v9163_v30  ;;  %v11202_v30 = vpack.c.bf16 %v1339_v18, %v1339_v18 }
 0x28d   :  { %7936 = vmatpush1.bf16.msra.mxu1 %v9165_v31  ;;  %7691 = vmatprep.subr.bf16.mxu0 %v9172_v32  ;;  %v9213_v31 = vcombine.low %v3106_v11, %v3110_v6  ;;  %v9220_v32 = vcombine.high %v3113_v23, %v3117_v22 }
 0x28e   :  { %7937 = vmatprep.subr.bf16.mxu1 %v9174_v53  ;;  %v3121_v53 = vld [vmem:[#allocation13 + $0x480] sm:$0xff] }
 0x290   :  { %7692 = vmatpush1.bf16.msra.mxu0 %v9171_v39  ;;  %v3126_v39 = vld [vmem:[#allocation13 + $0x4a8] sm:$0xff] }
 0x291   :  { %7938 = vmatpush1.bf16.msra.mxu1 %v9173_v40  ;;  %7693 = vmatprep.subr.bf16.mxu0 %v9180_v42  ;;  %v9219_v40 = vcombine.low %v3113_v23, %v3117_v22  ;;  %v9221_v42 = vcombine.low %v3114_v28, %v3118_v29  ;;  %v9230_v44 = vcombine.high %v3122_v38, %v3126_v39  ;;  %v3170_v28 = vld [vmem:[#allocation13 + $0x608] sm:$0xff] }
 0x292   :  { %7939 = vmatprep.subr.bf16.mxu1 %v9182_v43  ;;  %v9228_v43 = vcombine.high %v3121_v53, %v3125_v34  ;;  %v3174_v29 = vld [vmem:[#allocation13 + $0x628] sm:$0xff] }
 0x294   :  { %7694 = vmatpush1.bf16.msra.mxu0 %v9179_v51  ;;  %v3134_v51 = vld [vmem:[#allocation13 + $0x4e8] sm:$0xff] }
 0x295   :  { %7940 = vmatpush1.bf16.msra.mxu1 %v9181_v52  ;;  %7695 = vmatprep.subr.bf16.mxu0 %v9188_v54  ;;  %v9227_v52 = vcombine.low %v3121_v53, %v3125_v34  ;;  %v9229_v54 = vcombine.low %v3122_v38, %v3126_v39  ;;  %v9278_v34 = vcombine.high %v3170_v28, %v3174_v29  ;;  %v3181_v38 = vld [vmem:[#allocation13 + $0x660] sm:$0xff]  ;;  %v3178_v39 = vld [vmem:[#allocation13 + $0x648] sm:$0xff] }
 0x296   :  { %7941 = vmatprep.subr.bf16.mxu1 %v9190_v57  ;;  %v9238_v57 = vcombine.high %v3130_v50, %v3134_v51 }
 0x298   :  { %7696 = vmatpush1.bf16.msra.mxu0 %v9187_v0  ;;  %v9237_v0 = vcombine.low %v3130_v50, %v3134_v51  ;;  %v3189_v50 = vld [vmem:[#allocation13 + $0x6a0] sm:$0xff]  ;;  %v3186_v51 = vld [vmem:[#allocation13 + $0x688] sm:$0xff] }
 0x299   :  { %7942 = vmatpush1.bf16.msra.mxu1 %v9189_v1  ;;  %7697 = vmatprep.subr.bf16.mxu0 %v9196_v2  ;;  %v9244_v1 = vcombine.high %v3137_v58, %v3141_v59  ;;  %v9246_v2 = vcombine.high %v3138_v60, %v3142_v61  ;;  %v3193_v59 = vld [vmem:[#allocation13 + $0x6c0] sm:$0xff]  ;;  %v3194_v61 = vld [vmem:[#allocation13 + $0x6c8] sm:$0xff] }
 0x29a   :  { %7943 = vmatprep.subr.bf16.mxu1 %v9198_v15  ;;  %v3149_v15 = vld [vmem:[#allocation13 + $0x560] sm:$0xff] }
 0x29b   :  { %v9252_v21 = vcombine.high %v3145_v13, %v3149_v15  ;;  %v9251_v9 = vcombine.low %v3145_v13, %v3149_v15  ;;  %v3197_v60 = vld [vmem:[#allocation13 + $0x6e0] sm:$0xff] }
 0x29c   :  { %7698 = vmatpush1.bf16.msra.mxu0 %v9195_v20  ;;  %v9254_v20 = vcombine.high %v3146_v10, %v3150_v17  ;;  %v3201_v15 = vld [vmem:[#allocation13 + $0x700] sm:$0xff]  ;;  %v3202_v17 = vld [vmem:[#allocation13 + $0x708] sm:$0xff] }
 0x29d   :  { %7944 = vmatpush1.bf16.msra.mxu1 %v9197_v27  ;;  %7699 = vmatprep.subr.bf16.mxu0 %v9204_v8  ;;  %v3153_v27 = vld [vmem:[#allocation13 + $0x580] sm:$0xff] }
 0x29e   :  { %7945 = vmatprep.subr.bf16.mxu1 %v9206_v7  ;;  %v3157_v8 = vld [vmem:[#allocation13 + $0x5a0] sm:$0xff]  ;;  %v3158_v7 = vld [vmem:[#allocation13 + $0x5a8] sm:$0xff] }
 0x29f   :  { %v9260_v11 = vcombine.high %v3153_v27, %v3157_v8  ;;  %v9262_v6 = vcombine.high %v3154_v5, %v3158_v7  ;;  %v9259_v18 = vcombine.low %v3153_v27, %v3157_v8  ;;  %v3205_v10 = vld [vmem:[#allocation13 + $0x720] sm:$0xff] }
 0x2a0   :  { %7700 = vmatpush1.bf16.msra.mxu0 %v9203_v14  ;;  %v3165_v14 = vld [vmem:[#allocation13 + $0x5e0] sm:$0xff] }
 0x2a1   :  { %7946 = vmatpush1.bf16.msra.mxu1 %v9205_v49  ;;  %7710 = vmatprep.subr.bf16.mxu0 %v9212_v16  ;;  %v3162_v49 = vld [vmem:[#allocation13 + $0x5c8] sm:$0xff]  ;;  %v9268_v23 = vcombine.high %v3161_v19, %v3165_v14  ;;  %v3209_v8 = vld [vmem:[#allocation13 + $0x740] sm:$0xff] }
 0x2a2   :  { %7956 = vmatprep.subr.bf16.mxu1 %v9214_v4  ;;  %v3166_v16 = vld [vmem:[#allocation13 + $0x5e8] sm:$0xff]  ;;  %v9261_v4 = vcombine.low %v3154_v5, %v3158_v7  ;;  %v3213_v5 = vld [vmem:[#allocation13 + $0x760] sm:$0xff] }
 0x2a3   :  { %7702 = vmatmul.mubr.bf16.vlgmr.msra.gmra.mrb[16].mxu0 %v11202_v30  ;;  %v9270_v22 = vcombine.high %v3162_v49, %v3166_v16  ;;  %v3210_v7 = vld [vmem:[#allocation13 + $0x748] sm:$0xff] }
 0x2a4   :  { %7948 = vmatmul.mubr.bf16.vlgmr.msra.gmra.mrb[16].mxu1 %v11202_v30  ;;  %7711 = vmatpush1.bf16.msra.mxu0 %v9211_v26  ;;  %v3173_v26 = vld [vmem:[#allocation13 + $0x620] sm:$0xff] }
 0x2a5   :  { %7742 = vmatprep.mubr.bf16.mxu0 %v11204_v35  ;;  %7957 = vmatpush1.bf16.msra.mxu1 %v9213_v31  ;;  %v9267_v31 = vcombine.low %v3161_v19, %v3165_v14  ;;  %v9276_v53 = vcombine.high %v3169_v3, %v3173_v26  ;;  %v9316_v19 = vcombine.high %v3209_v8, %v3213_v5 }
 0x2a6   :  { %7988 = vmatprep.mubr.bf16.mxu1 %v11204_v35  ;;  %7712 = vmatprep.subr.bf16.mxu0 %v9220_v32  ;;  %v9269_v32 = vcombine.low %v3162_v49, %v3166_v16  ;;  %v3217_v49 = vld [vmem:[#allocation13 + $0x780] sm:$0xff] }
 0x2a7   :  { %7958 = vmatprep.subr.bf16.mxu1 %v9222_v37  ;;  %v3177_v37 = vld [vmem:[#allocation13 + $0x640] sm:$0xff] }
 0x2a8   :  { %7713 = vmatpush1.bf16.msra.mxu0 %v9219_v40  ;;  %v3182_v40 = vld [vmem:[#allocation13 + $0x668] sm:$0xff]  ;;  %v3221_v16 = vld [vmem:[#allocation13 + $0x7a0] sm:$0xff] }
 0x2a9   :  { %7959 = vmatpush1.bf16.msra.mxu1 %v9221_v42  ;;  %7714 = vmatprep.subr.bf16.mxu0 %v9228_v43  ;;  %v9275_v42 = vcombine.low %v3169_v3, %v3173_v26  ;;  %v9277_v43 = vcombine.low %v3170_v28, %v3174_v29  ;;  %v9286_v45 = vcombine.high %v3178_v39, %v3182_v40 }
 0x2aa   :  { %7960 = vmatprep.subr.bf16.mxu1 %v9230_v44  ;;  %v9284_v44 = vcombine.high %v3177_v37, %v3181_v38  ;;  %v9315_v3 = vcombine.low %v3209_v8, %v3213_v5  ;;  %v9324_v29 = vcombine.high %v3217_v49, %v3221_v16  ;;  %v3246_v8 = vld [vmem:[#allocation13 + $0x868] sm:$0xff] }
 0x2ac   :  { %7715 = vmatpush1.bf16.msra.mxu0 %v9227_v52  ;;  %v3190_v52 = vld [vmem:[#allocation13 + $0x6a8] sm:$0xff] }
 0x2ad   :  { %7961 = vmatpush1.bf16.msra.mxu1 %v9229_v54  ;;  %7716 = vmatprep.subr.bf16.mxu0 %v9236_v56  ;;  %v9283_v54 = vcombine.low %v3177_v37, %v3181_v38  ;;  %v9285_v56 = vcombine.low %v3178_v39, %v3182_v40  ;;  %v9294_v58 = vcombine.high %v3186_v51, %v3190_v52  ;;  %v3226_v39 = vld [vmem:[#allocation13 + $0x7c8] sm:$0xff] }
 0x2ae   :  { %7962 = vmatprep.subr.bf16.mxu1 %v9238_v57  ;;  %v9292_v57 = vcombine.high %v3185_v48, %v3189_v50  ;;  %v3230_v40 = vld [vmem:[#allocation13 + $0x7e8] sm:$0xff] }
 0x2b0   :  { %7717 = vmatpush1.bf16.msra.mxu0 %v9235_v63  ;;  %v3198_v63 = vld [vmem:[#allocation13 + $0x6e8] sm:$0xff] }
 0x2b1   :  { %7963 = vmatpush1.bf16.msra.mxu1 %v9237_v0  ;;  %7718 = vmatprep.subr.bf16.mxu0 %v9244_v1  ;;  %v9291_v0 = vcombine.low %v3185_v48, %v3189_v50  ;;  %v9293_v1 = vcombine.low %v3186_v51, %v3190_v52  ;;  %v9302_v13 = vcombine.high %v3194_v61, %v3198_v63 }
 0x2b2   :  { %7964 = vmatprep.subr.bf16.mxu1 %v9246_v2  ;;  %v9300_v2 = vcombine.high %v3193_v59, %v3197_v60  ;;  %v9323_v48 = vcombine.low %v3217_v49, %v3221_v16  ;;  %v3254_v49 = vld [vmem:[#allocation13 + $0x8a8] sm:$0xff] }
 0x2b4   :  { %7719 = vmatpush1.bf16.msra.mxu0 %v9243_v24  ;;  %v3206_v24 = vld [vmem:[#allocation13 + $0x728] sm:$0xff] }
 0x2b5   :  { %7965 = vmatpush1.bf16.msra.mxu1 %v9245_v25  ;;  %7720 = vmatprep.subr.bf16.mxu0 %v9252_v21  ;;  %v9299_v25 = vcombine.low %v3193_v59, %v3197_v60  ;;  %v9301_v21 = vcombine.low %v3194_v61, %v3198_v63  ;;  %v9310_v27 = vcombine.high %v3202_v17, %v3206_v24  ;;  %v3233_v60 = vld [vmem:[#allocation13 + $0x800] sm:$0xff]  ;;  %v3234_v63 = vld [vmem:[#allocation13 + $0x808] sm:$0xff] }
 0x2b6   :  { %7966 = vmatprep.subr.bf16.mxu1 %v9254_v20  ;;  %v9308_v20 = vcombine.high %v3201_v15, %v3205_v10  ;;  %v9334_v59 = vcombine.high %v3226_v39, %v3230_v40  ;;  %v3237_v61 = vld [vmem:[#allocation13 + $0x820] sm:$0xff] }
 0x2b8   :  { %7721 = vmatpush1.bf16.msra.mxu0 %v9251_v9  ;;  %v3214_v9 = vld [vmem:[#allocation13 + $0x768] sm:$0xff] }
 0x2b9   :  { %7967 = vmatpush1.bf16.msra.mxu1 %v9253_v41  ;;  %7722 = vmatprep.subr.bf16.mxu0 %v9260_v11  ;;  %v9307_v41 = vcombine.low %v3201_v15, %v3205_v10  ;;  %v9309_v11 = vcombine.low %v3202_v17, %v3206_v24  ;;  %v9318_v14 = vcombine.high %v3210_v7, %v3214_v9  ;;  %v3241_v24 = vld [vmem:[#allocation13 + $0x840] sm:$0xff] }
 0x2ba   :  { %7968 = vmatprep.subr.bf16.mxu1 %v9262_v6  ;;  %v11210_v6 = vld [vmem:[#allocation12] sm:$0xf]  ;;  %v9317_v28 = vcombine.low %v3210_v7, %v3214_v9  ;;  %v9340_v15 = vcombine.high %v3233_v60, %v3237_v61 }
 0x2bb   :  { %v1476_v26 = vrot.slane %v11210_v6, %v11562_v62 }
 0x2bc   :  { %7723 = vmatpush1.bf16.msra.mxu0 %v9259_v18  ;;  %v3218_v18 = vld [vmem:[#allocation13 + $0x788] sm:$0xff] }
 0x2bd   :  { %7969 = vmatpush1.bf16.msra.mxu1 %v9261_v4  ;;  %7724 = vmatprep.subr.bf16.mxu0 %v9268_v23  ;;  %v3222_v4 = vld [vmem:[#allocation13 + $0x7a8] sm:$0xff]  ;;  %v1472_v23 = vrot.slane %v11210_v6, %v11559_v33 }
 0x2be   :  { %7970 = vmatprep.subr.bf16.mxu1 %v9270_v22  ;;  %v1468_v22 = vrot.slane %v11210_v6, %v11560_v36 }
 0x2c0   :  { %7725 = vmatpush1.bf16.msra.mxu0 %v9267_v31 }
 0x2c1   :  { %7971 = vmatpush1.bf16.msra.mxu1 %v9269_v32  ;;  %7726 = vmatprep.subr.bf16.mxu0 %v9276_v53  ;;  %v9326_v32 = vcombine.high %v3218_v18, %v3222_v4  ;;  %v3225_v53 = vld [vmem:[#allocation13 + $0x7c0] sm:$0xff] }
 0x2c2   :  { %7972 = vmatprep.subr.bf16.mxu1 %v9278_v34  ;;  %v3229_v34 = vld [vmem:[#allocation13 + $0x7e0] sm:$0xff] }
 0x2c4   :  { %7727 = vmatpush1.bf16.msra.mxu0 %v9275_v42 }
 0x2c5   :  { %7973 = vmatpush1.bf16.msra.mxu1 %v9277_v43  ;;  %7728 = vmatprep.subr.bf16.mxu0 %v9284_v44 }
 0x2c6   :  { %7974 = vmatprep.subr.bf16.mxu1 %v9286_v45 }
 0x2c8   :  { %7729 = vmatpush1.bf16.msra.mxu0 %v9283_v54  ;;  %v9325_v54 = vcombine.low %v3218_v18, %v3222_v4 }
 0x2c9   :  { %7975 = vmatpush1.bf16.msra.mxu1 %v9285_v56  ;;  %7730 = vmatprep.subr.bf16.mxu0 %v9292_v57  ;;  %v9332_v56 = vcombine.high %v3225_v53, %v3229_v34  ;;  %v1337_v57 = vmul.f32 %v11185_v47, %v11183_v46 }
 0x2ca   :  { %7976 = vmatprep.subr.bf16.mxu1 %v9294_v58 }
 0x2cb   :  { %v1341_v10 = vsel %vm1332_vm12, %v11185_v47, %v1337_v57 }
 0x2cc   :  { %7731 = vmatpush1.bf16.msra.mxu0 %v9291_v0  ;;  %v3238_v0 = vld [vmem:[#allocation13 + $0x828] sm:$0xff]  ;;  %v11229_v5 = vpack.c.bf16 %v1341_v10, %v1341_v10 }
 0x2cd   :  { %7977 = vmatpush1.bf16.msra.mxu1 %v9293_v1  ;;  %7732 = vmatprep.subr.bf16.mxu0 %v9300_v2  ;;  %v9331_v2 = vcombine.low %v3225_v53, %v3229_v34  ;;  %v9342_v17 = vcombine.high %v3234_v63, %v3238_v0  ;;  %v9341_v7 = vcombine.low %v3234_v63, %v3238_v0  ;;  %v3285_v63 = vld [vmem:[#allocation13 + $0x9a0] sm:$0xff]  ;;  %v3282_v0 = vld [vmem:[#allocation13 + $0x988] sm:$0xff] }
 0x2ce   :  { %7978 = vmatprep.subr.bf16.mxu1 %v9302_v13  ;;  %v9333_v13 = vcombine.low %v3226_v39, %v3230_v40  ;;  %v3266_v39 = vld [vmem:[#allocation13 + $0x908] sm:$0xff] }
 0x2cf   :  { %v3270_v40 = vld [vmem:[#allocation13 + $0x928] sm:$0xff] }
 0x2d0   :  { %7733 = vmatpush1.bf16.msra.mxu0 %v9299_v25  ;;  %v3245_v25 = vld [vmem:[#allocation13 + $0x860] sm:$0xff] }
 0x2d1   :  { %7979 = vmatpush1.bf16.msra.mxu1 %v9301_v21  ;;  %7734 = vmatprep.subr.bf16.mxu0 %v9308_v20  ;;  %v9339_v20 = vcombine.low %v3233_v60, %v3237_v61  ;;  %v9348_v9 = vcombine.high %v3241_v24, %v3245_v25  ;;  %v9347_v16 = vcombine.low %v3241_v24, %v3245_v25  ;;  %v3281_v61 = vld [vmem:[#allocation13 + $0x980] sm:$0xff]  ;;  %v3290_v25 = vld [vmem:[#allocation13 + $0x9c8] sm:$0xff] }
 0x2d2   :  { %7980 = vmatprep.subr.bf16.mxu1 %v9310_v27  ;;  %v3242_v27 = vld [vmem:[#allocation13 + $0x848] sm:$0xff]  ;;  %v3293_v24 = vld [vmem:[#allocation13 + $0x9e0] sm:$0xff] }
 0x2d3   :  { %v9350_v47 = vcombine.high %v3242_v27, %v3246_v8  ;;  %v9349_v18 = vcombine.low %v3242_v27, %v3246_v8 }
 0x2d4   :  { %7735 = vmatpush1.bf16.msra.mxu0 %v9307_v41  ;;  %v3249_v41 = vld [vmem:[#allocation13 + $0x880] sm:$0xff] }
 0x2d5   :  { %7981 = vmatpush1.bf16.msra.mxu1 %v9309_v11  ;;  %7736 = vmatprep.subr.bf16.mxu0 %v9316_v19  ;;  %v3253_v11 = vld [vmem:[#allocation13 + $0x8a0] sm:$0xff] }
 0x2d6   :  { %v11218_v31 = vpop.f32.mrb[8].mxu0  ;;  %7982 = vmatprep.subr.bf16.mxu1 %v9318_v14  ;;  %v3250_v14 = vld [vmem:[#allocation13 + $0x888] sm:$0xff]  ;;  %v9356_v4 = vcombine.high %v3249_v41, %v3253_v11 }
 0x2d7   :  { %v2129_v37 = vpop.f32.mrb[8].mxu1  ;;  %v2049_v38 = vpop.f32.mrb[9].mxu0 }
 0x2d8   :  { %v11220_v42 = vadd.f32 %v2129_v37, %v1472_v23  ;;  %v9895_v43 = vadd.f32 %v2049_v38, %v1468_v22  ;;  %v2131_v44 = vpop.f32.mrb[9].mxu1  ;;  %v2051_v45 = vpop.f32.mrb[10].mxu0  ;;  %7737 = vmatpush1.bf16.msra.mxu0 %v9315_v3  ;;  %v9358_v23 = vcombine.high %v3250_v14, %v3254_v49  ;;  %v3257_v22 = vld [vmem:[#allocation13 + $0x8c0] sm:$0xff] }
 0x2d9   :  { %v11222_v50 = vadd.f32 %v2131_v44, %v1476_v26  ;;  %v2133_v51 = vpop.f32.mrb[10].mxu1  ;;  %7983 = vmatpush1.bf16.msra.mxu1 %v9317_v28  ;;  %v2052_v52 = vpop.f32.mrb[11].mxu0  ;;  %7738 = vmatprep.subr.bf16.mxu0 %v9324_v29  ;;  %v3261_v3 = vld [vmem:[#allocation13 + $0x8e0] sm:$0xff]  ;;  %v3258_v26 = vld [vmem:[#allocation13 + $0x8c8] sm:$0xff]  ;;  %v9355_v29 = vcombine.low %v3249_v41, %v3253_v11 }
 0x2da   :  { %v2134_v58 = vpop.f32.mrb[11].mxu1  ;;  %7984 = vmatprep.subr.bf16.mxu1 %v9326_v32  ;;  %v2141_v1 = vmul.f32 %v9895_v43, %v11183_v46  ;;  %vm2137_vm13 = vcmp.gt.f32.partialorder %v9895_v43, 0.0  ;;  %v3262_v28 = vld [vmem:[#allocation13 + $0x8e8] sm:$0xff]  ;;  %v9357_v32 = vcombine.low %v3250_v14, %v3254_v49  ;;  %v9364_v53 = vcombine.high %v3257_v22, %v3261_v3  ;;  %v3265_v37 = vld [vmem:[#allocation13 + $0x900] sm:$0xff] }
 0x2db   :  { %v9366_v34 = vcombine.high %v3258_v26, %v3262_v28  ;;  %v3269_v38 = vld [vmem:[#allocation13 + $0x920] sm:$0xff]  ;;  %v9365_v44 = vcombine.low %v3258_v26, %v3262_v28  ;;  %v9373_v58 = vcombine.low %v3266_v39, %v3270_v40  ;;  %v3298_v11 = vld [vmem:[#allocation13 + $0xa08] sm:$0xff]  ;;  %vm2139_vm15 = vcmp.gt.f32.partialorder %v11222_v50, 0.0 }
 0x2dc   :  { %7739 = vmatpush1.bf16.msra.mxu0 %v9323_v48  ;;  %v2145_v21 = vsel %vm2137_vm13, %v9895_v43, %v2141_v1  ;;  %v9363_v43 = vcombine.low %v3257_v22, %v3261_v3  ;;  %v9372_v45 = vcombine.high %v3265_v37, %v3269_v38  ;;  %v9374_v48 = vcombine.high %v3266_v39, %v3270_v40  ;;  %v3273_v51 = vld [vmem:[#allocation13 + $0x940] sm:$0xff]  ;;  %v3286_v1 = vld [vmem:[#allocation13 + $0x9a8] sm:$0xff] }
 0x2dd   :  { %7985 = vmatpush1.bf16.msra.mxu1 %v9325_v54  ;;  %7740 = vmatprep.subr.bf16.mxu0 %v9332_v56  ;;  %v11231_v19 = vpack.c.bf16 %v2145_v21, %v2145_v21  ;;  %v3277_v52 = vld [vmem:[#allocation13 + $0x960] sm:$0xff]  ;;  %v3274_v54 = vld [vmem:[#allocation13 + $0x948] sm:$0xff]  ;;  %v9371_v57 = vcombine.low %v3265_v37, %v3269_v38  ;;  %v9390_v10 = vcombine.high %v3282_v0, %v3286_v1  ;;  %vm2138_vm0 = vcmp.gt.f32.partialorder %v11220_v42, 0.0 }
 0x2de   :  { %7986 = vmatprep.subr.bf16.mxu1 %v9334_v59  ;;  %v3278_v56 = vld [vmem:[#allocation13 + $0x968] sm:$0xff]  ;;  %v9380_v59 = vcombine.high %v3273_v51, %v3277_v52  ;;  %v9389_v27 = vcombine.low %v3282_v0, %v3286_v1  ;;  %v3301_v41 = vld [vmem:[#allocation13 + $0xa20] sm:$0xff]  ;;  %vm8745_vm13 = vcmask 7168  }
 0x2df   :  { %v9382_v60 = vcombine.high %v3274_v54, %v3278_v56  ;;  %v3294_v21 = vld [vmem:[#allocation13 + $0x9e8] sm:$0xff] }
 0x2e0   :  { %7741 = vmatpush1.bf16.msra.mxu0 %v9331_v2  ;;  %v9379_v2 = vcombine.low %v3273_v51, %v3277_v52  ;;  %v9397_v49 = vcombine.low %v3290_v25, %v3294_v21  ;;  %v3306_v22 = vld [vmem:[#allocation13 + $0xa48] sm:$0xff] }
 0x2e1   :  { %7987 = vmatpush1.bf16.msra.mxu1 %v9333_v13  ;;  %7751 = vmatprep.subr.bf16.mxu0 %v9340_v15  ;;  %v9381_v13 = vcombine.low %v3274_v54, %v3278_v56  ;;  %v9388_v15 = vcombine.high %v3281_v61, %v3285_v63  ;;  %v3310_v3 = vld [vmem:[#allocation13 + $0xa68] sm:$0xff] }
 0x2e2   :  { %7997 = vmatprep.subr.bf16.mxu1 %v9342_v17  ;;  %v3289_v17 = vld [vmem:[#allocation13 + $0x9c0] sm:$0xff]  ;;  %v3314_v37 = vld [vmem:[#allocation13 + $0xa88] sm:$0xff]  ;;  %v9413_v40 = vcombine.low %v3306_v22, %v3310_v3 }
 0x2e3   :  { %7743 = vmatmul.mubr.bf16.vlgmr.msra.gmra.mrb[16].mxu0 %v11229_v5  ;;  %v9396_v8 = vcombine.high %v3289_v17, %v3293_v24  ;;  %v9395_v14 = vcombine.low %v3289_v17, %v3293_v24  ;;  %v3318_v38 = vld [vmem:[#allocation13 + $0xaa8] sm:$0xff] }
 0x2e4   :  { %7989 = vmatmul.mubr.bf16.vlgmr.msra.gmra.mrb[16].mxu1 %v11229_v5  ;;  %7752 = vmatpush1.bf16.msra.mxu0 %v9339_v20  ;;  %v9387_v20 = vcombine.low %v3281_v61, %v3285_v63  ;;  %v3322_v51 = vld [vmem:[#allocation13 + $0xac8] sm:$0xff]  ;;  %v9421_v56 = vcombine.low %v3314_v37, %v3318_v38 }
 0x2e5   :  { %7783 = vmatprep.mubr.bf16.mxu0 %v11231_v19  ;;  %7998 = vmatpush1.bf16.msra.mxu1 %v9341_v7  ;;  %v9398_v7 = vcombine.high %v3290_v25, %v3294_v21  ;;  %v3326_v52 = vld [vmem:[#allocation13 + $0xae8] sm:$0xff] }
 0x2e6   :  { %8029 = vmatprep.mubr.bf16.mxu1 %v11231_v19  ;;  %7753 = vmatprep.subr.bf16.mxu0 %v9348_v9  ;;  %v3297_v9 = vld [vmem:[#allocation13 + $0xa00] sm:$0xff]  ;;  %v3330_v61 = vld [vmem:[#allocation13 + $0xb08] sm:$0xff]  ;;  %v9429_v1 = vcombine.low %v3322_v51, %v3326_v52 }
 0x2e7   :  { %7999 = vmatprep.subr.bf16.mxu1 %v9350_v47  ;;  %v3302_v47 = vld [vmem:[#allocation13 + $0xa28] sm:$0xff]  ;;  %v9403_v26 = vcombine.low %v3297_v9, %v3301_v41 }
 0x2e8   :  { %7754 = vmatpush1.bf16.msra.mxu0 %v9347_v16  ;;  %v9404_v16 = vcombine.high %v3297_v9, %v3301_v41  ;;  %v9405_v28 = vcombine.low %v3298_v11, %v3302_v47  ;;  %v3334_v63 = vld [vmem:[#allocation13 + $0xb28] sm:$0xff]  ;;  %v3349_v9 = vld [vmem:[#allocation13 + $0xba0] sm:$0xff] }
 0x2e9   :  { %8000 = vmatpush1.bf16.msra.mxu1 %v9349_v18  ;;  %7755 = vmatprep.subr.bf16.mxu0 %v9356_v4  ;;  %v9406_v18 = vcombine.high %v3298_v11, %v3302_v47  ;;  %v3305_v4 = vld [vmem:[#allocation13 + $0xa40] sm:$0xff]  ;;  %v3338_v17 = vld [vmem:[#allocation13 + $0xb48] sm:$0xff]  ;;  %v9437_v21 = vcombine.low %v3330_v61, %v3334_v63 }
 0x2ea   :  { %8001 = vmatprep.subr.bf16.mxu1 %v9358_v23  ;;  %v3309_v23 = vld [vmem:[#allocation13 + $0xa60] sm:$0xff]  ;;  %v3342_v24 = vld [vmem:[#allocation13 + $0xb68] sm:$0xff] }
 0x2eb   :  { %v9411_v39 = vcombine.low %v3305_v4, %v3309_v23  ;;  %v3346_v41 = vld [vmem:[#allocation13 + $0xb88] sm:$0xff] }
 0x2ec   :  { %7756 = vmatpush1.bf16.msra.mxu0 %v9355_v29  ;;  %v9412_v29 = vcombine.high %v3305_v4, %v3309_v23  ;;  %v3350_v11 = vld [vmem:[#allocation13 + $0xba8] sm:$0xff]  ;;  %v3353_v4 = vld [vmem:[#allocation13 + $0xbc0] sm:$0xff] }
 0x2ed   :  { %8002 = vmatpush1.bf16.msra.mxu1 %v9357_v32  ;;  %7757 = vmatprep.subr.bf16.mxu0 %v9364_v53  ;;  %v9414_v32 = vcombine.high %v3306_v22, %v3310_v3  ;;  %v3313_v53 = vld [vmem:[#allocation13 + $0xa80] sm:$0xff]  ;;  %v3354_v22 = vld [vmem:[#allocation13 + $0xbc8] sm:$0xff] }
 0x2ee   :  { %8003 = vmatprep.subr.bf16.mxu1 %v9366_v34  ;;  %v3317_v34 = vld [vmem:[#allocation13 + $0xaa0] sm:$0xff] }
 0x2ef   :  { %v9419_v54 = vcombine.low %v3313_v53, %v3317_v34  ;;  %v3357_v23 = vld [vmem:[#allocation13 + $0xbe0] sm:$0xff] }
 0x2f0   :  { %7758 = vmatpush1.bf16.msra.mxu0 %v9363_v43  ;;  %v9420_v43 = vcombine.high %v3313_v53, %v3317_v34  ;;  %v3361_v53 = vld [vmem:[#allocation13 + $0xc00] sm:$0xff] }
 0x2f1   :  { %8004 = vmatpush1.bf16.msra.mxu1 %v9365_v44  ;;  %7759 = vmatprep.subr.bf16.mxu0 %v9372_v45  ;;  %v9422_v44 = vcombine.high %v3314_v37, %v3318_v38  ;;  %v3321_v45 = vld [vmem:[#allocation13 + $0xac0] sm:$0xff]  ;;  %v3366_v37 = vld [vmem:[#allocation13 + $0xc28] sm:$0xff]  ;;  %v2143_v38 = vmul.f32 %v11222_v50, %v11183_v46 }
 0x2f2   :  { %8005 = vmatprep.subr.bf16.mxu1 %v9374_v48  ;;  %v3325_v48 = vld [vmem:[#allocation13 + $0xae0] sm:$0xff] }
 0x2f3   :  { %v9427_v0 = vcombine.low %v3321_v45, %v3325_v48  ;;  %v3365_v34 = vld [vmem:[#allocation13 + $0xc20] sm:$0xff] }
 0x2f4   :  { %7760 = vmatpush1.bf16.msra.mxu0 %v9371_v57  ;;  %v9428_v57 = vcombine.high %v3321_v45, %v3325_v48  ;;  %v3369_v48 = vld [vmem:[#allocation13 + $0xc40] sm:$0xff] }
 0x2f5   :  { %8006 = vmatpush1.bf16.msra.mxu1 %v9373_v58  ;;  %7761 = vmatprep.subr.bf16.mxu0 %v9380_v59  ;;  %v9430_v58 = vcombine.high %v3322_v51, %v3326_v52  ;;  %v3329_v59 = vld [vmem:[#allocation13 + $0xb00] sm:$0xff]  ;;  %v2147_v52 = vsel %vm2139_vm15, %v11222_v50, %v2143_v38  ;;  %v3382_v50 = vld [vmem:[#allocation13 + $0xca8] sm:$0xff] }
 0x2f6   :  { %8007 = vmatprep.subr.bf16.mxu1 %v9382_v60  ;;  %v3333_v60 = vld [vmem:[#allocation13 + $0xb20] sm:$0xff]  ;;  %v3414_v38 = vld [vmem:[#allocation13 + $0xda8] sm:$0xff] }
 0x2f7   :  { %v9435_v25 = vcombine.low %v3329_v59, %v3333_v60  ;;  %v3373_v51 = vld [vmem:[#allocation13 + $0xc60] sm:$0xff] }
 0x2f8   :  { %7762 = vmatpush1.bf16.msra.mxu0 %v9379_v2  ;;  %v9436_v2 = vcombine.high %v3329_v59, %v3333_v60  ;;  %v9476_v60 = vcombine.high %v3369_v48, %v3373_v51 }
 0x2f9   :  { %8008 = vmatpush1.bf16.msra.mxu1 %v9381_v13  ;;  %7763 = vmatprep.subr.bf16.mxu0 %v9388_v15  ;;  %v9438_v13 = vcombine.high %v3330_v61, %v3334_v63  ;;  %v3337_v15 = vld [vmem:[#allocation13 + $0xb40] sm:$0xff] }
 0x2fa   :  { %8009 = vmatprep.subr.bf16.mxu1 %v9390_v10  ;;  %v3341_v10 = vld [vmem:[#allocation13 + $0xb60] sm:$0xff] }
 0x2fb   :  { %v9443_v47 = vcombine.low %v3337_v15, %v3341_v10  ;;  %v3377_v61 = vld [vmem:[#allocation13 + $0xc80] sm:$0xff] }
 0x2fc   :  { %7764 = vmatpush1.bf16.msra.mxu0 %v9387_v20  ;;  %v9444_v20 = vcombine.high %v3337_v15, %v3341_v10  ;;  %v3381_v63 = vld [vmem:[#allocation13 + $0xca0] sm:$0xff] }
 0x2fd   :  { %8010 = vmatpush1.bf16.msra.mxu1 %v9389_v27  ;;  %7765 = vmatprep.subr.bf16.mxu0 %v9396_v8  ;;  %v1464_v27 = vrot.slane %v11210_v6, %v11561_v55  ;;  %v9446_v8 = vcombine.high %v3338_v17, %v3342_v24  ;;  %v3358_v6 = vld [vmem:[#allocation13 + $0xbe8] sm:$0xff]  ;;  %v9484_v10 = vcombine.high %v3377_v61, %v3381_v63 }
 0x2fe   :  { %8011 = vmatprep.subr.bf16.mxu1 %v9398_v7  ;;  %v3345_v7 = vld [vmem:[#allocation13 + $0xb80] sm:$0xff] }
 0x2ff   :  { %v9451_v3 = vcombine.low %v3345_v7, %v3349_v9 }
 0x300   :  { %7766 = vmatpush1.bf16.msra.mxu0 %v9395_v14  ;;  %v9445_v14 = vcombine.low %v3338_v17, %v3342_v24  ;;  %v3385_v24 = vld [vmem:[#allocation13 + $0xcc0] sm:$0xff] }
 0x301   :  { %8012 = vmatpush1.bf16.msra.mxu1 %v9397_v49  ;;  %7767 = vmatprep.subr.bf16.mxu0 %v9404_v16  ;;  %v9452_v49 = vcombine.high %v3345_v7, %v3349_v9  ;;  %v9894_v16 = vadd.f32 %v11218_v31, %v1464_v27  ;;  %v3362_v31 = vld [vmem:[#allocation13 + $0xc08] sm:$0xff]  ;;  %v9483_v27 = vcombine.low %v3377_v61, %v3381_v63 }
 0x302   :  { %8013 = vmatprep.subr.bf16.mxu1 %v9406_v18  ;;  %v9454_v18 = vcombine.high %v3346_v41, %v3350_v11  ;;  %v9470_v45 = vcombine.high %v3362_v31, %v3366_v37  ;;  %v9469_v59 = vcombine.low %v3362_v31, %v3366_v37  ;;  %v3413_v31 = vld [vmem:[#allocation13 + $0xda0] sm:$0xff]  ;;  %v3410_v37 = vld [vmem:[#allocation13 + $0xd88] sm:$0xff] }
 0x303   :  { %vm2136_vm14 = vcmp.gt.f32.partialorder %v9894_v16, 0.0 }
 0x304   :  { %7768 = vmatpush1.bf16.msra.mxu0 %v9403_v26  ;;  %v9453_v26 = vcombine.low %v3346_v41, %v3350_v11  ;;  %v3393_v41 = vld [vmem:[#allocation13 + $0xd00] sm:$0xff] }
 0x305   :  { %8014 = vmatpush1.bf16.msra.mxu1 %v9405_v28  ;;  %7769 = vmatprep.subr.bf16.mxu0 %v9412_v29  ;;  %v9460_v28 = vcombine.high %v3353_v4, %v3357_v23  ;;  %v2140_v29 = vmul.f32 %v9894_v16, %v11183_v46  ;;  %v3397_v11 = vld [vmem:[#allocation13 + $0xd20] sm:$0xff] }
 0x306   :  { %8015 = vmatprep.subr.bf16.mxu1 %v9414_v32  ;;  %v9462_v32 = vcombine.high %v3354_v22, %v3358_v6 }
 0x308   :  { %7770 = vmatpush1.bf16.msra.mxu0 %v9411_v39  ;;  %v9459_v39 = vcombine.low %v3353_v4, %v3357_v23  ;;  %v3401_v23 = vld [vmem:[#allocation13 + $0xd40] sm:$0xff] }
 0x309   :  { %8016 = vmatpush1.bf16.msra.mxu1 %v9413_v40  ;;  %7771 = vmatprep.subr.bf16.mxu0 %v9420_v43  ;;  %v9461_v40 = vcombine.low %v3354_v22, %v3358_v6  ;;  %v9468_v43 = vcombine.high %v3361_v53, %v3365_v34  ;;  %v3405_v22 = vld [vmem:[#allocation13 + $0xd60] sm:$0xff]  ;;  %v3402_v6 = vld [vmem:[#allocation13 + $0xd48] sm:$0xff] }
 0x30a   :  { %8017 = vmatprep.subr.bf16.mxu1 %v9422_v44  ;;  %v2144_v44 = vsel %vm2136_vm14, %v9894_v16, %v2140_v29  ;;  %v11253_v29 = vld [vmem:[#allocation12] sm:$0xf] }
 0x30c   :  { %7772 = vmatpush1.bf16.msra.mxu0 %v9419_v54  ;;  %v9467_v54 = vcombine.low %v3361_v53, %v3365_v34  ;;  %v3409_v34 = vld [vmem:[#allocation13 + $0xd80] sm:$0xff] }
 0x30d   :  { %8018 = vmatpush1.bf16.msra.mxu1 %v9421_v56  ;;  %7773 = vmatprep.subr.bf16.mxu0 %v9428_v57  ;;  %v3370_v56 = vld [vmem:[#allocation13 + $0xc48] sm:$0xff] }
 0x30e   :  { %8019 = vmatprep.subr.bf16.mxu1 %v9430_v58  ;;  %v3374_v57 = vld [vmem:[#allocation13 + $0xc68] sm:$0xff]  ;;  %v11245_v58 = vpack.c.bf16 %v2144_v44, %v2144_v44 }
 0x30f   :  { %v9477_v15 = vcombine.low %v3370_v56, %v3374_v57 }
 0x310   :  { %7774 = vmatpush1.bf16.msra.mxu0 %v9427_v0  ;;  %v11247_v0 = vpack.c.bf16 %v2147_v52, %v2147_v52  ;;  %v3417_v52 = vld [vmem:[#allocation13 + $0xdc0] sm:$0xff] }
 0x311   :  { %8020 = vmatpush1.bf16.msra.mxu1 %v9429_v1  ;;  %7775 = vmatprep.subr.bf16.mxu0 %v9436_v2  ;;  %v9478_v1 = vcombine.high %v3370_v56, %v3374_v57  ;;  %v3378_v2 = vld [vmem:[#allocation13 + $0xc88] sm:$0xff] }
 0x312   :  { %8021 = vmatprep.subr.bf16.mxu1 %v9438_v13  ;;  %v9475_v13 = vcombine.low %v3369_v48, %v3373_v51  ;;  %v9486_v17 = vcombine.high %v3378_v2, %v3382_v50  ;;  %v9518_v51 = vcombine.high %v3410_v37, %v3414_v38 }
 0x314   :  { %7776 = vmatpush1.bf16.msra.mxu0 %v9435_v25  ;;  %v3389_v25 = vld [vmem:[#allocation13 + $0xce0] sm:$0xff] }
 0x315   :  { %8022 = vmatpush1.bf16.msra.mxu1 %v9437_v21  ;;  %7777 = vmatprep.subr.bf16.mxu0 %v9444_v20  ;;  %v3386_v21 = vld [vmem:[#allocation13 + $0xcc8] sm:$0xff]  ;;  %v9492_v7 = vcombine.high %v3385_v24, %v3389_v25 }
 0x316   :  { %8023 = vmatprep.subr.bf16.mxu1 %v9446_v8  ;;  %v3390_v20 = vld [vmem:[#allocation13 + $0xce8] sm:$0xff]  ;;  %v9485_v8 = vcombine.low %v3378_v2, %v3382_v50  ;;  %v9515_v2 = vcombine.low %v3409_v34, %v3413_v31 }
 0x317   :  { %v9494_v9 = vcombine.high %v3386_v21, %v3390_v20  ;;  %v9493_v16 = vcombine.low %v3386_v21, %v3390_v20  ;;  %v3425_v21 = vld [vmem:[#allocation13 + $0xe00] sm:$0xff] }
 0x318   :  { %7778 = vmatpush1.bf16.msra.mxu0 %v9443_v47  ;;  %v3394_v47 = vld [vmem:[#allocation13 + $0xd08] sm:$0xff]  ;;  %v3429_v20 = vld [vmem:[#allocation13 + $0xe20] sm:$0xff] }
 0x319   :  { %8024 = vmatpush1.bf16.msra.mxu1 %v9445_v14  ;;  %7779 = vmatprep.subr.bf16.mxu0 %v9452_v49  ;;  %v3398_v14 = vld [vmem:[#allocation13 + $0xd28] sm:$0xff]  ;;  %v9491_v49 = vcombine.low %v3385_v24, %v3389_v25 }
 0x31a   :  { %8025 = vmatprep.subr.bf16.mxu1 %v9454_v18  ;;  %v9500_v18 = vcombine.high %v3393_v41, %v3397_v11  ;;  %v9502_v4 = vcombine.high %v3394_v47, %v3398_v14 }
 0x31c   :  { %7780 = vmatpush1.bf16.msra.mxu0 %v9451_v3  ;;  %v3406_v3 = vld [vmem:[#allocation13 + $0xd68] sm:$0xff] }
 0x31d   :  { %8026 = vmatpush1.bf16.msra.mxu1 %v9453_v26  ;;  %7781 = vmatprep.subr.bf16.mxu0 %v9460_v28  ;;  %v9499_v26 = vcombine.low %v3393_v41, %v3397_v11  ;;  %v9501_v28 = vcombine.low %v3394_v47, %v3398_v14  ;;  %v9510_v53 = vcombine.high %v3402_v6, %v3406_v3  ;;  %v3433_v47 = vld [vmem:[#allocation13 + $0xe40] sm:$0xff] }
 0x31e   :  { %8027 = vmatprep.subr.bf16.mxu1 %v9462_v32  ;;  %v9508_v32 = vcombine.high %v3401_v23, %v3405_v22  ;;  %v9509_v44 = vcombine.low %v3402_v6, %v3406_v3  ;;  %v9532_v41 = vcombine.high %v3425_v21, %v3429_v20  ;;  %v3437_v14 = vld [vmem:[#allocation13 + $0xe60] sm:$0xff] }
 0x31f   :  { %v3441_v6 = vld [vmem:[#allocation13 + $0xe80] sm:$0xff] }
 0x320   :  { %7782 = vmatpush1.bf16.msra.mxu0 %v9459_v39  ;;  %v2277_v39 = vrot.slane %v11253_v29, %v11559_v33  ;;  %v3445_v3 = vld [vmem:[#allocation13 + $0xea0] sm:$0xff] }
 0x321   :  { %8028 = vmatpush1.bf16.msra.mxu1 %v9461_v40  ;;  %7792 = vmatprep.subr.bf16.mxu0 %v9468_v43  ;;  %v9507_v40 = vcombine.low %v3401_v23, %v3405_v22  ;;  %v2281_v43 = vrot.slane %v11253_v29, %v11562_v62  ;;  %v9540_v23 = vcombine.high %v3433_v47, %v3437_v14 }
 0x322   :  { %8038 = vmatprep.subr.bf16.mxu1 %v9470_v45  ;;  %v9516_v45 = vcombine.high %v3409_v34, %v3413_v31  ;;  %v9548_v34 = vcombine.high %v3441_v6, %v3445_v3 }
 0x323   :  { %7784 = vmatmul.mubr.bf16.vlgmr.msra.gmra.mrb[16].mxu0 %v11245_v58 }
 0x324   :  { %8030 = vmatmul.mubr.bf16.vlgmr.msra.gmra.mrb[16].mxu1 %v11245_v58  ;;  %7793 = vmatpush1.bf16.msra.mxu0 %v9467_v54  ;;  %v3421_v54 = vld [vmem:[#allocation13 + $0xde0] sm:$0xff] }
 0x325   :  { %7824 = vmatprep.mubr.bf16.mxu0 %v11247_v0  ;;  %8039 = vmatpush1.bf16.msra.mxu1 %v9469_v59  ;;  %v3418_v59 = vld [vmem:[#allocation13 + $0xdc8] sm:$0xff] }
 0x326   :  { %8070 = vmatprep.mubr.bf16.mxu1 %v11247_v0  ;;  %7794 = vmatprep.subr.bf16.mxu0 %v9476_v60  ;;  %v3422_v60 = vld [vmem:[#allocation13 + $0xde8] sm:$0xff] }
 0x327   :  { %8040 = vmatprep.subr.bf16.mxu1 %v9478_v1  ;;  %v9526_v25 = vcombine.high %v3418_v59, %v3422_v60 }
 0x328   :  { %7795 = vmatpush1.bf16.msra.mxu0 %v9475_v13 }
 0x329   :  { %8041 = vmatpush1.bf16.msra.mxu1 %v9477_v15  ;;  %7796 = vmatprep.subr.bf16.mxu0 %v9484_v10  ;;  %v9517_v10 = vcombine.low %v3410_v37, %v3414_v38  ;;  %v3449_v37 = vld [vmem:[#allocation13 + $0xec0] sm:$0xff] }
 0x32a   :  { %8042 = vmatprep.subr.bf16.mxu1 %v9486_v17  ;;  %v9524_v17 = vcombine.high %v3417_v52, %v3421_v54  ;;  %v3453_v38 = vld [vmem:[#allocation13 + $0xee0] sm:$0xff] }
 0x32c   :  { %7797 = vmatpush1.bf16.msra.mxu0 %v9483_v27  ;;  %v3426_v27 = vld [vmem:[#allocation13 + $0xe08] sm:$0xff] }
 0x32d   :  { %8043 = vmatpush1.bf16.msra.mxu1 %v9485_v8  ;;  %7798 = vmatprep.subr.bf16.mxu0 %v9492_v7  ;;  %v3430_v8 = vld [vmem:[#allocation13 + $0xe28] sm:$0xff]  ;;  %v9523_v7 = vcombine.low %v3417_v52, %v3421_v54  ;;  %v3457_v52 = vld [vmem:[#allocation13 + $0xf00] sm:$0xff] }
 0x32e   :  { %8044 = vmatprep.subr.bf16.mxu1 %v9494_v9  ;;  %v9525_v9 = vcombine.low %v3418_v59, %v3422_v60  ;;  %v9534_v11 = vcombine.high %v3426_v27, %v3430_v8  ;;  %v3461_v54 = vld [vmem:[#allocation13 + $0xf20] sm:$0xff]  ;;  %v3462_v59 = vld [vmem:[#allocation13 + $0xf28] sm:$0xff]  ;;  %v9555_v60 = vcombine.low %v3449_v37, %v3453_v38 }
 0x330   :  { %7799 = vmatpush1.bf16.msra.mxu0 %v9491_v49  ;;  %v3434_v49 = vld [vmem:[#allocation13 + $0xe48] sm:$0xff] }
 0x331   :  { %8045 = vmatpush1.bf16.msra.mxu1 %v9493_v16  ;;  %7800 = vmatprep.subr.bf16.mxu0 %v9500_v18  ;;  %v3438_v16 = vld [vmem:[#allocation13 + $0xe68] sm:$0xff]  ;;  %v9531_v18 = vcombine.low %v3425_v21, %v3429_v20 }
 0x332   :  { %8046 = vmatprep.subr.bf16.mxu1 %v9502_v4  ;;  %v9533_v4 = vcombine.low %v3426_v27, %v3430_v8  ;;  %v9542_v22 = vcombine.high %v3434_v49, %v3438_v16  ;;  %v3473_v27 = vld [vmem:[#allocation13 + $0xf80] sm:$0xff] }
 0x333   :  { %v3477_v8 = vld [vmem:[#allocation13 + $0xfa0] sm:$0xff] }
 0x334   :  { %7801 = vmatpush1.bf16.msra.mxu0 %v9499_v26  ;;  %v3442_v26 = vld [vmem:[#allocation13 + $0xe88] sm:$0xff] }
 0x335   :  { %8047 = vmatpush1.bf16.msra.mxu1 %v9501_v28  ;;  %7802 = vmatprep.subr.bf16.mxu0 %v9508_v32  ;;  %v3446_v28 = vld [vmem:[#allocation13 + $0xea8] sm:$0xff]  ;;  %v9539_v32 = vcombine.low %v3433_v47, %v3437_v14  ;;  %v9580_v14 = vcombine.high %v3473_v27, %v3477_v8 }
 0x336   :  { %v11259_v48 = vpop.f32.mrb[12].mxu0  ;;  %8048 = vmatprep.subr.bf16.mxu1 %v9510_v53  ;;  %v9541_v53 = vcombine.low %v3434_v49, %v3438_v16  ;;  %v9550_v31 = vcombine.high %v3442_v26, %v3446_v28  ;;  %v3481_v16 = vld [vmem:[#allocation13 + $0xfc0] sm:$0xff] }
 0x337   :  { %v2934_v56 = vpop.f32.mrb[12].mxu1  ;;  %v11261_v57 = vpop.f32.mrb[13].mxu0 }
 0x338   :  { %v11263_v61 = vadd.f32 %v2934_v56, %v2277_v39  ;;  %v2936_v63 = vpop.f32.mrb[13].mxu1  ;;  %v2856_v1 = vpop.f32.mrb[14].mxu0  ;;  %7803 = vmatpush1.bf16.msra.mxu0 %v9507_v40  ;;  %v3450_v39 = vld [vmem:[#allocation13 + $0xec8] sm:$0xff] }
 0x339   :  { %v11265_v50 = vadd.f32 %v2936_v63, %v2281_v43  ;;  %v2938_v13 = vpop.f32.mrb[14].mxu1  ;;  %8049 = vmatpush1.bf16.msra.mxu1 %v9509_v44  ;;  %v2857_v15 = vpop.f32.mrb[15].mxu0  ;;  %7804 = vmatprep.subr.bf16.mxu0 %v9516_v45  ;;  %v3454_v40 = vld [vmem:[#allocation13 + $0xee8] sm:$0xff]  ;;  %v9547_v43 = vcombine.low %v3441_v6, %v3445_v3  ;;  %v9549_v44 = vcombine.low %v3442_v26, %v3446_v28 }
 0x33a   :  { %v2939_v24 = vpop.f32.mrb[15].mxu1  ;;  %8050 = vmatprep.subr.bf16.mxu1 %v9518_v51  ;;  %v9556_v45 = vcombine.high %v3449_v37, %v3453_v38  ;;  %v9558_v51 = vcombine.high %v3450_v39, %v3454_v40  ;;  %v3458_v56 = vld [vmem:[#allocation13 + $0xf08] sm:$0xff]  ;;  %v9557_v63 = vcombine.low %v3450_v39, %v3454_v40  ;;  %v9564_v1 = vcombine.high %v3457_v52, %v3461_v54  ;;  %v3465_v13 = vld [vmem:[#allocation13 + $0xf40] sm:$0xff] }
 0x33b   :  { %v3469_v15 = vld [vmem:[#allocation13 + $0xf60] sm:$0xff]  ;;  %v9563_v24 = vcombine.low %v3457_v52, %v3461_v54  ;;  %v9579_v6 = vcombine.low %v3473_v27, %v3477_v8  ;;  %v2142_v28 = vmul.f32 %v11220_v42, %v11183_v46  ;;  %v3494_v37 = vld [vmem:[#allocation13 + $0x1028] sm:$0xff]  ;;  %vm2944_vm3 = vcmp.gt.f32.partialorder %v11265_v50, 0.0 }
 0x33c   :  { %7805 = vmatpush1.bf16.msra.mxu0 %v9515_v2  ;;  %v9566_v2 = vcombine.high %v3458_v56, %v3462_v59  ;;  %v9572_v21 = vcombine.high %v3465_v13, %v3469_v15  ;;  %v3513_v27 = vld [vmem:[#allocation13 + $0x10c0] sm:$0xff]  ;;  %vm2943_vm4 = vcmp.gt.f32.partialorder %v11263_v61, 0.0 }
 0x33d   :  { %8051 = vmatpush1.bf16.msra.mxu1 %v9517_v10  ;;  %7806 = vmatprep.subr.bf16.mxu0 %v9524_v17  ;;  %v3466_v10 = vld [vmem:[#allocation13 + $0xf48] sm:$0xff]  ;;  %v3517_v8 = vld [vmem:[#allocation13 + $0x10e0] sm:$0xff] }
 0x33e   :  { %8052 = vmatprep.subr.bf16.mxu1 %v9526_v25  ;;  %v3470_v17 = vld [vmem:[#allocation13 + $0xf68] sm:$0xff]  ;;  %v9565_v25 = vcombine.low %v3458_v56, %v3462_v59 }
 0x33f   :  { %v9574_v20 = vcombine.high %v3466_v10, %v3470_v17  ;;  %v9573_v47 = vcombine.low %v3466_v10, %v3470_v17  ;;  %v3498_v56 = vld [vmem:[#allocation13 + $0x1048] sm:$0xff] }
 0x340   :  { %7807 = vmatpush1.bf16.msra.mxu0 %v9523_v7  ;;  %v3474_v7 = vld [vmem:[#allocation13 + $0xf88] sm:$0xff] }
 0x341   :  { %8053 = vmatpush1.bf16.msra.mxu1 %v9525_v9  ;;  %7808 = vmatprep.subr.bf16.mxu0 %v9532_v41  ;;  %v3478_v9 = vld [vmem:[#allocation13 + $0xfa8] sm:$0xff]  ;;  %v2273_v41 = vrot.slane %v11253_v29, %v11560_v36 }
 0x342   :  { %8054 = vmatprep.subr.bf16.mxu1 %v9534_v11  ;;  %v9571_v11 = vcombine.low %v3465_v13, %v3469_v15  ;;  %v9582_v49 = vcombine.high %v3474_v7, %v3478_v9  ;;  %v9581_v3 = vcombine.low %v3474_v7, %v3478_v9  ;;  %v3502_v59 = vld [vmem:[#allocation13 + $0x1068] sm:$0xff]  ;;  %v3509_v13 = vld [vmem:[#allocation13 + $0x10a0] sm:$0xff] }
 0x343   :  { %v3506_v10 = vld [vmem:[#allocation13 + $0x1088] sm:$0xff] }
 0x344   :  { %7809 = vmatpush1.bf16.msra.mxu0 %v9531_v18  ;;  %v3485_v18 = vld [vmem:[#allocation13 + $0xfe0] sm:$0xff]  ;;  %v3510_v17 = vld [vmem:[#allocation13 + $0x10a8] sm:$0xff] }
 0x345   :  { %8055 = vmatpush1.bf16.msra.mxu1 %v9533_v4  ;;  %7810 = vmatprep.subr.bf16.mxu0 %v9540_v23  ;;  %v3482_v4 = vld [vmem:[#allocation13 + $0xfc8] sm:$0xff]  ;;  %v9588_v26 = vcombine.high %v3481_v16, %v3485_v18 }
 0x346   :  { %8056 = vmatprep.subr.bf16.mxu1 %v9542_v22  ;;  %v3486_v23 = vld [vmem:[#allocation13 + $0xfe8] sm:$0xff]  ;;  %v9899_v22 = vadd.f32 %v11261_v57, %v2273_v41  ;;  %v9587_v57 = vcombine.low %v3481_v16, %v3485_v18  ;;  %v3525_v16 = vld [vmem:[#allocation13 + $0x1120] sm:$0xff] }
 0x347   :  { %v9589_v39 = vcombine.low %v3482_v4, %v3486_v23  ;;  %v3514_v7 = vld [vmem:[#allocation13 + $0x10c8] sm:$0xff] }
 0x348   :  { %7811 = vmatpush1.bf16.msra.mxu0 %v9539_v32  ;;  %v9590_v32 = vcombine.high %v3482_v4, %v3486_v23  ;;  %v2946_v38 = vmul.f32 %v9899_v22, %v11183_v46  ;;  %vm2942_vm1 = vcmp.gt.f32.partialorder %v9899_v22, 0.0  ;;  %v3518_v9 = vld [vmem:[#allocation13 + $0x10e8] sm:$0xff]  ;;  %v9619_v23 = vcombine.low %v3513_v27, %v3517_v8 }
 0x349   :  { %8057 = vmatpush1.bf16.msra.mxu1 %v9541_v53  ;;  %7812 = vmatprep.subr.bf16.mxu0 %v9548_v34  ;;  %v3489_v53 = vld [vmem:[#allocation13 + $0x1000] sm:$0xff]  ;;  %v3522_v18 = vld [vmem:[#allocation13 + $0x1108] sm:$0xff] }
 0x34a   :  { %8058 = vmatprep.subr.bf16.mxu1 %v9550_v31  ;;  %v3493_v34 = vld [vmem:[#allocation13 + $0x1020] sm:$0xff]  ;;  %v3490_v31 = vld [vmem:[#allocation13 + $0x1008] sm:$0xff]  ;;  %v2950_v52 = vsel %vm2942_vm1, %v9899_v22, %v2946_v38  ;;  %v9621_v22 = vcombine.low %v3514_v7, %v3518_v9 }
 0x34b   :  { %v9596_v40 = vcombine.high %v3489_v53, %v3493_v34  ;;  %v9595_v54 = vcombine.low %v3489_v53, %v3493_v34  ;;  %v11277_v15 = vpack.c.bf16 %v2950_v52, %v2950_v52  ;;  %v3526_v4 = vld [vmem:[#allocation13 + $0x1128] sm:$0xff] }
 0x34c   :  { %7813 = vmatpush1.bf16.msra.mxu0 %v9547_v43  ;;  %v2146_v43 = vsel %vm2138_vm0, %v11220_v42, %v2142_v28  ;;  %v9606_v42 = vcombine.high %v3498_v56, %v3502_v59  ;;  %v3533_v28 = vld [vmem:[#allocation13 + $0x1160] sm:$0xff]  ;;  %v3534_v53 = vld [vmem:[#allocation13 + $0x1168] sm:$0xff] }
 0x34d   :  { %8059 = vmatpush1.bf16.msra.mxu1 %v9549_v44  ;;  %7814 = vmatprep.subr.bf16.mxu0 %v9556_v45  ;;  %v9598_v44 = vcombine.high %v3490_v31, %v3494_v37  ;;  %v3497_v45 = vld [vmem:[#allocation13 + $0x1040] sm:$0xff] }
 0x34e   :  { %8060 = vmatprep.subr.bf16.mxu1 %v9558_v51  ;;  %v3501_v51 = vld [vmem:[#allocation13 + $0x1060] sm:$0xff] }
 0x350   :  { %7815 = vmatpush1.bf16.msra.mxu0 %v9555_v60  ;;  %v11275_v60 = vpack.c.bf16 %v2146_v43, %v2146_v43  ;;  %v3542_v43 = vld [vmem:[#allocation13 + $0x11a8] sm:$0xff] }
 0x351   :  { %8061 = vmatpush1.bf16.msra.mxu1 %v9557_v63  ;;  %7816 = vmatprep.subr.bf16.mxu0 %v9564_v1  ;;  %v9597_v63 = vcombine.low %v3490_v31, %v3494_v37  ;;  %v9604_v1 = vcombine.high %v3497_v45, %v3501_v51  ;;  %v9629_v31 = vcombine.low %v3522_v18, %v3526_v4 }
 0x352   :  { %8062 = vmatprep.subr.bf16.mxu1 %v9566_v2  ;;  %v3505_v2 = vld [vmem:[#allocation13 + $0x1080] sm:$0xff] }
 0x353   :  { %v9611_v41 = vcombine.low %v3505_v2, %v3509_v13 }
 0x354   :  { %7817 = vmatpush1.bf16.msra.mxu0 %v9563_v24  ;;  %v9603_v24 = vcombine.low %v3497_v45, %v3501_v51 }
 0x355   :  { %8063 = vmatpush1.bf16.msra.mxu1 %v9565_v25  ;;  %7818 = vmatprep.subr.bf16.mxu0 %v9572_v21  ;;  %v9605_v25 = vcombine.low %v3498_v56, %v3502_v59  ;;  %v9612_v21 = vcombine.high %v3505_v2, %v3509_v13  ;;  %v3549_v56 = vld [vmem:[#allocation13 + $0x11e0] sm:$0xff]  ;;  %v3546_v59 = vld [vmem:[#allocation13 + $0x11c8] sm:$0xff] }
 0x356   :  { %8064 = vmatprep.subr.bf16.mxu1 %v9574_v20  ;;  %v9614_v20 = vcombine.high %v3506_v10, %v3510_v17 }
 0x358   :  { %7819 = vmatpush1.bf16.msra.mxu0 %v9571_v11  ;;  %v9613_v11 = vcombine.low %v3506_v10, %v3510_v17  ;;  %v3553_v10 = vld [vmem:[#allocation13 + $0x1200] sm:$0xff] }
 0x359   :  { %8065 = vmatpush1.bf16.msra.mxu1 %v9573_v47  ;;  %7820 = vmatprep.subr.bf16.mxu0 %v9580_v14  ;;  %v9620_v47 = vcombine.high %v3513_v27, %v3517_v8  ;;  %v9622_v14 = vcombine.high %v3514_v7, %v3518_v9  ;;  %v3557_v17 = vld [vmem:[#allocation13 + $0x1220] sm:$0xff] }
 0x35a   :  { %8066 = vmatprep.subr.bf16.mxu1 %v9582_v49  ;;  %v3521_v49 = vld [vmem:[#allocation13 + $0x1100] sm:$0xff]  ;;  %v9660_v27 = vcombine.high %v3553_v10, %v3557_v17 }
 0x35b   :  { %v9627_v34 = vcombine.low %v3521_v49, %v3525_v16  ;;  %v3561_v7 = vld [vmem:[#allocation13 + $0x1240] sm:$0xff] }
 0x35c   :  { %7821 = vmatpush1.bf16.msra.mxu0 %v9579_v6  ;;  %v9628_v6 = vcombine.high %v3521_v49, %v3525_v16  ;;  %v3565_v9 = vld [vmem:[#allocation13 + $0x1260] sm:$0xff] }
 0x35d   :  { %8067 = vmatpush1.bf16.msra.mxu1 %v9581_v3  ;;  %7822 = vmatprep.subr.bf16.mxu0 %v9588_v26  ;;  %v9630_v3 = vcombine.high %v3522_v18, %v3526_v4  ;;  %v3529_v26 = vld [vmem:[#allocation13 + $0x1140] sm:$0xff]  ;;  %v9668_v49 = vcombine.high %v3561_v7, %v3565_v9 }
 0x35e   :  { %8068 = vmatprep.subr.bf16.mxu1 %v9590_v32  ;;  %v3530_v32 = vld [vmem:[#allocation13 + $0x1148] sm:$0xff]  ;;  %v9636_v37 = vcombine.high %v3529_v26, %v3533_v28  ;;  %v3569_v18 = vld [vmem:[#allocation13 + $0x1280] sm:$0xff] }
 0x35f   :  { %v9638_v38 = vcombine.high %v3530_v32, %v3534_v53  ;;  %v9637_v45 = vcombine.low %v3530_v32, %v3534_v53  ;;  %v3573_v4 = vld [vmem:[#allocation13 + $0x12a0] sm:$0xff] }
 0x360   :  { %7823 = vmatpush1.bf16.msra.mxu0 %v9587_v57  ;;  %v3537_v57 = vld [vmem:[#allocation13 + $0x1180] sm:$0xff] }
 0x361   :  { %8069 = vmatpush1.bf16.msra.mxu1 %v9589_v39  ;;  %7833 = vmatprep.subr.bf16.mxu0 %v9596_v40  ;;  %v3541_v39 = vld [vmem:[#allocation13 + $0x11a0] sm:$0xff]  ;;  %v3538_v40 = vld [vmem:[#allocation13 + $0x1188] sm:$0xff] }
 0x362   :  { %8079 = vmatprep.subr.bf16.mxu1 %v9598_v44  ;;  %v9635_v44 = vcombine.low %v3529_v26, %v3533_v28  ;;  %v9644_v51 = vcombine.high %v3537_v57, %v3541_v39  ;;  %v9646_v52 = vcombine.high %v3538_v40, %v3542_v43  ;;  %v9645_v2 = vcombine.low %v3538_v40, %v3542_v43  ;;  %v3577_v32 = vld [vmem:[#allocation13 + $0x12c0] sm:$0xff] }
 0x363   :  { %7825 = vmatmul.mubr.bf16.vlgmr.msra.gmra.mrb[16].mxu0 %v11275_v60  ;;  %v9676_v26 = vcombine.high %v3569_v18, %v3573_v4  ;;  %v3581_v53 = vld [vmem:[#allocation13 + $0x12e0] sm:$0xff] }
 0x364   :  { %8071 = vmatmul.mubr.bf16.vlgmr.msra.gmra.mrb[16].mxu1 %v11275_v60  ;;  %7834 = vmatpush1.bf16.msra.mxu0 %v9595_v54  ;;  %v3545_v54 = vld [vmem:[#allocation13 + $0x11c0] sm:$0xff] }
 0x365   :  { %7865 = vmatprep.mubr.bf16.mxu0 %v11277_v15  ;;  %8080 = vmatpush1.bf16.msra.mxu1 %v9597_v63  ;;  %v3550_v63 = vld [vmem:[#allocation13 + $0x11e8] sm:$0xff]  ;;  %v9652_v13 = vcombine.high %v3545_v54, %v3549_v56  ;;  %v3585_v40 = vld [vmem:[#allocation13 + $0x1300] sm:$0xff] }
 0x366   :  { %8111 = vmatprep.mubr.bf16.mxu1 %v11277_v15  ;;  %7835 = vmatprep.subr.bf16.mxu0 %v9604_v1  ;;  %v9643_v1 = vcombine.low %v3537_v57, %v3541_v39  ;;  %v9684_v57 = vcombine.high %v3577_v32, %v3581_v53  ;;  %v3589_v43 = vld [vmem:[#allocation13 + $0x1320] sm:$0xff] }
 0x367   :  { %8081 = vmatprep.subr.bf16.mxu1 %v9606_v42  ;;  %v9654_v42 = vcombine.high %v3546_v59, %v3550_v63 }
 0x368   :  { %7836 = vmatpush1.bf16.msra.mxu0 %v9603_v24  ;;  %v3554_v24 = vld [vmem:[#allocation13 + $0x1208] sm:$0xff] }
 0x369   :  { %8082 = vmatpush1.bf16.msra.mxu1 %v9605_v25  ;;  %7837 = vmatprep.subr.bf16.mxu0 %v9612_v21  ;;  %v3558_v25 = vld [vmem:[#allocation13 + $0x1228] sm:$0xff]  ;;  %v9651_v21 = vcombine.low %v3545_v54, %v3549_v56  ;;  %v9692_v54 = vcombine.high %v3585_v40, %v3589_v43 }
 0x36a   :  { %8083 = vmatprep.subr.bf16.mxu1 %v9614_v20  ;;  %v9653_v20 = vcombine.low %v3546_v59, %v3550_v63  ;;  %v9662_v8 = vcombine.high %v3554_v24, %v3558_v25  ;;  %v3593_v59 = vld [vmem:[#allocation13 + $0x1340] sm:$0xff] }
 0x36b   :  { %v3597_v63 = vld [vmem:[#allocation13 + $0x1360] sm:$0xff] }
 0x36c   :  { %7838 = vmatpush1.bf16.msra.mxu0 %v9611_v41  ;;  %v3562_v41 = vld [vmem:[#allocation13 + $0x1248] sm:$0xff] }
 0x36d   :  { %8084 = vmatpush1.bf16.msra.mxu1 %v9613_v11  ;;  %7839 = vmatprep.subr.bf16.mxu0 %v9620_v47  ;;  %v3566_v11 = vld [vmem:[#allocation13 + $0x1268] sm:$0xff]  ;;  %v9659_v47 = vcombine.low %v3553_v10, %v3557_v17  ;;  %v9700_v10 = vcombine.high %v3593_v59, %v3597_v63  ;;  %v2269_v17 = vrot.slane %v11253_v29, %v11561_v55 }
 0x36e   :  { %8085 = vmatprep.subr.bf16.mxu1 %v9622_v14  ;;  %v9661_v14 = vcombine.low %v3554_v24, %v3558_v25  ;;  %v9670_v16 = vcombine.high %v3562_v41, %v3566_v11  ;;  %v3601_v25 = vld [vmem:[#allocation13 + $0x1380] sm:$0xff]  ;;  %v3614_v29 = vld [vmem:[#allocation13 + $0x13e8] sm:$0xff] }
 0x370   :  { %7840 = vmatpush1.bf16.msra.mxu0 %v9619_v23  ;;  %v3570_v23 = vld [vmem:[#allocation13 + $0x1288] sm:$0xff] }
 0x371   :  { %8086 = vmatpush1.bf16.msra.mxu1 %v9621_v22  ;;  %7841 = vmatprep.subr.bf16.mxu0 %v9628_v6  ;;  %v3574_v22 = vld [vmem:[#allocation13 + $0x12a8] sm:$0xff]  ;;  %v9667_v6 = vcombine.low %v3561_v7, %v3565_v9 }
 0x372   :  { %8087 = vmatprep.subr.bf16.mxu1 %v9630_v3  ;;  %v9669_v3 = vcombine.low %v3562_v41, %v3566_v11  ;;  %v9678_v28 = vcombine.high %v3570_v23, %v3574_v22  ;;  %v9898_v41 = vadd.f32 %v11259_v48, %v2269_v17  ;;  %v3618_v48 = vld [vmem:[#allocation13 + $0x1408] sm:$0xff]  ;;  %v3641_v17 = vld [vmem:[#allocation13 + $0x14c0] sm:$0xff] }
 0x374   :  { %7842 = vmatpush1.bf16.msra.mxu0 %v9627_v34  ;;  %v3578_v34 = vld [vmem:[#allocation13 + $0x12c8] sm:$0xff]  ;;  %vm2941_vm2 = vcmp.gt.f32.partialorder %v9898_v41, 0.0 }
 0x375   :  { %8088 = vmatpush1.bf16.msra.mxu1 %v9629_v31  ;;  %7843 = vmatprep.subr.bf16.mxu0 %v9636_v37  ;;  %v3582_v31 = vld [vmem:[#allocation13 + $0x12e8] sm:$0xff]  ;;  %v9675_v37 = vcombine.low %v3569_v18, %v3573_v4 }
 0x376   :  { %8089 = vmatprep.subr.bf16.mxu1 %v9638_v38  ;;  %v9677_v38 = vcombine.low %v3570_v23, %v3574_v22  ;;  %v9686_v39 = vcombine.high %v3578_v34, %v3582_v31  ;;  %v2945_v23 = vmul.f32 %v9898_v41, %v11183_v46 }
 0x378   :  { %7844 = vmatpush1.bf16.msra.mxu0 %v9635_v44  ;;  %v3586_v44 = vld [vmem:[#allocation13 + $0x1308] sm:$0xff] }
 0x379   :  { %8090 = vmatpush1.bf16.msra.mxu1 %v9637_v45  ;;  %7845 = vmatprep.subr.bf16.mxu0 %v9644_v51  ;;  %v3590_v45 = vld [vmem:[#allocation13 + $0x1328] sm:$0xff]  ;;  %v9683_v51 = vcombine.low %v3577_v32, %v3581_v53 }
 0x37a   :  { %8091 = vmatprep.subr.bf16.mxu1 %v9646_v52  ;;  %v9685_v52 = vcombine.low %v3578_v34, %v3582_v31  ;;  %v9694_v56 = vcombine.high %v3586_v44, %v3590_v45  ;;  %v2949_v31 = vsel %vm2941_vm2, %v9898_v41, %v2945_v23  ;;  %v3653_v41 = vld [vmem:[#allocation13 + $0x1520] sm:$0xff]  ;;  %v3658_v23 = vld [vmem:[#allocation13 + $0x1548] sm:$0xff] }
 0x37c   :  { %7846 = vmatpush1.bf16.msra.mxu0 %v9643_v1  ;;  %v3594_v1 = vld [vmem:[#allocation13 + $0x1348] sm:$0xff] }
 0x37d   :  { %8092 = vmatpush1.bf16.msra.mxu1 %v9645_v2  ;;  %7847 = vmatprep.subr.bf16.mxu0 %v9652_v13  ;;  %v3598_v2 = vld [vmem:[#allocation13 + $0x1368] sm:$0xff]  ;;  %v9691_v13 = vcombine.low %v3585_v40, %v3589_v43 }
 0x37e   :  { %8093 = vmatprep.subr.bf16.mxu1 %v9654_v42  ;;  %v9693_v42 = vcombine.low %v3586_v44, %v3590_v45  ;;  %v9702_v24 = vcombine.high %v3594_v1, %v3598_v2  ;;  %v9701_v7 = vcombine.low %v3594_v1, %v3598_v2  ;;  %v3626_v43 = vld [vmem:[#allocation13 + $0x1448] sm:$0xff]  ;;  %v11291_v45 = vpack.c.bf16 %v2949_v31, %v2949_v31 }
 0x37f   :  { %v3630_v44 = vld [vmem:[#allocation13 + $0x1468] sm:$0xff] }
 0x380   :  { %7848 = vmatpush1.bf16.msra.mxu0 %v9651_v21  ;;  %v3605_v21 = vld [vmem:[#allocation13 + $0x13a0] sm:$0xff]  ;;  %v3634_v1 = vld [vmem:[#allocation13 + $0x1488] sm:$0xff] }
 0x381   :  { %8094 = vmatpush1.bf16.msra.mxu1 %v9653_v20  ;;  %7849 = vmatprep.subr.bf16.mxu0 %v9660_v27  ;;  %v3602_v20 = vld [vmem:[#allocation13 + $0x1388] sm:$0xff]  ;;  %v9708_v9 = vcombine.high %v3601_v25, %v3605_v21 }
 0x382   :  { %8095 = vmatprep.subr.bf16.mxu1 %v9662_v8  ;;  %v3606_v27 = vld [vmem:[#allocation13 + $0x13a8] sm:$0xff]  ;;  %v9699_v8 = vcombine.low %v3593_v59, %v3597_v63  ;;  %v9734_v63 = vcombine.high %v3626_v43, %v3630_v44 }
 0x383   :  { %v9710_v11 = vcombine.high %v3602_v20, %v3606_v27  ;;  %v9709_v18 = vcombine.low %v3602_v20, %v3606_v27 }
 0x384   :  { %7850 = vmatpush1.bf16.msra.mxu0 %v9659_v47  ;;  %v3609_v47 = vld [vmem:[#allocation13 + $0x13c0] sm:$0xff] }
 0x385   :  { %8096 = vmatpush1.bf16.msra.mxu1 %v9661_v14  ;;  %7851 = vmatprep.subr.bf16.mxu0 %v9668_v49  ;;  %v3613_v14 = vld [vmem:[#allocation13 + $0x13e0] sm:$0xff]  ;;  %v3610_v49 = vld [vmem:[#allocation13 + $0x13c8] sm:$0xff] }
 0x386   :  { %8097 = vmatprep.subr.bf16.mxu1 %v9670_v16  ;;  %v9707_v16 = vcombine.low %v3601_v25, %v3605_v21  ;;  %v9716_v4 = vcombine.high %v3609_v47, %v3613_v14  ;;  %v9718_v22 = vcombine.high %v3610_v49, %v3614_v29  ;;  %v9715_v32 = vcombine.low %v3609_v47, %v3613_v14  ;;  %v3642_v25 = vld [vmem:[#allocation13 + $0x14c8] sm:$0xff] }
 0x387   :  { %v9717_v53 = vcombine.low %v3610_v49, %v3614_v29  ;;  %v3646_v21 = vld [vmem:[#allocation13 + $0x14e8] sm:$0xff] }
 0x388   :  { %7852 = vmatpush1.bf16.msra.mxu0 %v9667_v6  ;;  %v3617_v6 = vld [vmem:[#allocation13 + $0x1400] sm:$0xff]  ;;  %v3654_v47 = vld [vmem:[#allocation13 + $0x1528] sm:$0xff]  ;;  %v9749_v49 = vcombine.low %v3642_v25, %v3646_v21 }
 0x389   :  { %8098 = vmatpush1.bf16.msra.mxu1 %v9669_v3  ;;  %7853 = vmatprep.subr.bf16.mxu0 %v9676_v26  ;;  %v3621_v3 = vld [vmem:[#allocation13 + $0x1420] sm:$0xff]  ;;  %v3622_v26 = vld [vmem:[#allocation13 + $0x1428] sm:$0xff] }
 0x38a   :  { %8099 = vmatprep.subr.bf16.mxu1 %v9678_v28  ;;  %v2948_v28 = vmul.f32 %v11265_v50, %v11183_v46  ;;  %v9724_v34 = vcombine.high %v3617_v6, %v3621_v3  ;;  %v9723_v40 = vcombine.low %v3617_v6, %v3621_v3 }
 0x38c   :  { %7854 = vmatpush1.bf16.msra.mxu0 %v9675_v37  ;;  %v9726_v37 = vcombine.high %v3618_v48, %v3622_v26 }
 0x38d   :  { %8100 = vmatpush1.bf16.msra.mxu1 %v9677_v38  ;;  %7855 = vmatprep.subr.bf16.mxu0 %v9684_v57  ;;  %v3625_v38 = vld [vmem:[#allocation13 + $0x1440] sm:$0xff] }
 0x38e   :  { %8101 = vmatprep.subr.bf16.mxu1 %v9686_v39  ;;  %v3629_v57 = vld [vmem:[#allocation13 + $0x1460] sm:$0xff]  ;;  %v2952_v39 = vsel %vm2944_vm3, %v11265_v50, %v2948_v28  ;;  %v3638_v50 = vld [vmem:[#allocation13 + $0x14a8] sm:$0xff] }
 0x38f   :  { %v11293_v59 = vpack.c.bf16 %v2952_v39, %v2952_v39  ;;  %v9731_v2 = vcombine.low %v3625_v38, %v3629_v57  ;;  %v9741_v27 = vcombine.low %v3634_v1, %v3638_v50  ;;  %v3665_v28 = vld [vmem:[#allocation13 + $0x1580] sm:$0xff] }
 0x390   :  { %7856 = vmatpush1.bf16.msra.mxu0 %v9683_v51  ;;  %v9725_v51 = vcombine.low %v3618_v48, %v3622_v26  ;;  %v3673_v39 = vld [vmem:[#allocation13 + $0x15c0] sm:$0xff] }
 0x391   :  { %8102 = vmatpush1.bf16.msra.mxu1 %v9685_v52  ;;  %7857 = vmatprep.subr.bf16.mxu0 %v9692_v54  ;;  %v9732_v52 = vcombine.high %v3625_v38, %v3629_v57  ;;  %v3633_v54 = vld [vmem:[#allocation13 + $0x1480] sm:$0xff] }
 0x392   :  { %8103 = vmatprep.subr.bf16.mxu1 %v9694_v56  ;;  %v3637_v56 = vld [vmem:[#allocation13 + $0x14a0] sm:$0xff] }
 0x393   :  { %v9739_v20 = vcombine.low %v3633_v54, %v3637_v56 }
 0x394   :  { %7858 = vmatpush1.bf16.msra.mxu0 %v9691_v13  ;;  %v9733_v13 = vcombine.low %v3626_v43, %v3630_v44  ;;  %v3674_v43 = vld [vmem:[#allocation13 + $0x15c8] sm:$0xff] }
 0x395   :  { %8104 = vmatpush1.bf16.msra.mxu1 %v9693_v42  ;;  %7859 = vmatprep.subr.bf16.mxu0 %v9700_v10  ;;  %v9740_v42 = vcombine.high %v3633_v54, %v3637_v56  ;;  %v9742_v10 = vcombine.high %v3634_v1, %v3638_v50  ;;  %v3678_v44 = vld [vmem:[#allocation13 + $0x15e8] sm:$0xff]  ;;  %v3685_v1 = vld [vmem:[#allocation13 + $0x1620] sm:$0xff] }
 0x396   :  { %8105 = vmatprep.subr.bf16.mxu1 %v9702_v24  ;;  %v3645_v24 = vld [vmem:[#allocation13 + $0x14e0] sm:$0xff]  ;;  %v9782_v56 = vcombine.high %v3674_v43, %v3678_v44  ;;  %v3682_v50 = vld [vmem:[#allocation13 + $0x1608] sm:$0xff] }
 0x397   :  { %v9747_v14 = vcombine.low %v3641_v17, %v3645_v24 }
 0x398   :  { %7860 = vmatpush1.bf16.msra.mxu0 %v9699_v8  ;;  %v9748_v8 = vcombine.high %v3641_v17, %v3645_v24  ;;  %v3689_v24 = vld [vmem:[#allocation13 + $0x1640] sm:$0xff] }
 0x399   :  { %8106 = vmatpush1.bf16.msra.mxu1 %v9701_v7  ;;  %7861 = vmatprep.subr.bf16.mxu0 %v9708_v9  ;;  %v9750_v7 = vcombine.high %v3642_v25, %v3646_v21  ;;  %v3649_v9 = vld [vmem:[#allocation13 + $0x1500] sm:$0xff]  ;;  %v3690_v21 = vld [vmem:[#allocation13 + $0x1648] sm:$0xff] }
 0x39a   :  { %8107 = vmatprep.subr.bf16.mxu1 %v9710_v11  ;;  %v3650_v11 = vld [vmem:[#allocation13 + $0x1508] sm:$0xff]  ;;  %v9756_v29 = vcombine.high %v3649_v9, %v3653_v41  ;;  %v9755_v6 = vcombine.low %v3649_v9, %v3653_v41  ;;  %v3693_v25 = vld [vmem:[#allocation13 + $0x1660] sm:$0xff] }
 0x39b   :  { %v9757_v3 = vcombine.low %v3650_v11, %v3654_v47  ;;  %v3697_v41 = vld [vmem:[#allocation13 + $0x1680] sm:$0xff] }
 0x39c   :  { %7862 = vmatpush1.bf16.msra.mxu0 %v9707_v16  ;;  %v9758_v16 = vcombine.high %v3650_v11, %v3654_v47  ;;  %v3701_v11 = vld [vmem:[#allocation13 + $0x16a0] sm:$0xff]  ;;  %v3698_v47 = vld [vmem:[#allocation13 + $0x1688] sm:$0xff] }
 0x39d   :  { %8108 = vmatpush1.bf16.msra.mxu1 %v9709_v18  ;;  %7863 = vmatprep.subr.bf16.mxu0 %v9716_v4  ;;  %v3657_v18 = vld [vmem:[#allocation13 + $0x1540] sm:$0xff] }
 0x39e   :  { %8109 = vmatprep.subr.bf16.mxu1 %v9718_v22  ;;  %v3661_v4 = vld [vmem:[#allocation13 + $0x1560] sm:$0xff]  ;;  %v3662_v22 = vld [vmem:[#allocation13 + $0x1568] sm:$0xff] }
 0x39f   :  { %v9764_v48 = vcombine.high %v3657_v18, %v3661_v4  ;;  %v9766_v26 = vcombine.high %v3658_v23, %v3662_v22  ;;  %v9763_v31 = vcombine.low %v3657_v18, %v3661_v4  ;;  %v3705_v4 = vld [vmem:[#allocation13 + $0x16c0] sm:$0xff] }
 0x3a0   :  { %7864 = vmatpush1.bf16.msra.mxu0 %v9715_v32  ;;  %v3669_v32 = vld [vmem:[#allocation13 + $0x15a0] sm:$0xff] }
 0x3a1   :  { %8110 = vmatpush1.bf16.msra.mxu1 %v9717_v53  ;;  %7874 = vmatprep.subr.bf16.mxu0 %v9724_v34  ;;  %v3666_v53 = vld [vmem:[#allocation13 + $0x1588] sm:$0xff]  ;;  %v9772_v38 = vcombine.high %v3665_v28, %v3669_v32 }
 0x3a2   :  { %8120 = vmatprep.subr.bf16.mxu1 %v9726_v37  ;;  %v3670_v34 = vld [vmem:[#allocation13 + $0x15a8] sm:$0xff]  ;;  %v9765_v37 = vcombine.low %v3658_v23, %v3662_v22  ;;  %v3709_v23 = vld [vmem:[#allocation13 + $0x16e0] sm:$0xff] }
 0x3a3   :  { %7866 = vmatmul.mubr.bf16.vlgmr.msra.gmra.mrb[16].mxu0 %v11291_v45  ;;  %v9774_v57 = vcombine.high %v3666_v53, %v3670_v34  ;;  %v3706_v22 = vld [vmem:[#allocation13 + $0x16c8] sm:$0xff] }
 0x3a4   :  { %8112 = vmatmul.mubr.bf16.vlgmr.msra.gmra.mrb[16].mxu1 %v11291_v45  ;;  %7875 = vmatpush1.bf16.msra.mxu0 %v9723_v40  ;;  %v3677_v40 = vld [vmem:[#allocation13 + $0x15e0] sm:$0xff] }
 0x3a5   :  { %7906 = vmatprep.mubr.bf16.mxu0 %v11293_v59  ;;  %8121 = vmatpush1.bf16.msra.mxu1 %v9725_v51  ;;  %v9771_v51 = vcombine.low %v3665_v28, %v3669_v32  ;;  %v9780_v54 = vcombine.high %v3673_v39, %v3677_v40  ;;  %v3713_v32 = vld [vmem:[#allocation13 + $0x1700] sm:$0xff] }
 0x3a6   :  { %8152 = vmatprep.mubr.bf16.mxu1 %v11293_v59  ;;  %7876 = vmatprep.subr.bf16.mxu0 %v9732_v52  ;;  %v9773_v52 = vcombine.low %v3666_v53, %v3670_v34  ;;  %v3717_v53 = vld [vmem:[#allocation13 + $0x1720] sm:$0xff]  ;;  %v3714_v34 = vld [vmem:[#allocation13 + $0x1708] sm:$0xff] }
 0x3a7   :  { %8122 = vmatprep.subr.bf16.mxu1 %v9734_v63  ;;  %v3681_v63 = vld [vmem:[#allocation13 + $0x1600] sm:$0xff] }
 0x3a8   :  { %7877 = vmatpush1.bf16.msra.mxu0 %v9731_v2  ;;  %v3686_v2 = vld [vmem:[#allocation13 + $0x1628] sm:$0xff] }
 0x3a9   :  { %8123 = vmatpush1.bf16.msra.mxu1 %v9733_v13  ;;  %7878 = vmatprep.subr.bf16.mxu0 %v9740_v42  ;;  %v9779_v13 = vcombine.low %v3673_v39, %v3677_v40  ;;  %v9781_v42 = vcombine.low %v3674_v43, %v3678_v44  ;;  %v9790_v17 = vcombine.high %v3682_v50, %v3686_v2  ;;  %v3721_v40 = vld [vmem:[#allocation13 + $0x1740] sm:$0xff]  ;;  %v3722_v44 = vld [vmem:[#allocation13 + $0x1748] sm:$0xff] }
 0x3aa   :  { %8124 = vmatprep.subr.bf16.mxu1 %v9742_v10  ;;  %v9788_v10 = vcombine.high %v3681_v63, %v3685_v1  ;;  %v3725_v43 = vld [vmem:[#allocation13 + $0x1760] sm:$0xff] }
 0x3ac   :  { %7879 = vmatpush1.bf16.msra.mxu0 %v9739_v20  ;;  %v3694_v20 = vld [vmem:[#allocation13 + $0x1668] sm:$0xff] }
 0x3ad   :  { %8125 = vmatpush1.bf16.msra.mxu1 %v9741_v27  ;;  %7880 = vmatprep.subr.bf16.mxu0 %v9748_v8  ;;  %v9787_v27 = vcombine.low %v3681_v63, %v3685_v1  ;;  %v9789_v8 = vcombine.low %v3682_v50, %v3686_v2  ;;  %v9798_v9 = vcombine.high %v3690_v21, %v3694_v20  ;;  %v3729_v1 = vld [vmem:[#allocation13 + $0x1780] sm:$0xff]  ;;  %v3730_v2 = vld [vmem:[#allocation13 + $0x1788] sm:$0xff] }
 0x3ae   :  { %8126 = vmatprep.subr.bf16.mxu1 %v9750_v7  ;;  %v9796_v7 = vcombine.high %v3689_v24, %v3693_v25  ;;  %v3733_v50 = vld [vmem:[#allocation13 + $0x17a0] sm:$0xff] }
 0x3b0   :  { %7881 = vmatpush1.bf16.msra.mxu0 %v9747_v14  ;;  %v3702_v14 = vld [vmem:[#allocation13 + $0x16a8] sm:$0xff] }
 0x3b1   :  { %8127 = vmatpush1.bf16.msra.mxu1 %v9749_v49  ;;  %7882 = vmatprep.subr.bf16.mxu0 %v9756_v29  ;;  %v9795_v49 = vcombine.low %v3689_v24, %v3693_v25  ;;  %v9797_v29 = vcombine.low %v3690_v21, %v3694_v20  ;;  %v9806_v18 = vcombine.high %v3698_v47, %v3702_v14  ;;  %v3737_v25 = vld [vmem:[#allocation13 + $0x17c0] sm:$0xff]  ;;  %v3738_v20 = vld [vmem:[#allocation13 + $0x17c8] sm:$0xff] }
 0x3b2   :  { %8128 = vmatprep.subr.bf16.mxu1 %v9758_v16  ;;  %v9804_v16 = vcombine.high %v3697_v41, %v3701_v11  ;;  %v3741_v21 = vld [vmem:[#allocation13 + $0x17e0] sm:$0xff] }
 0x3b4   :  { %7883 = vmatpush1.bf16.msra.mxu0 %v9755_v6  ;;  %v3710_v6 = vld [vmem:[#allocation13 + $0x16e8] sm:$0xff] }
 0x3b5   :  { %8129 = vmatpush1.bf16.msra.mxu1 %v9757_v3  ;;  %7884 = vmatprep.subr.bf16.mxu0 %v9764_v48  ;;  %v9803_v3 = vcombine.low %v3697_v41, %v3701_v11  ;;  %v9805_v48 = vcombine.low %v3698_v47, %v3702_v14  ;;  %v9814_v28 = vcombine.high %v3706_v22, %v3710_v6  ;;  %v2979_v47 = vld [vmem:[#allocation13 + $0x10] sm:$0xff] }
 0x3b6   :  { %8130 = vmatprep.subr.bf16.mxu1 %v9766_v26  ;;  %v9812_v26 = vcombine.high %v3705_v4, %v3709_v23  ;;  %v2947_v41 = vmul.f32 %v11263_v61, %v11183_v46  ;;  %v2983_v14 = vld [vmem:[#allocation13 + $0x30] sm:$0xff] }
 0x3b7   :  { %v2991_v46 = vld [vmem:[#allocation13 + $0x70] sm:$0xff] }
 0x3b8   :  { %7885 = vmatpush1.bf16.msra.mxu0 %v9763_v31  ;;  %v3718_v31 = vld [vmem:[#allocation13 + $0x1728] sm:$0xff] }
 0x3b9   :  { %8131 = vmatpush1.bf16.msra.mxu1 %v9765_v37  ;;  %7886 = vmatprep.subr.bf16.mxu0 %v9772_v38  ;;  %v9811_v37 = vcombine.low %v3705_v4, %v3709_v23  ;;  %v9813_v38 = vcombine.low %v3706_v22, %v3710_v6  ;;  %v9822_v39 = vcombine.high %v3714_v34, %v3718_v31  ;;  %v2987_v6 = vld [vmem:[#allocation13 + $0x50] sm:$0xff] }
 0x3ba   :  { %8132 = vmatprep.subr.bf16.mxu1 %v9774_v57  ;;  %v9820_v57 = vcombine.high %v3713_v32, %v3717_v53  ;;  %v9088_v4 = vcombine.high %v2979_v47, %v2983_v14  ;;  %v2951_v23 = vsel %vm2943_vm4, %v11263_v61, %v2947_v41 }
 0x3bc   :  { %7887 = vmatpush1.bf16.msra.mxu0 %v9771_v51  ;;  %v3726_v51 = vld [vmem:[#allocation13 + $0x1768] sm:$0xff] }
 0x3bd   :  { %8133 = vmatpush1.bf16.msra.mxu1 %v9773_v52  ;;  %7888 = vmatprep.subr.bf16.mxu0 %v9780_v54  ;;  %v9819_v52 = vcombine.low %v3713_v32, %v3717_v53  ;;  %v9821_v54 = vcombine.low %v3714_v34, %v3718_v31  ;;  %v9830_v63 = vcombine.high %v3722_v44, %v3726_v51  ;;  %v2995_v34 = vld [vmem:[#allocation13 + $0x90] sm:$0xff] }
 0x3be   :  { %8134 = vmatprep.subr.bf16.mxu1 %v9782_v56  ;;  %v9828_v56 = vcombine.high %v3721_v40, %v3725_v43  ;;  %v9096_v53 = vcombine.high %v2987_v6, %v2991_v46  ;;  %v2999_v31 = vld [vmem:[#allocation13 + $0xb0] sm:$0xff] }
 0x3c0   :  { %7889 = vmatpush1.bf16.msra.mxu0 %v9779_v13  ;;  %v3734_v13 = vld [vmem:[#allocation13 + $0x17a8] sm:$0xff] }
 0x3c1   :  { %8135 = vmatpush1.bf16.msra.mxu1 %v9781_v42  ;;  %7890 = vmatprep.subr.bf16.mxu0 %v9788_v10  ;;  %v9827_v42 = vcombine.low %v3721_v40, %v3725_v43  ;;  %v9829_v10 = vcombine.low %v3722_v44, %v3726_v51  ;;  %v9838_v24 = vcombine.high %v3730_v2, %v3734_v13  ;;  %v3003_v44 = vld [vmem:[#allocation13 + $0xd0] sm:$0xff] }
 0x3c2   :  { %8136 = vmatprep.subr.bf16.mxu1 %v9790_v17  ;;  %v9836_v17 = vcombine.high %v3729_v1, %v3733_v50  ;;  %v9104_v40 = vcombine.high %v2995_v34, %v2999_v31  ;;  %v3007_v51 = vld [vmem:[#allocation13 + $0xf0] sm:$0xff] }
 0x3c4   :  { %7891 = vmatpush1.bf16.msra.mxu0 %v9787_v27  ;;  %v3742_v27 = vld [vmem:[#allocation13 + $0x17e8] sm:$0xff] }
 0x3c5   :  { %8137 = vmatpush1.bf16.msra.mxu1 %v9789_v8  ;;  %7892 = vmatprep.subr.bf16.mxu0 %v9796_v7  ;;  %v9835_v8 = vcombine.low %v3729_v1, %v3733_v50  ;;  %v9837_v7 = vcombine.low %v3730_v2, %v3734_v13  ;;  %v9846_v11 = vcombine.high %v3738_v20, %v3742_v27  ;;  %v3011_v2 = vld [vmem:[#allocation13 + $0x110] sm:$0xff] }
 0x3c6   :  { %8138 = vmatprep.subr.bf16.mxu1 %v9798_v9  ;;  %v9844_v9 = vcombine.high %v3737_v25, %v3741_v21  ;;  %v9112_v1 = vcombine.high %v3003_v44, %v3007_v51  ;;  %v3015_v13 = vld [vmem:[#allocation13 + $0x130] sm:$0xff] }
 0x3c8   :  { %7893 = vmatpush1.bf16.msra.mxu0 %v9795_v49  ;;  %v2980_v49 = vld [vmem:[#allocation13 + $0x18] sm:$0xff] }
 0x3c9   :  { %8139 = vmatpush1.bf16.msra.mxu1 %v9797_v29  ;;  %7894 = vmatprep.subr.bf16.mxu0 %v9804_v16  ;;  %v2984_v29 = vld [vmem:[#allocation13 + $0x38] sm:$0xff]  ;;  %v9843_v16 = vcombine.low %v3737_v25, %v3741_v21  ;;  %v3019_v21 = vld [vmem:[#allocation13 + $0x150] sm:$0xff] }
 0x3ca   :  { %8140 = vmatprep.subr.bf16.mxu1 %v9806_v18  ;;  %v9845_v18 = vcombine.low %v3738_v20, %v3742_v27  ;;  %v9090_v22 = vcombine.high %v2980_v49, %v2984_v29  ;;  %v9089_v32 = vcombine.low %v2980_v49, %v2984_v29  ;;  %v3023_v20 = vld [vmem:[#allocation13 + $0x170] sm:$0xff]  ;;  %v3020_v27 = vld [vmem:[#allocation13 + $0x158] sm:$0xff] }
 0x3cb   :  { %v9128_v41 = vcombine.high %v3019_v21, %v3023_v20  ;;  %v3028_v49 = vld [vmem:[#allocation13 + $0x198] sm:$0xff] }
 0x3cc   :  { %7895 = vmatpush1.bf16.msra.mxu0 %v9803_v3  ;;  %v9087_v3 = vcombine.low %v2979_v47, %v2983_v14  ;;  %v3027_v47 = vld [vmem:[#allocation13 + $0x190] sm:$0xff]  ;;  %v3032_v29 = vld [vmem:[#allocation13 + $0x1b8] sm:$0xff] }
 0x3cd   :  { %8141 = vmatpush1.bf16.msra.mxu1 %v9805_v48  ;;  %7896 = vmatprep.subr.bf16.mxu0 %v9812_v26  ;;  %v2988_v48 = vld [vmem:[#allocation13 + $0x58] sm:$0xff]  ;;  %v3031_v14 = vld [vmem:[#allocation13 + $0x1b0] sm:$0xff] }
 0x3ce   :  { %8142 = vmatprep.subr.bf16.mxu1 %v9814_v28  ;;  %v2992_v26 = vld [vmem:[#allocation13 + $0x78] sm:$0xff]  ;;  %v11303_v28 = vpack.c.bf16 %v2951_v23, %v2951_v23  ;;  %v9138_v23 = vcombine.high %v3028_v49, %v3032_v29 }
 0x3cf   :  { %v9098_v61 = vcombine.high %v2988_v48, %v2992_v26 }
 0x3d0   :  { %7897 = vmatpush1.bf16.msra.mxu0 %v9811_v37  ;;  %v2996_v37 = vld [vmem:[#allocation13 + $0x98] sm:$0xff] }
 0x3d1   :  { %8143 = vmatpush1.bf16.msra.mxu1 %v9813_v38  ;;  %7898 = vmatprep.subr.bf16.mxu0 %v9820_v57  ;;  %v3000_v38 = vld [vmem:[#allocation13 + $0xb8] sm:$0xff]  ;;  %v9095_v57 = vcombine.low %v2987_v6, %v2991_v46  ;;  %v3039_v6 = vld [vmem:[#allocation13 + $0x1f0] sm:$0xff] }
 0x3d2   :  { %8144 = vmatprep.subr.bf16.mxu1 %v9822_v39  ;;  %v9097_v39 = vcombine.low %v2988_v48, %v2992_v26  ;;  %v9106_v43 = vcombine.high %v2996_v37, %v3000_v38  ;;  %v3036_v46 = vld [vmem:[#allocation13 + $0x1d8] sm:$0xff]  ;;  %v9135_v48 = vcombine.low %v3027_v47, %v3031_v14  ;;  %v9137_v26 = vcombine.low %v3028_v49, %v3032_v29 }
 0x3d3   :  { %v3080_v49 = vld [vmem:[#allocation13 + $0x338] sm:$0xff] }
 0x3d4   :  { %7899 = vmatpush1.bf16.msra.mxu0 %v9819_v52  ;;  %v3004_v52 = vld [vmem:[#allocation13 + $0xd8] sm:$0xff] }
 0x3d5   :  { %8145 = vmatpush1.bf16.msra.mxu1 %v9821_v54  ;;  %7900 = vmatprep.subr.bf16.mxu0 %v9828_v56  ;;  %v3008_v54 = vld [vmem:[#allocation13 + $0xf8] sm:$0xff]  ;;  %v9103_v56 = vcombine.low %v2995_v34, %v2999_v31  ;;  %v3043_v34 = vld [vmem:[#allocation13 + $0x210] sm:$0xff] }
 0x3d6   :  { %8146 = vmatprep.subr.bf16.mxu1 %v9830_v63  ;;  %v9105_v63 = vcombine.low %v2996_v37, %v3000_v38  ;;  %v9114_v50 = vcombine.high %v3004_v52, %v3008_v54  ;;  %v3047_v31 = vld [vmem:[#allocation13 + $0x230] sm:$0xff]  ;;  %v3048_v37 = vld [vmem:[#allocation13 + $0x238] sm:$0xff] }
 0x3d8   :  { %7901 = vmatpush1.bf16.msra.mxu0 %v9827_v42  ;;  %v3012_v42 = vld [vmem:[#allocation13 + $0x118] sm:$0xff] }
 0x3d9   :  { %8147 = vmatpush1.bf16.msra.mxu1 %v9829_v10  ;;  %7902 = vmatprep.subr.bf16.mxu0 %v9836_v17  ;;  %v3016_v10 = vld [vmem:[#allocation13 + $0x138] sm:$0xff]  ;;  %v9113_v17 = vcombine.low %v3004_v52, %v3008_v54  ;;  %v9151_v54 = vcombine.low %v3043_v34, %v3047_v31 }
 0x3da   :  { %8148 = vmatprep.subr.bf16.mxu1 %v9838_v24  ;;  %v9120_v24 = vcombine.high %v3011_v2, %v3015_v13  ;;  %v9122_v25 = vcombine.high %v3012_v42, %v3016_v10  ;;  %v3056_v52 = vld [vmem:[#allocation13 + $0x278] sm:$0xff] }
 0x3dc   :  { %7903 = vmatpush1.bf16.msra.mxu0 %v9835_v8  ;;  %v3024_v8 = vld [vmem:[#allocation13 + $0x178] sm:$0xff] }
 0x3dd   :  { %8149 = vmatpush1.bf16.msra.mxu1 %v9837_v7  ;;  %7904 = vmatprep.subr.bf16.mxu0 %v9844_v9  ;;  %v9119_v7 = vcombine.low %v3011_v2, %v3015_v13  ;;  %v9121_v9 = vcombine.low %v3012_v42, %v3016_v10  ;;  %v3063_v2 = vld [vmem:[#allocation13 + $0x2b0] sm:$0xff]  ;;  %v3060_v13 = vld [vmem:[#allocation13 + $0x298] sm:$0xff] }
 0x3de   :  { %8150 = vmatprep.subr.bf16.mxu1 %v9846_v11  ;;  %v9130_v11 = vcombine.high %v3020_v27, %v3024_v8  ;;  %v3064_v42 = vld [vmem:[#allocation13 + $0x2b8] sm:$0xff] }
 0x3e0   :  { %7905 = vmatpush1.bf16.msra.mxu0 %v9843_v16  ;;  %v9127_v16 = vcombine.low %v3019_v21, %v3023_v20  ;;  %v3071_v21 = vld [vmem:[#allocation13 + $0x2f0] sm:$0xff]  ;;  %v3068_v20 = vld [vmem:[#allocation13 + $0x2d8] sm:$0xff] }
 0x3e1   :  { %8151 = vmatpush1.bf16.msra.mxu1 %v9845_v18  ;;  %8161 = vmatprep.subr.bf16.mxu0 %v9088_v4  ;;  %v9129_v18 = vcombine.low %v3020_v27, %v3024_v8  ;;  %v9136_v4 = vcombine.high %v3027_v47, %v3031_v14  ;;  %v3072_v27 = vld [vmem:[#allocation13 + $0x2f8] sm:$0xff]  ;;  %v3079_v47 = vld [vmem:[#allocation13 + $0x330] sm:$0xff] }
 0x3e2   :  { %8407 = vmatprep.subr.bf16.mxu1 %v9090_v22  ;;  %v3035_v22 = vld [vmem:[#allocation13 + $0x1d0] sm:$0xff]  ;;  %v3076_v14 = vld [vmem:[#allocation13 + $0x318] sm:$0xff] }
 0x3e3   :  { %7907 = vmatmul.mubr.bf16.vlgmr.msra.gmra.mrb[16].mxu0 %v11303_v28  ;;  %v9143_v38 = vcombine.low %v3035_v22, %v3039_v6 }
 0x3e4   :  { %8153 = vmatmul.mubr.bf16.vlgmr.msra.gmra.mrb[16].mxu1 %v11303_v28  ;;  %8162 = vmatpush1.bf16.msra.mxu0 %v9087_v3  ;;  %v3040_v3 = vld [vmem:[#allocation13 + $0x1f8] sm:$0xff] }
 0x3e5   :  { %8193 = vmatprep.mubr.bf16.mxu0 %v11190_v12  ;;  %8408 = vmatpush1.bf16.msra.mxu1 %v9089_v32  ;;  %v9144_v32 = vcombine.high %v3035_v22, %v3039_v6  ;;  %v3087_v22 = vld [vmem:[#allocation13 + $0x370] sm:$0xff]  ;;  %v3084_v6 = vld [vmem:[#allocation13 + $0x358] sm:$0xff] }
 0x3e6   :  { %8439 = vmatprep.mubr.bf16.mxu1 %v11190_v12  ;;  %8163 = vmatprep.subr.bf16.mxu0 %v9096_v53  ;;  %v9111_v12 = vcombine.low %v3003_v44, %v3007_v51  ;;  %v9146_v53 = vcombine.high %v3036_v46, %v3040_v3  ;;  %v3055_v44 = vld [vmem:[#allocation13 + $0x270] sm:$0xff]  ;;  %v3052_v51 = vld [vmem:[#allocation13 + $0x258] sm:$0xff] }
 0x3e7   :  { %8409 = vmatprep.subr.bf16.mxu1 %v9098_v61  ;;  %v3044_v61 = vld [vmem:[#allocation13 + $0x218] sm:$0xff] }
 0x3e8   :  { %8164 = vmatpush1.bf16.msra.mxu0 %v9095_v57  ;;  %v9145_v57 = vcombine.low %v3036_v46, %v3040_v3  ;;  %v3088_v46 = vld [vmem:[#allocation13 + $0x378] sm:$0xff] }
 0x3e9   :  { %8410 = vmatpush1.bf16.msra.mxu1 %v9097_v39  ;;  %8165 = vmatprep.subr.bf16.mxu0 %v9104_v40  ;;  %v9152_v39 = vcombine.high %v3043_v34, %v3047_v31  ;;  %v9154_v40 = vcombine.high %v3044_v61, %v3048_v37  ;;  %v3095_v34 = vld [vmem:[#allocation13 + $0x3b0] sm:$0xff]  ;;  %v3092_v31 = vld [vmem:[#allocation13 + $0x398] sm:$0xff] }
 0x3ea   :  { %8411 = vmatprep.subr.bf16.mxu1 %v9106_v43  ;;  %v3051_v43 = vld [vmem:[#allocation13 + $0x250] sm:$0xff] }
 0x3eb   :  { %v9159_v10 = vcombine.low %v3051_v43, %v3055_v44 }
 0x3ec   :  { %8166 = vmatpush1.bf16.msra.mxu0 %v9103_v56  ;;  %v9153_v56 = vcombine.low %v3044_v61, %v3048_v37  ;;  %v3096_v61 = vld [vmem:[#allocation13 + $0x3b8] sm:$0xff] }
 0x3ed   :  { %8412 = vmatpush1.bf16.msra.mxu1 %v9105_v63  ;;  %8167 = vmatprep.subr.bf16.mxu0 %v9112_v1  ;;  %v9160_v63 = vcombine.high %v3051_v43, %v3055_v44  ;;  %v9162_v1 = vcombine.high %v3052_v51, %v3056_v52  ;;  %v3103_v43 = vld [vmem:[#allocation13 + $0x3f0] sm:$0xff]  ;;  %v3100_v44 = vld [vmem:[#allocation13 + $0x3d8] sm:$0xff] }
 0x3ee   :  { %8413 = vmatprep.subr.bf16.mxu1 %v9114_v50  ;;  %v3059_v50 = vld [vmem:[#allocation13 + $0x290] sm:$0xff] }
 0x3ef   :  { %v9167_v8 = vcombine.low %v3059_v50, %v3063_v2 }
 0x3f0   :  { %8168 = vmatpush1.bf16.msra.mxu0 %v9111_v12  ;;  %v9161_v12 = vcombine.low %v3052_v51, %v3056_v52  ;;  %v3104_v51 = vld [vmem:[#allocation13 + $0x3f8] sm:$0xff] }
 0x3f1   :  { %8414 = vmatpush1.bf16.msra.mxu1 %v9113_v17  ;;  %8169 = vmatprep.subr.bf16.mxu0 %v9120_v24  ;;  %v9168_v17 = vcombine.high %v3059_v50, %v3063_v2  ;;  %v9170_v24 = vcombine.high %v3060_v13, %v3064_v42  ;;  %v3111_v50 = vld [vmem:[#allocation13 + $0x430] sm:$0xff]  ;;  %v3108_v2 = vld [vmem:[#allocation13 + $0x418] sm:$0xff] }
 0x3f2   :  { %8415 = vmatprep.subr.bf16.mxu1 %v9122_v25  ;;  %v3067_v25 = vld [vmem:[#allocation13 + $0x2d0] sm:$0xff] }
 0x3f3   :  { %v9175_v29 = vcombine.low %v3067_v25, %v3071_v21 }
 0x3f4   :  { %8170 = vmatpush1.bf16.msra.mxu0 %v9119_v7  ;;  %v9169_v7 = vcombine.low %v3060_v13, %v3064_v42  ;;  %v3112_v13 = vld [vmem:[#allocation13 + $0x438] sm:$0xff] }
 0x3f5   :  { %8416 = vmatpush1.bf16.msra.mxu1 %v9121_v9  ;;  %8171 = vmatprep.subr.bf16.mxu0 %v9128_v41  ;;  %v9176_v9 = vcombine.high %v3067_v25, %v3071_v21  ;;  %v9178_v41 = vcombine.high %v3068_v20, %v3072_v27  ;;  %v3119_v25 = vld [vmem:[#allocation13 + $0x470] sm:$0xff] }
 0x3f6   :  { %8417 = vmatprep.subr.bf16.mxu1 %v9130_v11  ;;  %v3075_v11 = vld [vmem:[#allocation13 + $0x310] sm:$0xff] }
 0x3f7   :  { %v9183_v3 = vcombine.low %v3075_v11, %v3079_v47 }
 0x3f8   :  { %8172 = vmatpush1.bf16.msra.mxu0 %v9127_v16  ;;  %v9177_v16 = vcombine.low %v3068_v20, %v3072_v27  ;;  %v3116_v20 = vld [vmem:[#allocation13 + $0x458] sm:$0xff] }
 0x3f9   :  { %8418 = vmatpush1.bf16.msra.mxu1 %v9129_v18  ;;  %8173 = vmatprep.subr.bf16.mxu0 %v9136_v4  ;;  %v9184_v18 = vcombine.high %v3075_v11, %v3079_v47  ;;  %v9186_v4 = vcombine.high %v3076_v14, %v3080_v49  ;;  %v3120_v27 = vld [vmem:[#allocation13 + $0x478] sm:$0xff] }
 0x3fa   :  { %8419 = vmatprep.subr.bf16.mxu1 %v9138_v23  ;;  %v3083_v23 = vld [vmem:[#allocation13 + $0x350] sm:$0xff]  ;;  %v9226_v11 = vcombine.high %v3116_v20, %v3120_v27  ;;  %v3124_v47 = vld [vmem:[#allocation13 + $0x498] sm:$0xff] }
 0x3fb   :  { %v9191_v37 = vcombine.low %v3083_v23, %v3087_v22 }
 0x3fc   :  { %8174 = vmatpush1.bf16.msra.mxu0 %v9135_v48  ;;  %v9185_v48 = vcombine.low %v3076_v14, %v3080_v49  ;;  %v3128_v14 = vld [vmem:[#allocation13 + $0x4b8] sm:$0xff] }
 0x3fd   :  { %8420 = vmatpush1.bf16.msra.mxu1 %v9137_v26  ;;  %8175 = vmatprep.subr.bf16.mxu0 %v9144_v32  ;;  %v9192_v26 = vcombine.high %v3083_v23, %v3087_v22  ;;  %v9194_v32 = vcombine.high %v3084_v6, %v3088_v46  ;;  %v3135_v23 = vld [vmem:[#allocation13 + $0x4f0] sm:$0xff]  ;;  %v3132_v22 = vld [vmem:[#allocation13 + $0x4d8] sm:$0xff] }
 0x3fe   :  { %8421 = vmatprep.subr.bf16.mxu1 %v9146_v53  ;;  %v3091_v53 = vld [vmem:[#allocation13 + $0x390] sm:$0xff] }
 0x3ff   :  { %v9199_v52 = vcombine.low %v3091_v53, %v3095_v34 }
 0x400   :  { %8176 = vmatpush1.bf16.msra.mxu0 %v9143_v38  ;;  %v9193_v38 = vcombine.low %v3084_v6, %v3088_v46  ;;  %v3136_v6 = vld [vmem:[#allocation13 + $0x4f8] sm:$0xff] }
 0x401   :  { %8422 = vmatpush1.bf16.msra.mxu1 %v9145_v57  ;;  %8177 = vmatprep.subr.bf16.mxu0 %v9152_v39  ;;  %v9200_v57 = vcombine.high %v3091_v53, %v3095_v34  ;;  %v9202_v39 = vcombine.high %v3092_v31, %v3096_v61  ;;  %v3140_v53 = vld [vmem:[#allocation13 + $0x518] sm:$0xff] }
 0x402   :  { %8423 = vmatprep.subr.bf16.mxu1 %v9154_v40  ;;  %v3099_v40 = vld [vmem:[#allocation13 + $0x3d0] sm:$0xff]  ;;  %v3144_v34 = vld [vmem:[#allocation13 + $0x538] sm:$0xff] }
 0x403   :  { %v9207_v42 = vcombine.low %v3099_v40, %v3103_v43 }
 0x404   :  { %8178 = vmatpush1.bf16.msra.mxu0 %v9151_v54  ;;  %v9201_v54 = vcombine.low %v3092_v31, %v3096_v61  ;;  %v9241_v31 = vcombine.low %v3132_v22, %v3136_v6 }
 0x405   :  { %8424 = vmatpush1.bf16.msra.mxu1 %v9153_v56  ;;  %8179 = vmatprep.subr.bf16.mxu0 %v9160_v63  ;;  %v9208_v56 = vcombine.high %v3099_v40, %v3103_v43  ;;  %v9210_v63 = vcombine.high %v3100_v44, %v3104_v51  ;;  %v3152_v40 = vld [vmem:[#allocation13 + $0x578] sm:$0xff] }
 0x406   :  { %8425 = vmatprep.subr.bf16.mxu1 %v9162_v1  ;;  %v3107_v1 = vld [vmem:[#allocation13 + $0x410] sm:$0xff] }
 0x407   :  { %v9215_v21 = vcombine.low %v3107_v1, %v3111_v50 }
 0x408   :  { %8180 = vmatpush1.bf16.msra.mxu0 %v9159_v10  ;;  %v9209_v10 = vcombine.low %v3100_v44, %v3104_v51  ;;  %v9249_v44 = vcombine.low %v3140_v53, %v3144_v34 }
 0x409   :  { %8426 = vmatpush1.bf16.msra.mxu1 %v9161_v12  ;;  %8181 = vmatprep.subr.bf16.mxu0 %v9168_v17  ;;  %v9216_v12 = vcombine.high %v3107_v1, %v3111_v50  ;;  %v9218_v17 = vcombine.high %v3108_v2, %v3112_v13  ;;  %v3160_v1 = vld [vmem:[#allocation13 + $0x5b8] sm:$0xff] }
 0x40a   :  { %8427 = vmatprep.subr.bf16.mxu1 %v9170_v24  ;;  %v3115_v24 = vld [vmem:[#allocation13 + $0x450] sm:$0xff] }
 0x40b   :  { %v9223_v49 = vcombine.low %v3115_v24, %v3119_v25 }
 0x40c   :  { %8182 = vmatpush1.bf16.msra.mxu0 %v9167_v8  ;;  %v9217_v8 = vcombine.low %v3108_v2, %v3112_v13 }
 0x40d   :  { %8428 = vmatpush1.bf16.msra.mxu1 %v9169_v7  ;;  %8183 = vmatprep.subr.bf16.mxu0 %v9176_v9  ;;  %v9224_v7 = vcombine.high %v3115_v24, %v3119_v25  ;;  %v3123_v9 = vld [vmem:[#allocation13 + $0x490] sm:$0xff]  ;;  %v3168_v24 = vld [vmem:[#allocation13 + $0x5f8] sm:$0xff] }
 0x40e   :  { %8429 = vmatprep.subr.bf16.mxu1 %v9178_v41  ;;  %v3127_v41 = vld [vmem:[#allocation13 + $0x4b0] sm:$0xff] }
 0x40f   :  { %v9231_v46 = vcombine.low %v3123_v9, %v3127_v41 }
 0x410   :  { %8184 = vmatpush1.bf16.msra.mxu0 %v9175_v29  ;;  %v9225_v29 = vcombine.low %v3116_v20, %v3120_v27 }
 0x411   :  { %8430 = vmatpush1.bf16.msra.mxu1 %v9177_v16  ;;  %8185 = vmatprep.subr.bf16.mxu0 %v9184_v18  ;;  %v9232_v16 = vcombine.high %v3123_v9, %v3127_v41  ;;  %v9234_v18 = vcombine.high %v3124_v47, %v3128_v14  ;;  %v3172_v9 = vld [vmem:[#allocation13 + $0x618] sm:$0xff] }
 0x412   :  { %8431 = vmatprep.subr.bf16.mxu1 %v9186_v4  ;;  %v3131_v4 = vld [vmem:[#allocation13 + $0x4d0] sm:$0xff]  ;;  %v3176_v41 = vld [vmem:[#allocation13 + $0x638] sm:$0xff] }
 0x414   :  { %8186 = vmatpush1.bf16.msra.mxu0 %v9183_v3  ;;  %v9240_v3 = vcombine.high %v3131_v4, %v3135_v23 }
 0x415   :  { %8432 = vmatpush1.bf16.msra.mxu1 %v9185_v48  ;;  %8187 = vmatprep.subr.bf16.mxu0 %v9192_v26  ;;  %v9242_v48 = vcombine.high %v3132_v22, %v3136_v6  ;;  %v3139_v26 = vld [vmem:[#allocation13 + $0x510] sm:$0xff]  ;;  %v9281_v22 = vcombine.low %v3172_v9, %v3176_v41 }
 0x416   :  { %8433 = vmatprep.subr.bf16.mxu1 %v9194_v32  ;;  %v3143_v32 = vld [vmem:[#allocation13 + $0x530] sm:$0xff] }
 0x417   :  { %v9248_v61 = vcombine.high %v3139_v26, %v3143_v32  ;;  %v9247_v43 = vcombine.low %v3139_v26, %v3143_v32  ;;  %v3192_v26 = vld [vmem:[#allocation13 + $0x6b8] sm:$0xff] }
 0x418   :  { %8188 = vmatpush1.bf16.msra.mxu0 %v9191_v37  ;;  %v9250_v37 = vcombine.high %v3140_v53, %v3144_v34 }
 0x419   :  { %8434 = vmatpush1.bf16.msra.mxu1 %v9193_v38  ;;  %8189 = vmatprep.subr.bf16.mxu0 %v9200_v57  ;;  %v3147_v38 = vld [vmem:[#allocation13 + $0x550] sm:$0xff] }
 0x41a   :  { %8435 = vmatprep.subr.bf16.mxu1 %v9202_v39  ;;  %v3151_v57 = vld [vmem:[#allocation13 + $0x570] sm:$0xff]  ;;  %v3148_v39 = vld [vmem:[#allocation13 + $0x558] sm:$0xff] }
 0x41b   :  { %v9256_v51 = vcombine.high %v3147_v38, %v3151_v57  ;;  %v9255_v50 = vcombine.low %v3147_v38, %v3151_v57  ;;  %v9257_v2 = vcombine.low %v3148_v39, %v3152_v40  ;;  %v3200_v38 = vld [vmem:[#allocation13 + $0x6f8] sm:$0xff] }
 0x41c   :  { %8190 = vmatpush1.bf16.msra.mxu0 %v9199_v52  ;;  %v9258_v52 = vcombine.high %v3148_v39, %v3152_v40 }
 0x41d   :  { %8436 = vmatpush1.bf16.msra.mxu1 %v9201_v54  ;;  %8191 = vmatprep.subr.bf16.mxu0 %v9208_v56  ;;  %v3155_v54 = vld [vmem:[#allocation13 + $0x590] sm:$0xff] }
 0x41e   :  { %8437 = vmatprep.subr.bf16.mxu1 %v9210_v63  ;;  %v3159_v56 = vld [vmem:[#allocation13 + $0x5b0] sm:$0xff]  ;;  %v3156_v63 = vld [vmem:[#allocation13 + $0x598] sm:$0xff] }
 0x41f   :  { %v9264_v13 = vcombine.high %v3155_v54, %v3159_v56  ;;  %v9263_v25 = vcombine.low %v3155_v54, %v3159_v56  ;;  %v3208_v54 = vld [vmem:[#allocation13 + $0x738] sm:$0xff] }
 0x420   :  { %8192 = vmatpush1.bf16.msra.mxu0 %v9207_v42  ;;  %v9266_v42 = vcombine.high %v3156_v63, %v3160_v1 }
 0x421   :  { %8438 = vmatpush1.bf16.msra.mxu1 %v9209_v10  ;;  %8202 = vmatprep.subr.bf16.mxu0 %v9216_v12  ;;  %v3163_v10 = vld [vmem:[#allocation13 + $0x5d0] sm:$0xff] }
 0x422   :  { %8448 = vmatprep.subr.bf16.mxu1 %v9218_v17  ;;  %v3167_v12 = vld [vmem:[#allocation13 + $0x5f0] sm:$0xff]  ;;  %v3164_v17 = vld [vmem:[#allocation13 + $0x5d8] sm:$0xff] }
 0x423   :  { %8194 = vmatmul.mubr.bf16.vlgmr.msra.gmra.mrb[20].mxu0 %v11202_v30  ;;  %v9272_v20 = vcombine.high %v3163_v10, %v3167_v12  ;;  %v9274_v27 = vcombine.high %v3164_v17, %v3168_v24 }
 0x424   :  { %8440 = vmatmul.mubr.bf16.vlgmr.msra.gmra.mrb[20].mxu1 %v11202_v30  ;;  %8203 = vmatpush1.bf16.msra.mxu0 %v9215_v21  ;;  %v9233_v30 = vcombine.low %v3124_v47, %v3128_v14  ;;  %v9265_v21 = vcombine.low %v3156_v63, %v3160_v1  ;;  %v9273_v47 = vcombine.low %v3164_v17, %v3168_v24 }
 0x425   :  { %8234 = vmatprep.mubr.bf16.mxu0 %v11204_v35  ;;  %8449 = vmatpush1.bf16.msra.mxu1 %v9217_v8  ;;  %v3171_v8 = vld [vmem:[#allocation13 + $0x610] sm:$0xff] }
 0x426   :  { %8480 = vmatprep.mubr.bf16.mxu1 %v11204_v35  ;;  %8204 = vmatprep.subr.bf16.mxu0 %v9224_v7  ;;  %v9239_v35 = vcombine.low %v3131_v4, %v3135_v23  ;;  %v3175_v7 = vld [vmem:[#allocation13 + $0x630] sm:$0xff]  ;;  %v3184_v4 = vld [vmem:[#allocation13 + $0x678] sm:$0xff] }
 0x427   :  { %8450 = vmatprep.subr.bf16.mxu1 %v9226_v11  ;;  %v9271_v11 = vcombine.low %v3163_v10, %v3167_v12  ;;  %v9280_v14 = vcombine.high %v3171_v8, %v3175_v7  ;;  %v9279_v23 = vcombine.low %v3171_v8, %v3175_v7  ;;  %v3216_v10 = vld [vmem:[#allocation13 + $0x778] sm:$0xff] }
 0x428   :  { %8205 = vmatpush1.bf16.msra.mxu0 %v9223_v49  ;;  %v9282_v49 = vcombine.high %v3172_v9, %v3176_v41  ;;  %v3224_v8 = vld [vmem:[#allocation13 + $0x7b8] sm:$0xff] }
 0x429   :  { %8451 = vmatpush1.bf16.msra.mxu1 %v9225_v29  ;;  %8206 = vmatprep.subr.bf16.mxu0 %v9232_v16  ;;  %v3179_v29 = vld [vmem:[#allocation13 + $0x650] sm:$0xff] }
 0x42a   :  { %8452 = vmatprep.subr.bf16.mxu1 %v9234_v18  ;;  %v3183_v16 = vld [vmem:[#allocation13 + $0x670] sm:$0xff]  ;;  %v3180_v18 = vld [vmem:[#allocation13 + $0x658] sm:$0xff] }
 0x42b   :  { %v9288_v6 = vcombine.high %v3179_v29, %v3183_v16  ;;  %v9287_v32 = vcombine.low %v3179_v29, %v3183_v16  ;;  %v9289_v53 = vcombine.low %v3180_v18, %v3184_v4  ;;  %v3232_v29 = vld [vmem:[#allocation13 + $0x7f8] sm:$0xff] }
 0x42c   :  { %8207 = vmatpush1.bf16.msra.mxu0 %v9231_v46  ;;  %v9290_v46 = vcombine.high %v3180_v18, %v3184_v4 }
 0x42d   :  { %8453 = vmatpush1.bf16.msra.mxu1 %v9233_v30  ;;  %8208 = vmatprep.subr.bf16.mxu0 %v9240_v3  ;;  %v3187_v30 = vld [vmem:[#allocation13 + $0x690] sm:$0xff] }
 0x42e   :  { %8454 = vmatprep.subr.bf16.mxu1 %v9242_v48  ;;  %v3191_v3 = vld [vmem:[#allocation13 + $0x6b0] sm:$0xff]  ;;  %v3188_v48 = vld [vmem:[#allocation13 + $0x698] sm:$0xff] }
 0x42f   :  { %v9296_v34 = vcombine.high %v3187_v30, %v3191_v3  ;;  %v9295_v57 = vcombine.low %v3187_v30, %v3191_v3  ;;  %v9297_v39 = vcombine.low %v3188_v48, %v3192_v26  ;;  %v3240_v30 = vld [vmem:[#allocation13 + $0x838] sm:$0xff] }
 0x430   :  { %8209 = vmatpush1.bf16.msra.mxu0 %v9239_v35  ;;  %v9298_v35 = vcombine.high %v3188_v48, %v3192_v26 }
 0x431   :  { %8455 = vmatpush1.bf16.msra.mxu1 %v9241_v31  ;;  %8210 = vmatprep.subr.bf16.mxu0 %v9248_v61  ;;  %v3195_v31 = vld [vmem:[#allocation13 + $0x6d0] sm:$0xff] }
 0x432   :  { %8456 = vmatprep.subr.bf16.mxu1 %v9250_v37  ;;  %v3199_v61 = vld [vmem:[#allocation13 + $0x6f0] sm:$0xff]  ;;  %v3196_v37 = vld [vmem:[#allocation13 + $0x6d8] sm:$0xff] }
 0x433   :  { %v9304_v40 = vcombine.high %v3195_v31, %v3199_v61  ;;  %v9303_v56 = vcombine.low %v3195_v31, %v3199_v61  ;;  %v9305_v63 = vcombine.low %v3196_v37, %v3200_v38  ;;  %v3244_v31 = vld [vmem:[#allocation13 + $0x858] sm:$0xff] }
 0x434   :  { %8211 = vmatpush1.bf16.msra.mxu0 %v9247_v43  ;;  %v9306_v43 = vcombine.high %v3196_v37, %v3200_v38  ;;  %v3248_v61 = vld [vmem:[#allocation13 + $0x878] sm:$0xff] }
 0x435   :  { %8457 = vmatpush1.bf16.msra.mxu1 %v9249_v44  ;;  %8212 = vmatprep.subr.bf16.mxu0 %v9256_v51  ;;  %v3203_v44 = vld [vmem:[#allocation13 + $0x710] sm:$0xff] }
 0x436   :  { %8458 = vmatprep.subr.bf16.mxu1 %v9258_v52  ;;  %v3207_v51 = vld [vmem:[#allocation13 + $0x730] sm:$0xff]  ;;  %v3204_v52 = vld [vmem:[#allocation13 + $0x718] sm:$0xff] }
 0x437   :  { %v9312_v1 = vcombine.high %v3203_v44, %v3207_v51  ;;  %v9311_v12 = vcombine.low %v3203_v44, %v3207_v51  ;;  %v9313_v17 = vcombine.low %v3204_v52, %v3208_v54  ;;  %v3256_v44 = vld [vmem:[#allocation13 + $0x8b8] sm:$0xff] }
 0x438   :  { %8213 = vmatpush1.bf16.msra.mxu0 %v9255_v50  ;;  %v9314_v50 = vcombine.high %v3204_v52, %v3208_v54  ;;  %v9353_v52 = vcombine.low %v3244_v31, %v3248_v61 }
 0x439   :  { %8459 = vmatpush1.bf16.msra.mxu1 %v9257_v2  ;;  %8214 = vmatprep.subr.bf16.mxu0 %v9264_v13  ;;  %v3211_v2 = vld [vmem:[#allocation13 + $0x750] sm:$0xff] }
 0x43a   :  { %8460 = vmatprep.subr.bf16.mxu1 %v9266_v42  ;;  %v3215_v13 = vld [vmem:[#allocation13 + $0x770] sm:$0xff]  ;;  %v3212_v42 = vld [vmem:[#allocation13 + $0x758] sm:$0xff] }
 0x43b   :  { %v9320_v24 = vcombine.high %v3211_v2, %v3215_v13  ;;  %v9319_v7 = vcombine.low %v3211_v2, %v3215_v13  ;;  %v9321_v9 = vcombine.low %v3212_v42, %v3216_v10  ;;  %v3264_v2 = vld [vmem:[#allocation13 + $0x8f8] sm:$0xff] }
 0x43c   :  { %8215 = vmatpush1.bf16.msra.mxu0 %v9263_v25  ;;  %v9322_v25 = vcombine.high %v3212_v42, %v3216_v10 }
 0x43d   :  { %8461 = vmatpush1.bf16.msra.mxu1 %v9265_v21  ;;  %8216 = vmatprep.subr.bf16.mxu0 %v9272_v20  ;;  %v3219_v21 = vld [vmem:[#allocation13 + $0x790] sm:$0xff] }
 0x43e   :  { %8462 = vmatprep.subr.bf16.mxu1 %v9274_v27  ;;  %v3223_v20 = vld [vmem:[#allocation13 + $0x7b0] sm:$0xff]  ;;  %v3220_v27 = vld [vmem:[#allocation13 + $0x798] sm:$0xff] }
 0x43f   :  { %v9328_v41 = vcombine.high %v3219_v21, %v3223_v20  ;;  %v9327_v16 = vcombine.low %v3219_v21, %v3223_v20  ;;  %v9329_v18 = vcombine.low %v3220_v27, %v3224_v8 }
 0x440   :  { %8217 = vmatpush1.bf16.msra.mxu0 %v9271_v11  ;;  %v9330_v11 = vcombine.high %v3220_v27, %v3224_v8  ;;  %v3275_v8 = vld [vmem:[#allocation13 + $0x950] sm:$0xff] }
 0x441   :  { %8463 = vmatpush1.bf16.msra.mxu1 %v9273_v47  ;;  %8218 = vmatprep.subr.bf16.mxu0 %v9280_v14  ;;  %v3227_v47 = vld [vmem:[#allocation13 + $0x7d0] sm:$0xff] }
 0x442   :  { %8464 = vmatprep.subr.bf16.mxu1 %v9282_v49  ;;  %v3231_v14 = vld [vmem:[#allocation13 + $0x7f0] sm:$0xff]  ;;  %v3228_v49 = vld [vmem:[#allocation13 + $0x7d8] sm:$0xff] }
 0x443   :  { %v9336_v4 = vcombine.high %v3227_v47, %v3231_v14  ;;  %v9335_v3 = vcombine.low %v3227_v47, %v3231_v14  ;;  %v9337_v48 = vcombine.low %v3228_v49, %v3232_v29 }
 0x444   :  { %8219 = vmatpush1.bf16.msra.mxu0 %v9279_v23  ;;  %v9338_v23 = vcombine.high %v3228_v49, %v3232_v29  ;;  %v3283_v29 = vld [vmem:[#allocation13 + $0x990] sm:$0xff] }
 0x445   :  { %8465 = vmatpush1.bf16.msra.mxu1 %v9281_v22  ;;  %8220 = vmatprep.subr.bf16.mxu0 %v9288_v6  ;;  %v3235_v22 = vld [vmem:[#allocation13 + $0x810] sm:$0xff] }
 0x446   :  { %8466 = vmatprep.subr.bf16.mxu1 %v9290_v46  ;;  %v3239_v6 = vld [vmem:[#allocation13 + $0x830] sm:$0xff]  ;;  %v3236_v46 = vld [vmem:[#allocation13 + $0x818] sm:$0xff] }
 0x447   :  { %v9344_v26 = vcombine.high %v3235_v22, %v3239_v6  ;;  %v9345_v37 = vcombine.low %v3236_v46, %v3240_v30 }
 0x448   :  { %8221 = vmatpush1.bf16.msra.mxu0 %v9287_v32  ;;  %v9346_v32 = vcombine.high %v3236_v46, %v3240_v30  ;;  %v3291_v30 = vld [vmem:[#allocation13 + $0x9d0] sm:$0xff] }
 0x449   :  { %8467 = vmatpush1.bf16.msra.mxu1 %v9289_v53  ;;  %8222 = vmatprep.subr.bf16.mxu0 %v9296_v34  ;;  %v3243_v53 = vld [vmem:[#allocation13 + $0x850] sm:$0xff] }
 0x44a   :  { %8468 = vmatprep.subr.bf16.mxu1 %v9298_v35  ;;  %v3247_v34 = vld [vmem:[#allocation13 + $0x870] sm:$0xff]  ;;  %v9343_v35 = vcombine.low %v3235_v22, %v3239_v6 }
 0x44b   :  { %v9352_v38 = vcombine.high %v3243_v53, %v3247_v34  ;;  %v9351_v51 = vcombine.low %v3243_v53, %v3247_v34 }
 0x44c   :  { %8223 = vmatpush1.bf16.msra.mxu0 %v9295_v57  ;;  %v3251_v57 = vld [vmem:[#allocation13 + $0x890] sm:$0xff] }
 0x44d   :  { %8469 = vmatpush1.bf16.msra.mxu1 %v9297_v39  ;;  %8224 = vmatprep.subr.bf16.mxu0 %v9304_v40  ;;  %v3255_v39 = vld [vmem:[#allocation13 + $0x8b0] sm:$0xff]  ;;  %v9354_v40 = vcombine.high %v3244_v31, %v3248_v61 }
 0x44e   :  { %8470 = vmatprep.subr.bf16.mxu1 %v9306_v43  ;;  %v3252_v43 = vld [vmem:[#allocation13 + $0x898] sm:$0xff]  ;;  %v9360_v54 = vcombine.high %v3251_v57, %v3255_v39  ;;  %v9359_v13 = vcombine.low %v3251_v57, %v3255_v39  ;;  %v3299_v31 = vld [vmem:[#allocation13 + $0xa10] sm:$0xff] }
 0x44f   :  { %v3303_v61 = vld [vmem:[#allocation13 + $0xa30] sm:$0xff] }
 0x450   :  { %8225 = vmatpush1.bf16.msra.mxu0 %v9303_v56  ;;  %v9362_v56 = vcombine.high %v3252_v43, %v3256_v44 }
 0x451   :  { %8471 = vmatpush1.bf16.msra.mxu1 %v9305_v63  ;;  %8226 = vmatprep.subr.bf16.mxu0 %v9312_v1  ;;  %v3259_v63 = vld [vmem:[#allocation13 + $0x8d0] sm:$0xff] }
 0x452   :  { %8472 = vmatprep.subr.bf16.mxu1 %v9314_v50  ;;  %v3263_v1 = vld [vmem:[#allocation13 + $0x8f0] sm:$0xff]  ;;  %v3260_v50 = vld [vmem:[#allocation13 + $0x8d8] sm:$0xff] }
 0x453   :  { %v9368_v42 = vcombine.high %v3259_v63, %v3263_v1  ;;  %v9370_v10 = vcombine.high %v3260_v50, %v3264_v2  ;;  %v9369_v21 = vcombine.low %v3260_v50, %v3264_v2  ;;  %v3315_v2 = vld [vmem:[#allocation13 + $0xa90] sm:$0xff] }
 0x454   :  { %8227 = vmatpush1.bf16.msra.mxu0 %v9311_v12  ;;  %v3267_v12 = vld [vmem:[#allocation13 + $0x910] sm:$0xff] }
 0x455   :  { %8473 = vmatpush1.bf16.msra.mxu1 %v9313_v17  ;;  %8228 = vmatprep.subr.bf16.mxu0 %v9320_v24  ;;  %v3271_v17 = vld [vmem:[#allocation13 + $0x930] sm:$0xff]  ;;  %v3268_v24 = vld [vmem:[#allocation13 + $0x918] sm:$0xff] }
 0x456   :  { %8474 = vmatprep.subr.bf16.mxu1 %v9322_v25  ;;  %v3272_v25 = vld [vmem:[#allocation13 + $0x938] sm:$0xff]  ;;  %v9376_v20 = vcombine.high %v3267_v12, %v3271_v17 }
 0x457   :  { %v9378_v27 = vcombine.high %v3268_v24, %v3272_v25  ;;  %v9377_v47 = vcombine.low %v3268_v24, %v3272_v25  ;;  %v3323_v25 = vld [vmem:[#allocation13 + $0xad0] sm:$0xff] }
 0x458   :  { %8229 = vmatpush1.bf16.msra.mxu0 %v9319_v7  ;;  %v3279_v7 = vld [vmem:[#allocation13 + $0x970] sm:$0xff] }
 0x459   :  { %8475 = vmatpush1.bf16.msra.mxu1 %v9321_v9  ;;  %8230 = vmatprep.subr.bf16.mxu0 %v9328_v41  ;;  %v3276_v9 = vld [vmem:[#allocation13 + $0x958] sm:$0xff]  ;;  %v9384_v14 = vcombine.high %v3275_v8, %v3279_v7 }
 0x45a   :  { %8476 = vmatprep.subr.bf16.mxu1 %v9330_v11  ;;  %v3280_v41 = vld [vmem:[#allocation13 + $0x978] sm:$0xff]  ;;  %v9375_v11 = vcombine.low %v3267_v12, %v3271_v17 }
 0x45b   :  { %v9386_v49 = vcombine.high %v3276_v9, %v3280_v41  ;;  %v9385_v22 = vcombine.low %v3276_v9, %v3280_v41  ;;  %v3331_v41 = vld [vmem:[#allocation13 + $0xb10] sm:$0xff] }
 0x45c   :  { %8231 = vmatpush1.bf16.msra.mxu0 %v9327_v16  ;;  %v3287_v16 = vld [vmem:[#allocation13 + $0x9b0] sm:$0xff] }
 0x45d   :  { %8477 = vmatpush1.bf16.msra.mxu1 %v9329_v18  ;;  %8232 = vmatprep.subr.bf16.mxu0 %v9336_v4  ;;  %v3284_v18 = vld [vmem:[#allocation13 + $0x998] sm:$0xff]  ;;  %v9392_v6 = vcombine.high %v3283_v29, %v3287_v16 }
 0x45e   :  { %8478 = vmatprep.subr.bf16.mxu1 %v9338_v23  ;;  %v3288_v4 = vld [vmem:[#allocation13 + $0x9b8] sm:$0xff]  ;;  %v9383_v23 = vcombine.low %v3275_v8, %v3279_v7 }
 0x45f   :  { %v9394_v46 = vcombine.high %v3284_v18, %v3288_v4  ;;  %v9393_v53 = vcombine.low %v3284_v18, %v3288_v4  ;;  %v3339_v4 = vld [vmem:[#allocation13 + $0xb50] sm:$0xff] }
 0x460   :  { %8233 = vmatpush1.bf16.msra.mxu0 %v9335_v3  ;;  %v3295_v3 = vld [vmem:[#allocation13 + $0x9f0] sm:$0xff] }
 0x461   :  { %8479 = vmatpush1.bf16.msra.mxu1 %v9337_v48  ;;  %8243 = vmatprep.subr.bf16.mxu0 %v9344_v26  ;;  %v3292_v48 = vld [vmem:[#allocation13 + $0x9d8] sm:$0xff]  ;;  %v9400_v34 = vcombine.high %v3291_v30, %v3295_v3  ;;  %v9399_v57 = vcombine.low %v3291_v30, %v3295_v3 }
 0x462   :  { %8489 = vmatprep.subr.bf16.mxu1 %v9346_v32  ;;  %v3296_v26 = vld [vmem:[#allocation13 + $0x9f8] sm:$0xff]  ;;  %v9391_v32 = vcombine.low %v3283_v29, %v3287_v16 }
 0x463   :  { %8235 = vmatmul.mubr.bf16.vlgmr.msra.gmra.mrb[20].mxu0 %v11229_v5  ;;  %v9401_v39 = vcombine.low %v3292_v48, %v3296_v26 }
 0x464   :  { %8481 = vmatmul.mubr.bf16.vlgmr.msra.gmra.mrb[20].mxu1 %v11229_v5  ;;  %8244 = vmatpush1.bf16.msra.mxu0 %v9343_v35  ;;  %v9361_v5 = vcombine.low %v3252_v43, %v3256_v44  ;;  %v9402_v35 = vcombine.high %v3292_v48, %v3296_v26  ;;  %v3307_v44 = vld [vmem:[#allocation13 + $0xa50] sm:$0xff] }
 0x465   :  { %8275 = vmatprep.mubr.bf16.mxu0 %v11231_v19  ;;  %8490 = vmatpush1.bf16.msra.mxu1 %v9345_v37  ;;  %v3300_v37 = vld [vmem:[#allocation13 + $0xa18] sm:$0xff]  ;;  %v3347_v26 = vld [vmem:[#allocation13 + $0xb90] sm:$0xff] }
 0x466   :  { %8521 = vmatprep.mubr.bf16.mxu1 %v11231_v19  ;;  %8245 = vmatprep.subr.bf16.mxu0 %v9352_v38  ;;  %v9367_v19 = vcombine.low %v3259_v63, %v3263_v1  ;;  %v3304_v38 = vld [vmem:[#allocation13 + $0xa38] sm:$0xff] }
 0x467   :  { %8491 = vmatprep.subr.bf16.mxu1 %v9354_v40  ;;  %v9408_v40 = vcombine.high %v3299_v31, %v3303_v61  ;;  %v9410_v43 = vcombine.high %v3300_v37, %v3304_v38  ;;  %v9409_v63 = vcombine.low %v3300_v37, %v3304_v38  ;;  %v3355_v38 = vld [vmem:[#allocation13 + $0xbd0] sm:$0xff] }
 0x468   :  { %8246 = vmatpush1.bf16.msra.mxu0 %v9351_v51  ;;  %v3311_v51 = vld [vmem:[#allocation13 + $0xa70] sm:$0xff] }
 0x469   :  { %8492 = vmatpush1.bf16.msra.mxu1 %v9353_v52  ;;  %8247 = vmatprep.subr.bf16.mxu0 %v9360_v54  ;;  %v3308_v52 = vld [vmem:[#allocation13 + $0xa58] sm:$0xff]  ;;  %v9416_v1 = vcombine.high %v3307_v44, %v3311_v51 }
 0x46a   :  { %8493 = vmatprep.subr.bf16.mxu1 %v9362_v56  ;;  %v3312_v54 = vld [vmem:[#allocation13 + $0xa78] sm:$0xff]  ;;  %v9407_v56 = vcombine.low %v3299_v31, %v3303_v61 }
 0x46b   :  { %v9418_v50 = vcombine.high %v3308_v52, %v3312_v54  ;;  %v9417_v12 = vcombine.low %v3308_v52, %v3312_v54  ;;  %v3363_v54 = vld [vmem:[#allocation13 + $0xc10] sm:$0xff] }
 0x46c   :  { %8248 = vmatpush1.bf16.msra.mxu0 %v9359_v13  ;;  %v3319_v13 = vld [vmem:[#allocation13 + $0xab0] sm:$0xff] }
 0x46d   :  { %8494 = vmatpush1.bf16.msra.mxu1 %v9361_v5  ;;  %8249 = vmatprep.subr.bf16.mxu0 %v9368_v42  ;;  %v3316_v5 = vld [vmem:[#allocation13 + $0xa98] sm:$0xff]  ;;  %v9424_v17 = vcombine.high %v3315_v2, %v3319_v13 }
 0x46e   :  { %8495 = vmatprep.subr.bf16.mxu1 %v9370_v10  ;;  %v3320_v42 = vld [vmem:[#allocation13 + $0xab8] sm:$0xff]  ;;  %v9415_v10 = vcombine.low %v3307_v44, %v3311_v51 }
 0x46f   :  { %v9426_v24 = vcombine.high %v3316_v5, %v3320_v42  ;;  %v9425_v8 = vcombine.low %v3316_v5, %v3320_v42  ;;  %v3371_v42 = vld [vmem:[#allocation13 + $0xc50] sm:$0xff] }
 0x470   :  { %8250 = vmatpush1.bf16.msra.mxu0 %v9367_v19  ;;  %v3327_v19 = vld [vmem:[#allocation13 + $0xaf0] sm:$0xff] }
 0x471   :  { %8496 = vmatpush1.bf16.msra.mxu1 %v9369_v21  ;;  %8251 = vmatprep.subr.bf16.mxu0 %v9376_v20  ;;  %v3324_v21 = vld [vmem:[#allocation13 + $0xad8] sm:$0xff]  ;;  %v9432_v7 = vcombine.high %v3323_v25, %v3327_v19 }
 0x472   :  { %8497 = vmatprep.subr.bf16.mxu1 %v9378_v27  ;;  %v3328_v20 = vld [vmem:[#allocation13 + $0xaf8] sm:$0xff]  ;;  %v9423_v27 = vcombine.low %v3315_v2, %v3319_v13 }
 0x473   :  { %v9434_v9 = vcombine.high %v3324_v21, %v3328_v20  ;;  %v9433_v29 = vcombine.low %v3324_v21, %v3328_v20  ;;  %v3379_v21 = vld [vmem:[#allocation13 + $0xc90] sm:$0xff] }
 0x474   :  { %8252 = vmatpush1.bf16.msra.mxu0 %v9375_v11  ;;  %v3335_v11 = vld [vmem:[#allocation13 + $0xb30] sm:$0xff] }
 0x475   :  { %8498 = vmatpush1.bf16.msra.mxu1 %v9377_v47  ;;  %8253 = vmatprep.subr.bf16.mxu0 %v9384_v14  ;;  %v3332_v47 = vld [vmem:[#allocation13 + $0xb18] sm:$0xff]  ;;  %v9440_v16 = vcombine.high %v3331_v41, %v3335_v11  ;;  %v3383_v20 = vld [vmem:[#allocation13 + $0xcb0] sm:$0xff] }
 0x476   :  { %8499 = vmatprep.subr.bf16.mxu1 %v9386_v49  ;;  %v3336_v14 = vld [vmem:[#allocation13 + $0xb38] sm:$0xff]  ;;  %v9431_v49 = vcombine.low %v3323_v25, %v3327_v19 }
 0x477   :  { %v9442_v18 = vcombine.high %v3332_v47, %v3336_v14  ;;  %v9441_v30 = vcombine.low %v3332_v47, %v3336_v14  ;;  %v3387_v14 = vld [vmem:[#allocation13 + $0xcd0] sm:$0xff] }
 0x478   :  { %8254 = vmatpush1.bf16.msra.mxu0 %v9383_v23  ;;  %v3343_v23 = vld [vmem:[#allocation13 + $0xb70] sm:$0xff] }
 0x479   :  { %8500 = vmatpush1.bf16.msra.mxu1 %v9385_v22  ;;  %8255 = vmatprep.subr.bf16.mxu0 %v9392_v6  ;;  %v3340_v22 = vld [vmem:[#allocation13 + $0xb58] sm:$0xff]  ;;  %v9448_v3 = vcombine.high %v3339_v4, %v3343_v23 }
 0x47a   :  { %8501 = vmatprep.subr.bf16.mxu1 %v9394_v46  ;;  %v3344_v6 = vld [vmem:[#allocation13 + $0xb78] sm:$0xff]  ;;  %v9439_v46 = vcombine.low %v3331_v41, %v3335_v11  ;;  %v9488_v11 = vcombine.high %v3379_v21, %v3383_v20 }
 0x47b   :  { %v9450_v48 = vcombine.high %v3340_v22, %v3344_v6  ;;  %v9449_v31 = vcombine.low %v3340_v22, %v3344_v6  ;;  %v3395_v22 = vld [vmem:[#allocation13 + $0xd10] sm:$0xff] }
 0x47c   :  { %8256 = vmatpush1.bf16.msra.mxu0 %v9391_v32  ;;  %v3351_v32 = vld [vmem:[#allocation13 + $0xbb0] sm:$0xff] }
 0x47d   :  { %8502 = vmatpush1.bf16.msra.mxu1 %v9393_v53  ;;  %8257 = vmatprep.subr.bf16.mxu0 %v9400_v34  ;;  %v3348_v53 = vld [vmem:[#allocation13 + $0xb98] sm:$0xff]  ;;  %v9456_v61 = vcombine.high %v3347_v26, %v3351_v32  ;;  %v3399_v6 = vld [vmem:[#allocation13 + $0xd30] sm:$0xff] }
 0x47e   :  { %8503 = vmatprep.subr.bf16.mxu1 %v9402_v35  ;;  %v3352_v34 = vld [vmem:[#allocation13 + $0xbb8] sm:$0xff]  ;;  %v9447_v35 = vcombine.low %v3339_v4, %v3343_v23 }
 0x47f   :  { %v9458_v37 = vcombine.high %v3348_v53, %v3352_v34  ;;  %v9457_v44 = vcombine.low %v3348_v53, %v3352_v34  ;;  %v3407_v53 = vld [vmem:[#allocation13 + $0xd70] sm:$0xff]  ;;  %v3404_v34 = vld [vmem:[#allocation13 + $0xd58] sm:$0xff] }
 0x480   :  { %8258 = vmatpush1.bf16.msra.mxu0 %v9399_v57  ;;  %v3359_v57 = vld [vmem:[#allocation13 + $0xbf0] sm:$0xff] }
 0x481   :  { %8504 = vmatpush1.bf16.msra.mxu1 %v9401_v39  ;;  %8259 = vmatprep.subr.bf16.mxu0 %v9408_v40  ;;  %v3356_v39 = vld [vmem:[#allocation13 + $0xbd8] sm:$0xff]  ;;  %v9464_v51 = vcombine.high %v3355_v38, %v3359_v57 }
 0x482   :  { %8505 = vmatprep.subr.bf16.mxu1 %v9410_v43  ;;  %v3360_v40 = vld [vmem:[#allocation13 + $0xbf8] sm:$0xff]  ;;  %v9455_v43 = vcombine.low %v3347_v26, %v3351_v32  ;;  %v3403_v32 = vld [vmem:[#allocation13 + $0xd50] sm:$0xff] }
 0x483   :  { %v9466_v52 = vcombine.high %v3356_v39, %v3360_v40  ;;  %v9465_v2 = vcombine.low %v3356_v39, %v3360_v40  ;;  %v11323_v39 = vld [vmem:[#allocation13 + $0xd90] sm:$0xff] }
 0x484   :  { %8260 = vmatpush1.bf16.msra.mxu0 %v9407_v56  ;;  %v3367_v56 = vld [vmem:[#allocation13 + $0xc30] sm:$0xff] }
 0x485   :  { %8506 = vmatpush1.bf16.msra.mxu1 %v9409_v63  ;;  %8261 = vmatprep.subr.bf16.mxu0 %v9416_v1  ;;  %v3364_v63 = vld [vmem:[#allocation13 + $0xc18] sm:$0xff]  ;;  %v9472_v13 = vcombine.high %v3363_v54, %v3367_v56  ;;  %v3415_v40 = vld [vmem:[#allocation13 + $0xdb0] sm:$0xff] }
 0x486   :  { %8507 = vmatprep.subr.bf16.mxu1 %v9418_v50  ;;  %v3368_v1 = vld [vmem:[#allocation13 + $0xc38] sm:$0xff]  ;;  %v9463_v50 = vcombine.low %v3355_v38, %v3359_v57  ;;  %v9512_v38 = vcombine.high %v3403_v32, %v3407_v53 }
 0x487   :  { %v9474_v5 = vcombine.high %v3364_v63, %v3368_v1  ;;  %v9473_v25 = vcombine.low %v3364_v63, %v3368_v1  ;;  %v9511_v63 = vcombine.low %v3403_v32, %v3407_v53 }
 0x488   :  { %8262 = vmatpush1.bf16.msra.mxu0 %v9415_v10  ;;  %v3375_v10 = vld [vmem:[#allocation13 + $0xc70] sm:$0xff] }
 0x489   :  { %8508 = vmatpush1.bf16.msra.mxu1 %v9417_v12  ;;  %8263 = vmatprep.subr.bf16.mxu0 %v9424_v17  ;;  %v9471_v12 = vcombine.low %v3363_v54, %v3367_v56  ;;  %v3372_v17 = vld [vmem:[#allocation13 + $0xc58] sm:$0xff]  ;;  %v9480_v19 = vcombine.high %v3371_v42, %v3375_v10 }
 0x48a   :  { %8509 = vmatprep.subr.bf16.mxu1 %v9426_v24  ;;  %v3376_v24 = vld [vmem:[#allocation13 + $0xc78] sm:$0xff] }
 0x48b   :  { %v9481_v41 = vcombine.low %v3372_v17, %v3376_v24 }
 0x48c   :  { %8264 = vmatpush1.bf16.msra.mxu0 %v9423_v27  ;;  %v9482_v27 = vcombine.high %v3372_v17, %v3376_v24  ;;  %v3420_v24 = vld [vmem:[#allocation13 + $0xdd8] sm:$0xff] }
 0x48d   :  { %8510 = vmatpush1.bf16.msra.mxu1 %v9425_v8  ;;  %8265 = vmatprep.subr.bf16.mxu0 %v9432_v7  ;;  %v3380_v8 = vld [vmem:[#allocation13 + $0xc98] sm:$0xff] }
 0x48e   :  { %8511 = vmatprep.subr.bf16.mxu1 %v9434_v9  ;;  %v3384_v7 = vld [vmem:[#allocation13 + $0xcb8] sm:$0xff]  ;;  %v9479_v9 = vcombine.low %v3371_v42, %v3375_v10  ;;  %v11335_v10 = vstv %s11321_s21 }
 0x48f   :  { %v9490_v47 = vcombine.high %v3380_v8, %v3384_v7 }
 0x490   :  { %8266 = vmatpush1.bf16.msra.mxu0 %v9431_v49  ;;  %v3391_v49 = vld [vmem:[#allocation13 + $0xcf0] sm:$0xff] }
 0x491   :  { %8512 = vmatpush1.bf16.msra.mxu1 %v9433_v29  ;;  %8267 = vmatprep.subr.bf16.mxu0 %v9440_v16  ;;  %v3388_v29 = vld [vmem:[#allocation13 + $0xcd8] sm:$0xff]  ;;  %v9496_v4 = vcombine.high %v3387_v14, %v3391_v49 }
 0x492   :  { %8513 = vmatprep.subr.bf16.mxu1 %v9442_v18  ;;  %v3392_v16 = vld [vmem:[#allocation13 + $0xcf8] sm:$0xff]  ;;  %v9487_v18 = vcombine.low %v3379_v21, %v3383_v20 }
 0x493   :  { %v9498_v23 = vcombine.high %v3388_v29, %v3392_v16 }
 0x494   :  { %8268 = vmatpush1.bf16.msra.mxu0 %v9439_v46  ;;  %v3396_v46 = vld [vmem:[#allocation13 + $0xd18] sm:$0xff] }
 0x495   :  { %8514 = vmatpush1.bf16.msra.mxu1 %v9441_v30  ;;  %8269 = vmatprep.subr.bf16.mxu0 %v9448_v3  ;;  %v3400_v30 = vld [vmem:[#allocation13 + $0xd38] sm:$0xff]  ;;  %v9497_v3 = vcombine.low %v3388_v29, %v3392_v16 }
 0x496   :  { %8515 = vmatprep.subr.bf16.mxu1 %v9450_v48  ;;  %v9504_v48 = vcombine.high %v3395_v22, %v3399_v6  ;;  %v9506_v26 = vcombine.high %v3396_v46, %v3400_v30 }
 0x498   :  { %8270 = vmatpush1.bf16.msra.mxu0 %v9447_v35  ;;  %v3408_v35 = vld [vmem:[#allocation13 + $0xd78] sm:$0xff] }
 0x499   :  { %8516 = vmatpush1.bf16.msra.mxu1 %v9449_v31  ;;  %8271 = vmatprep.subr.bf16.mxu0 %v9456_v61  ;;  %v9503_v31 = vcombine.low %v3395_v22, %v3399_v6  ;;  %v3745_v61 = vld [vmem:[#allocation15] sm:$0xff]  ;;  %v9514_v57 = vcombine.high %v3404_v34, %v3408_v35  ;;  %v3431_v22 = vld [vmem:[#allocation13 + $0xe30] sm:$0xff] }
 0x49a   :  { %8517 = vmatprep.subr.bf16.mxu1 %v9458_v37  ;;  %v9505_v37 = vcombine.low %v3396_v46, %v3400_v30  ;;  %v3758_v54 = vrot.slane %v3745_v61, %v11559_v33  ;;  %v3754_v56 = vrot.slane %v3745_v61, %v11560_v36  ;;  %v3762_v1 = vrot.slane %v3745_v61, %v11562_v62 }
 0x49c   :  { %8272 = vmatpush1.bf16.msra.mxu0 %v9455_v43  ;;  %v3750_v43 = vrot.slane %v3745_v61, %v11561_v55 }
 0x49d   :  { %8518 = vmatpush1.bf16.msra.mxu1 %v9457_v44  ;;  %8273 = vmatprep.subr.bf16.mxu0 %v9464_v51  ;;  %v11326_v44 = vld [vmem:[#allocation16] sm:$0xff]  ;;  %v3412_v51 = vld [vmem:[#allocation13 + $0xd98] sm:$0xff] }
 0x49e   :  { %8519 = vmatprep.subr.bf16.mxu1 %v9466_v52  ;;  %v3416_v52 = vld [vmem:[#allocation13 + $0xdb8] sm:$0xff]  ;;  %v8691_v20 = vrot.slane %v11326_v44, %v11559_v33  ;;  %v8695_v30 = vrot.slane %v11326_v44, %v11562_v62 }
 0x49f   :  { %v9522_v17 = vcombine.high %v3412_v51, %v3416_v52 }
 0x4a0   :  { %8274 = vmatpush1.bf16.msra.mxu0 %v9463_v50  ;;  %v9513_v50 = vcombine.low %v3404_v34, %v3408_v35 }
 0x4a1   :  { %8520 = vmatpush1.bf16.msra.mxu1 %v9465_v2  ;;  %8284 = vmatprep.subr.bf16.mxu0 %v9472_v13  ;;  %v9520_v2 = vcombine.high %v11323_v39, %v3415_v40  ;;  %v11332_v13 = vld [vmem:[#allocation13 + $0xdd0] sm:$0xff] }
 0x4a2   :  { %8530 = vmatprep.subr.bf16.mxu1 %v9474_v5  ;;  %v3423_v5 = vld [vmem:[#allocation13 + $0xdf0] sm:$0xff] }
 0x4a3   :  { %8276 = vmatmul.mubr.bf16.vlgmr.msra.gmra.mrb[20].mxu0 %v11245_v58  ;;  %v9527_v53 = vcombine.low %v11332_v13, %v3423_v5 }
 0x4a4   :  { %8522 = vmatmul.mubr.bf16.vlgmr.msra.gmra.mrb[20].mxu1 %v11245_v58  ;;  %8285 = vmatpush1.bf16.msra.mxu0 %v9471_v12  ;;  %v9489_v58 = vcombine.low %v3380_v8, %v3384_v7  ;;  %v8683_v12 = vrot.slane %v11326_v44, %v11561_v55  ;;  %v9519_v8 = vcombine.low %v11323_v39, %v3415_v40  ;;  %v3436_v40 = vld [vmem:[#allocation13 + $0xe58] sm:$0xff] }
 0x4a5   :  { %8316 = vmatprep.mubr.bf16.mxu0 %v11247_v0  ;;  %8531 = vmatpush1.bf16.msra.mxu1 %v9473_v25  ;;  %v3424_v25 = vld [vmem:[#allocation13 + $0xdf8] sm:$0xff]  ;;  %v9521_v7 = vcombine.low %v3412_v51, %v3416_v52 }
 0x4a6   :  { %8562 = vmatprep.mubr.bf16.mxu1 %v11247_v0  ;;  %8286 = vmatprep.subr.bf16.mxu0 %v9480_v19  ;;  %v9495_v0 = vcombine.low %v3387_v14, %v3391_v49  ;;  %v9528_v14 = vcombine.high %v11332_v13, %v3423_v5  ;;  %v9529_v35 = vcombine.low %v3420_v24, %v3424_v25  ;;  %v3448_v13 = vld [vmem:[#allocation13 + $0xeb8] sm:$0xff] }
 0x4a7   :  { %8532 = vmatprep.subr.bf16.mxu1 %v9482_v27 }
 0x4a8   :  { %8287 = vmatpush1.bf16.msra.mxu0 %v9479_v9 }
 0x4a9   :  { %8533 = vmatpush1.bf16.msra.mxu1 %v9481_v41  ;;  %8288 = vmatprep.subr.bf16.mxu0 %v9488_v11  ;;  %v8687_v11 = vrot.slane %v11326_v44, %v11560_v36 }
 0x4aa   :  { %8534 = vmatprep.subr.bf16.mxu1 %v9490_v47 }
 0x4ac   :  { %8289 = vmatpush1.bf16.msra.mxu0 %v9487_v18  ;;  %v9530_v18 = vcombine.high %v3420_v24, %v3424_v25  ;;  %v3451_v25 = vld [vmem:[#allocation13 + $0xed0] sm:$0xff] }
 0x4ad   :  { %8535 = vmatpush1.bf16.msra.mxu1 %v9489_v58  ;;  %8290 = vmatprep.subr.bf16.mxu0 %v9496_v4 }
 0x4ae   :  { %8536 = vmatprep.subr.bf16.mxu1 %v9498_v23  ;;  %v3427_v23 = vld [vmem:[#allocation13 + $0xe10] sm:$0xff] }
 0x4af   :  { %v9535_v44 = vcombine.low %v3427_v23, %v3431_v22 }
 0x4b0   :  { %8291 = vmatpush1.bf16.msra.mxu0 %v9495_v0  ;;  %v3428_v0 = vld [vmem:[#allocation13 + $0xe18] sm:$0xff] }
 0x4b1   :  { %8537 = vmatpush1.bf16.msra.mxu1 %v9497_v3  ;;  %8292 = vmatprep.subr.bf16.mxu0 %v9504_v48  ;;  %v3432_v3 = vld [vmem:[#allocation13 + $0xe38] sm:$0xff] }
 0x4b2   :  { %8538 = vmatprep.subr.bf16.mxu1 %v9506_v26  ;;  %v9537_v51 = vcombine.low %v3428_v0, %v3432_v3 }
 0x4b4   :  { %8293 = vmatpush1.bf16.msra.mxu0 %v9503_v31  ;;  %v9536_v31 = vcombine.high %v3427_v23, %v3431_v22 }
 0x4b5   :  { %8539 = vmatpush1.bf16.msra.mxu1 %v9505_v37  ;;  %8294 = vmatprep.subr.bf16.mxu0 %v9512_v38  ;;  %v9538_v37 = vcombine.high %v3428_v0, %v3432_v3  ;;  %v3435_v38 = vld [vmem:[#allocation13 + $0xe50] sm:$0xff]  ;;  %v3476_v0 = vld [vmem:[#allocation13 + $0xf98] sm:$0xff] }
 0x4b6   :  { %v7908_v42 = vpop.f32.mrb[16].mxu0  ;;  %8540 = vmatprep.subr.bf16.mxu1 %v9514_v57  ;;  %v3439_v57 = vld [vmem:[#allocation13 + $0xe70] sm:$0xff]  ;;  %v3480_v3 = vld [vmem:[#allocation13 + $0xfb8] sm:$0xff] }
 0x4b7   :  { %v9902_v19 = vadd.f32 %v7908_v42, %v3750_v43  ;;  %v8154_v21 = vpop.f32.mrb[16].mxu1  ;;  %v7910_v27 = vpop.f32.mrb[17].mxu0  ;;  %v3440_v43 = vld [vmem:[#allocation13 + $0xe78] sm:$0xff]  ;;  %v9543_v42 = vcombine.low %v3435_v38, %v3439_v57 }
 0x4b8   :  { %v9904_v9 = vadd.f32 %v8154_v21, %v3758_v54  ;;  %v9903_v41 = vadd.f32 %v7910_v27, %v3754_v56  ;;  %v8156_v47 = vpop.f32.mrb[17].mxu1  ;;  %v7912_v55 = vpop.f32.mrb[18].mxu0  ;;  %8295 = vmatpush1.bf16.msra.mxu0 %v9511_v63  ;;  %v9544_v54 = vcombine.high %v3435_v38, %v3439_v57  ;;  %v9546_v63 = vcombine.high %v3436_v40, %v3440_v43  ;;  %v3452_v21 = vld [vmem:[#allocation13 + $0xed8] sm:$0xff] }
 0x4b9   :  { %vm8653_vm5 = vcmp.gt.f32.partialorder %v9902_v19, 0.0  ;;  %v8662_v49 = vmul.f32 %v9902_v19, %v11335_v10  ;;  %v9905_v29 = vadd.f32 %v8156_v47, %v3762_v1  ;;  %v8158_v16 = vpop.f32.mrb[18].mxu1  ;;  %8541 = vmatpush1.bf16.msra.mxu1 %v9513_v50  ;;  %v7913_v33 = vpop.f32.mrb[19].mxu0  ;;  %8296 = vmatprep.subr.bf16.mxu0 %v9520_v2  ;;  %v3443_v1 = vld [vmem:[#allocation13 + $0xe90] sm:$0xff]  ;;  %v3444_v2 = vld [vmem:[#allocation13 + $0xe98] sm:$0xff]  ;;  %v9585_v38 = vcombine.low %v3476_v0, %v3480_v3 }
 0x4ba   :  { %vm8655_vm6 = vcmp.gt.f32.partialorder %v9904_v9, 0.0  ;;  %v8664_v58 = vmul.f32 %v9904_v9, %v11335_v10  ;;  %vm8654_vm7 = vcmp.gt.f32.partialorder %v9903_v41, 0.0  ;;  %v8663_v36 = vmul.f32 %v9903_v41, %v11335_v10  ;;  %v8159_v4 = vpop.f32.mrb[19].mxu1  ;;  %8542 = vmatprep.subr.bf16.mxu1 %v9522_v17  ;;  %v3447_v50 = vld [vmem:[#allocation13 + $0xeb0] sm:$0xff]  ;;  %v3460_v47 = vld [vmem:[#allocation13 + $0xf18] sm:$0xff] }
 0x4bb   :  { %v8670_v6 = vsel %vm8653_vm5, %v9902_v19, %v8662_v49  ;;  %vm8656_vm8 = vcmp.gt.f32.partialorder %v9905_v29, 0.0  ;;  %v8665_v46 = vmul.f32 %v9905_v29, %v11335_v10  ;;  %v9552_v17 = vcombine.high %v3443_v1, %v3447_v50  ;;  %v3455_v19 = vld [vmem:[#allocation13 + $0xef0] sm:$0xff]  ;;  %v3464_v55 = vld [vmem:[#allocation13 + $0xf38] sm:$0xff] }
 0x4bc   :  { %v8720_v48 = vmul.f32 %v8683_v12, %v8670_v6  ;;  %v8672_v26 = vsel %vm8655_vm6, %v9904_v9, %v8664_v58  ;;  %v8671_v32 = vsel %vm8654_vm7, %v9903_v41, %v8663_v36  ;;  %8297 = vmatpush1.bf16.msra.mxu0 %v9519_v8  ;;  %v9545_v12 = vcombine.low %v3436_v40, %v3440_v43  ;;  %v3459_v41 = vld [vmem:[#allocation13 + $0xf10] sm:$0xff]  ;;  %v3468_v58 = vld [vmem:[#allocation13 + $0xf58] sm:$0xff] }
 0x4bd   :  { %v8721_v34 = vmul.f32 %v8687_v11, %v8671_v32  ;;  %8543 = vmatpush1.bf16.msra.mxu1 %v9521_v7  ;;  %8298 = vmatprep.subr.bf16.mxu0 %v9528_v14  ;;  %v8673_v61 = vsel %vm8656_vm8, %v9905_v29, %v8665_v46  ;;  %v8722_v39 = vmul.f32 %v8691_v20, %v8672_v26  ;;  %v3456_v20 = vld [vmem:[#allocation13 + $0xef8] sm:$0xff]  ;;  %v3463_v11 = vld [vmem:[#allocation13 + $0xf30] sm:$0xff] }
 0x4be   :  { %8544 = vmatprep.subr.bf16.mxu1 %v9530_v18  ;;  %v8723_v52 = vmul.f32 %v8695_v30, %v8673_v61  ;;  %v9554_v24 = vcombine.high %v3444_v2, %v3448_v13  ;;  %v9551_v27 = vcombine.low %v3443_v1, %v3447_v50  ;;  %v9553_v8 = vcombine.low %v3444_v2, %v3448_v13  ;;  %v3467_v33 = vld [vmem:[#allocation13 + $0xf50] sm:$0xff]  ;;  %v3472_v36 = vld [vmem:[#allocation13 + $0xf78] sm:$0xff] }
 0x4bf   :  { %v8728_v62 = vadd.f32 %v8721_v34, %v8720_v48  ;;  %v9560_v7 = vcombine.high %v3451_v25, %v3455_v19  ;;  %v9562_v9 = vcombine.high %v3452_v21, %v3456_v20  ;;  %v9559_v14 = vcombine.low %v3451_v25, %v3455_v19  ;;  %v3471_v18 = vld [vmem:[#allocation13 + $0xf70] sm:$0xff]  ;;  %v3488_v61 = vld [vmem:[#allocation13 + $0xff8] sm:$0xff] }
 0x4c0   :  { %8299 = vmatpush1.bf16.msra.mxu0 %v9527_v53  ;;  %v9561_v49 = vcombine.low %v3452_v21, %v3456_v20  ;;  %v9568_v29 = vcombine.high %v3459_v41, %v3463_v11  ;;  %v9570_v16 = vcombine.high %v3460_v47, %v3464_v55  ;;  %v9567_v4 = vcombine.low %v3459_v41, %v3463_v11  ;;  %v3475_v46 = vld [vmem:[#allocation13 + $0xf90] sm:$0xff]  ;;  %v3492_v43 = vld [vmem:[#allocation13 + $0x1018] sm:$0xff] }
 0x4c1   :  { %8545 = vmatpush1.bf16.msra.mxu1 %v9529_v35  ;;  %8300 = vmatprep.subr.bf16.mxu0 %v9536_v31  ;;  %v8729_v56 = vadd.f32 %v8728_v62, %v8722_v39  ;;  %v9569_v23 = vcombine.low %v3460_v47, %v3464_v55  ;;  %v9576_v22 = vcombine.high %v3467_v33, %v3471_v18  ;;  %v3479_v30 = vld [vmem:[#allocation13 + $0xfb0] sm:$0xff]  ;;  %v3484_v31 = vld [vmem:[#allocation13 + $0xfd8] sm:$0xff] }
 0x4c2   :  { %8546 = vmatprep.subr.bf16.mxu1 %v9538_v37  ;;  %v9578_v6 = vcombine.high %v3468_v58, %v3472_v36  ;;  %v9575_v48 = vcombine.low %v3467_v33, %v3471_v18  ;;  %v9577_v26 = vcombine.low %v3468_v58, %v3472_v36  ;;  %v9584_v32 = vcombine.high %v3475_v46, %v3479_v30  ;;  %v3483_v34 = vld [vmem:[#allocation13 + $0xfd0] sm:$0xff]  ;;  %v3500_v2 = vld [vmem:[#allocation13 + $0x1058] sm:$0xff] }
 0x4c3   :  { %v11353_v5 = vadd.f32 %v8729_v56, %v8723_v52  ;;  %v9586_v53 = vcombine.high %v3476_v0, %v3480_v3  ;;  %v3487_v35 = vld [vmem:[#allocation13 + $0xff0] sm:$0xff]  ;;  %v9583_v37 = vcombine.low %v3475_v46, %v3479_v30  ;;  %v9594_v39 = vcombine.high %v3484_v31, %v3488_v61  ;;  %v3504_v13 = vld [vmem:[#allocation13 + $0x1078] sm:$0xff] }
 0x4c4   :  { %8301 = vmatpush1.bf16.msra.mxu0 %v9535_v44  ;;  %v9592_v57 = vcombine.high %v3483_v34, %v3487_v35  ;;  %v3491_v62 = vld [vmem:[#allocation13 + $0x1010] sm:$0xff]  ;;  %v3496_v44 = vld [vmem:[#allocation13 + $0x1038] sm:$0xff]  ;;  %v9593_v52 = vcombine.low %v3484_v31, %v3488_v61  ;;  %v9610_v25 = vcombine.high %v3500_v2, %v3504_v13 }
 0x4c5   :  { %8547 = vmatpush1.bf16.msra.mxu1 %v9537_v51  ;;  %8302 = vmatprep.subr.bf16.mxu0 %v9544_v54  ;;  %v3495_v40 = vld [vmem:[#allocation13 + $0x1030] sm:$0xff]  ;;  %v9591_v51 = vcombine.low %v3483_v34, %v3487_v35  ;;  %v9602_v56 = vcombine.high %v3492_v43, %v3496_v44  ;;  %v3508_v19 = vld [vmem:[#allocation13 + $0x1098] sm:$0xff] }
 0x4c6   :  { %8548 = vmatprep.subr.bf16.mxu1 %v9546_v63  ;;  %v9600_v54 = vcombine.high %v3491_v62, %v3495_v40  ;;  %v3499_v63 = vld [vmem:[#allocation13 + $0x1050] sm:$0xff]  ;;  %v9599_v50 = vcombine.low %v3491_v62, %v3495_v40  ;;  %v3512_v21 = vld [vmem:[#allocation13 + $0x10b8] sm:$0xff] }
 0x4c7   :  { %v3503_v1 = vld [vmem:[#allocation13 + $0x1070] sm:$0xff]  ;;  %v3516_v11 = vld [vmem:[#allocation13 + $0x10d8] sm:$0xff] }
 0x4c8   :  { %8303 = vmatpush1.bf16.msra.mxu0 %v9543_v42  ;;  %v9601_v42 = vcombine.low %v3492_v43, %v3496_v44  ;;  %v9607_v20 = vcombine.low %v3499_v63, %v3503_v1  ;;  %v3519_v41 = vld [vmem:[#allocation13 + $0x10f0] sm:$0xff]  ;;  %v3520_v47 = vld [vmem:[#allocation13 + $0x10f8] sm:$0xff] }
 0x4c9   :  { %8549 = vmatpush1.bf16.msra.mxu1 %v9545_v12  ;;  %8304 = vmatprep.subr.bf16.mxu0 %v9552_v17  ;;  %v9608_v12 = vcombine.high %v3499_v63, %v3503_v1  ;;  %v3507_v17 = vld [vmem:[#allocation13 + $0x1090] sm:$0xff]  ;;  %v3524_v33 = vld [vmem:[#allocation13 + $0x1118] sm:$0xff]  ;;  %v9625_v58 = vcombine.low %v3516_v11, %v3520_v47 }
 0x4ca   :  { %8550 = vmatprep.subr.bf16.mxu1 %v9554_v24  ;;  %v3511_v24 = vld [vmem:[#allocation13 + $0x10b0] sm:$0xff]  ;;  %v3528_v18 = vld [vmem:[#allocation13 + $0x1138] sm:$0xff] }
 0x4cb   :  { %v9615_v55 = vcombine.low %v3507_v17, %v3511_v24  ;;  %v3536_v46 = vld [vmem:[#allocation13 + $0x1178] sm:$0xff]  ;;  %v9633_v0 = vcombine.low %v3524_v33, %v3528_v18 }
 0x4cc   :  { %8305 = vmatpush1.bf16.msra.mxu0 %v9551_v27  ;;  %v9609_v27 = vcombine.low %v3500_v2, %v3504_v13  ;;  %v3544_v34 = vld [vmem:[#allocation13 + $0x11b8] sm:$0xff] }
 0x4cd   :  { %8551 = vmatpush1.bf16.msra.mxu1 %v9553_v8  ;;  %8306 = vmatprep.subr.bf16.mxu0 %v9560_v7  ;;  %v9616_v8 = vcombine.high %v3507_v17, %v3511_v24  ;;  %v9618_v7 = vcombine.high %v3508_v19, %v3512_v21  ;;  %v3552_v62 = vld [vmem:[#allocation13 + $0x11f8] sm:$0xff] }
 0x4ce   :  { %8552 = vmatprep.subr.bf16.mxu1 %v9562_v9  ;;  %v3515_v9 = vld [vmem:[#allocation13 + $0x10d0] sm:$0xff]  ;;  %v3560_v63 = vld [vmem:[#allocation13 + $0x1238] sm:$0xff] }
 0x4cf   :  { %v3564_v17 = vld [vmem:[#allocation13 + $0x1258] sm:$0xff] }
 0x4d0   :  { %8307 = vmatpush1.bf16.msra.mxu0 %v9559_v14  ;;  %v9624_v14 = vcombine.high %v3515_v9, %v3519_v41  ;;  %v3568_v24 = vld [vmem:[#allocation13 + $0x1278] sm:$0xff] }
 0x4d1   :  { %8553 = vmatpush1.bf16.msra.mxu1 %v9561_v49  ;;  %8308 = vmatprep.subr.bf16.mxu0 %v9568_v29  ;;  %v9626_v49 = vcombine.high %v3516_v11, %v3520_v47  ;;  %v3523_v29 = vld [vmem:[#allocation13 + $0x1110] sm:$0xff]  ;;  %v9673_v11 = vcombine.low %v3564_v17, %v3568_v24 }
 0x4d2   :  { %8554 = vmatprep.subr.bf16.mxu1 %v9570_v16  ;;  %v3527_v16 = vld [vmem:[#allocation13 + $0x1130] sm:$0xff] }
 0x4d3   :  { %v9632_v36 = vcombine.high %v3523_v29, %v3527_v16  ;;  %v9631_v30 = vcombine.low %v3523_v29, %v3527_v16  ;;  %v3584_v29 = vld [vmem:[#allocation13 + $0x12f8] sm:$0xff] }
 0x4d4   :  { %8309 = vmatpush1.bf16.msra.mxu0 %v9567_v4  ;;  %v9634_v4 = vcombine.high %v3524_v33, %v3528_v18 }
 0x4d5   :  { %8555 = vmatpush1.bf16.msra.mxu1 %v9569_v23  ;;  %8310 = vmatprep.subr.bf16.mxu0 %v9576_v22  ;;  %v3531_v23 = vld [vmem:[#allocation13 + $0x1150] sm:$0xff] }
 0x4d6   :  { %8556 = vmatprep.subr.bf16.mxu1 %v9578_v6  ;;  %v3535_v22 = vld [vmem:[#allocation13 + $0x1170] sm:$0xff]  ;;  %v3532_v6 = vld [vmem:[#allocation13 + $0x1158] sm:$0xff] }
 0x4d7   :  { %v9640_v3 = vcombine.high %v3531_v23, %v3535_v22  ;;  %v9639_v35 = vcombine.low %v3531_v23, %v3535_v22  ;;  %v9641_v31 = vcombine.low %v3532_v6, %v3536_v46  ;;  %v3592_v23 = vld [vmem:[#allocation13 + $0x1338] sm:$0xff] }
 0x4d8   :  { %8311 = vmatpush1.bf16.msra.mxu0 %v9575_v48  ;;  %v9642_v48 = vcombine.high %v3532_v6, %v3536_v46 }
 0x4d9   :  { %8557 = vmatpush1.bf16.msra.mxu1 %v9577_v26  ;;  %8312 = vmatprep.subr.bf16.mxu0 %v9584_v32  ;;  %v3539_v26 = vld [vmem:[#allocation13 + $0x1190] sm:$0xff] }
 0x4da   :  { %8558 = vmatprep.subr.bf16.mxu1 %v9586_v53  ;;  %v3543_v32 = vld [vmem:[#allocation13 + $0x11b0] sm:$0xff]  ;;  %v3540_v53 = vld [vmem:[#allocation13 + $0x1198] sm:$0xff] }
 0x4db   :  { %v9648_v61 = vcombine.high %v3539_v26, %v3543_v32  ;;  %v9647_v40 = vcombine.low %v3539_v26, %v3543_v32  ;;  %v9649_v43 = vcombine.low %v3540_v53, %v3544_v34  ;;  %v3600_v26 = vld [vmem:[#allocation13 + $0x1378] sm:$0xff] }
 0x4dc   :  { %8313 = vmatpush1.bf16.msra.mxu0 %v9583_v37  ;;  %v9650_v37 = vcombine.high %v3540_v53, %v3544_v34 }
 0x4dd   :  { %8559 = vmatpush1.bf16.msra.mxu1 %v9585_v38  ;;  %8314 = vmatprep.subr.bf16.mxu0 %v9592_v57  ;;  %v3547_v38 = vld [vmem:[#allocation13 + $0x11d0] sm:$0xff] }
 0x4de   :  { %8560 = vmatprep.subr.bf16.mxu1 %v9594_v39  ;;  %v3551_v57 = vld [vmem:[#allocation13 + $0x11f0] sm:$0xff]  ;;  %v3548_v39 = vld [vmem:[#allocation13 + $0x11d8] sm:$0xff] }
 0x4df   :  { %v9656_v44 = vcombine.high %v3547_v38, %v3551_v57  ;;  %v9655_v1 = vcombine.low %v3547_v38, %v3551_v57  ;;  %v3608_v38 = vld [vmem:[#allocation13 + $0x13b8] sm:$0xff] }
 0x4e0   :  { %8315 = vmatpush1.bf16.msra.mxu0 %v9591_v51  ;;  %v9658_v51 = vcombine.high %v3548_v39, %v3552_v62 }
 0x4e1   :  { %8561 = vmatpush1.bf16.msra.mxu1 %v9593_v52  ;;  %8325 = vmatprep.subr.bf16.mxu0 %v9600_v54  ;;  %v3555_v52 = vld [vmem:[#allocation13 + $0x1210] sm:$0xff] }
 0x4e2   :  { %8571 = vmatprep.subr.bf16.mxu1 %v9602_v56  ;;  %v3559_v54 = vld [vmem:[#allocation13 + $0x1230] sm:$0xff]  ;;  %v3556_v56 = vld [vmem:[#allocation13 + $0x1218] sm:$0xff] }
 0x4e3   :  { %8317 = vmatmul.mubr.bf16.vlgmr.msra.gmra.mrb[20].mxu0 %v11275_v60  ;;  %v9664_v2 = vcombine.high %v3555_v52, %v3559_v54  ;;  %v9666_v13 = vcombine.high %v3556_v56, %v3560_v63 }
 0x4e4   :  { %8563 = vmatmul.mubr.bf16.vlgmr.msra.gmra.mrb[20].mxu1 %v11275_v60  ;;  %8326 = vmatpush1.bf16.msra.mxu0 %v9599_v50  ;;  %v9617_v60 = vcombine.low %v3508_v19, %v3512_v21  ;;  %v9657_v50 = vcombine.low %v3548_v39, %v3552_v62  ;;  %v9665_v19 = vcombine.low %v3556_v56, %v3560_v63 }
 0x4e5   :  { %8357 = vmatprep.mubr.bf16.mxu0 %v11277_v15  ;;  %8572 = vmatpush1.bf16.msra.mxu1 %v9601_v42  ;;  %v3563_v42 = vld [vmem:[#allocation13 + $0x1250] sm:$0xff] }
 0x4e6   :  { %8603 = vmatprep.mubr.bf16.mxu1 %v11277_v15  ;;  %8327 = vmatprep.subr.bf16.mxu0 %v9608_v12  ;;  %v9623_v15 = vcombine.low %v3515_v9, %v3519_v41  ;;  %v3567_v12 = vld [vmem:[#allocation13 + $0x1270] sm:$0xff]  ;;  %v3576_v9 = vld [vmem:[#allocation13 + $0x12b8] sm:$0xff] }
 0x4e7   :  { %8573 = vmatprep.subr.bf16.mxu1 %v9610_v25  ;;  %v9663_v25 = vcombine.low %v3555_v52, %v3559_v54  ;;  %v9672_v21 = vcombine.high %v3563_v42, %v3567_v12  ;;  %v9671_v41 = vcombine.low %v3563_v42, %v3567_v12  ;;  %v3616_v52 = vld [vmem:[#allocation13 + $0x13f8] sm:$0xff] }
 0x4e8   :  { %8328 = vmatpush1.bf16.msra.mxu0 %v9607_v20  ;;  %v9674_v20 = vcombine.high %v3564_v17, %v3568_v24  ;;  %v3624_v42 = vld [vmem:[#allocation13 + $0x1438] sm:$0xff] }
 0x4e9   :  { %8574 = vmatpush1.bf16.msra.mxu1 %v9609_v27  ;;  %8329 = vmatprep.subr.bf16.mxu0 %v9616_v8  ;;  %v3571_v27 = vld [vmem:[#allocation13 + $0x1290] sm:$0xff] }
 0x4ea   :  { %8575 = vmatprep.subr.bf16.mxu1 %v9618_v7  ;;  %v3575_v8 = vld [vmem:[#allocation13 + $0x12b0] sm:$0xff]  ;;  %v3572_v7 = vld [vmem:[#allocation13 + $0x1298] sm:$0xff] }
 0x4eb   :  { %v9680_v47 = vcombine.high %v3571_v27, %v3575_v8  ;;  %v9679_v16 = vcombine.low %v3571_v27, %v3575_v8  ;;  %v9681_v33 = vcombine.low %v3572_v7, %v3576_v9  ;;  %v3628_v27 = vld [vmem:[#allocation13 + $0x1458] sm:$0xff] }
 0x4ec   :  { %8330 = vmatpush1.bf16.msra.mxu0 %v9615_v55  ;;  %v9682_v55 = vcombine.high %v3572_v7, %v3576_v9  ;;  %v3632_v8 = vld [vmem:[#allocation13 + $0x1478] sm:$0xff] }
 0x4ed   :  { %8576 = vmatpush1.bf16.msra.mxu1 %v9617_v60  ;;  %8331 = vmatprep.subr.bf16.mxu0 %v9624_v14  ;;  %v3579_v60 = vld [vmem:[#allocation13 + $0x12d0] sm:$0xff] }
 0x4ee   :  { %8577 = vmatprep.subr.bf16.mxu1 %v9626_v49  ;;  %v3583_v14 = vld [vmem:[#allocation13 + $0x12f0] sm:$0xff]  ;;  %v3580_v49 = vld [vmem:[#allocation13 + $0x12d8] sm:$0xff] }
 0x4ef   :  { %v9688_v18 = vcombine.high %v3579_v60, %v3583_v14  ;;  %v9687_v22 = vcombine.low %v3579_v60, %v3583_v14  ;;  %v9689_v6 = vcombine.low %v3580_v49, %v3584_v29  ;;  %v3640_v60 = vld [vmem:[#allocation13 + $0x14b8] sm:$0xff] }
 0x4f0   :  { %8332 = vmatpush1.bf16.msra.mxu0 %v9623_v15  ;;  %v9690_v15 = vcombine.high %v3580_v49, %v3584_v29  ;;  %v9737_v49 = vcombine.low %v3628_v27, %v3632_v8 }
 0x4f1   :  { %8578 = vmatpush1.bf16.msra.mxu1 %v9625_v58  ;;  %8333 = vmatprep.subr.bf16.mxu0 %v9632_v36  ;;  %v3587_v58 = vld [vmem:[#allocation13 + $0x1310] sm:$0xff] }
 0x4f2   :  { %8579 = vmatprep.subr.bf16.mxu1 %v9634_v4  ;;  %v3591_v36 = vld [vmem:[#allocation13 + $0x1330] sm:$0xff]  ;;  %v3588_v4 = vld [vmem:[#allocation13 + $0x1318] sm:$0xff] }
 0x4f3   :  { %v9696_v46 = vcombine.high %v3587_v58, %v3591_v36  ;;  %v9695_v32 = vcombine.low %v3587_v58, %v3591_v36  ;;  %v9697_v53 = vcombine.low %v3588_v4, %v3592_v23  ;;  %v3648_v58 = vld [vmem:[#allocation13 + $0x14f8] sm:$0xff] }
 0x4f4   :  { %8334 = vmatpush1.bf16.msra.mxu0 %v9631_v30  ;;  %v9698_v30 = vcombine.high %v3588_v4, %v3592_v23 }
 0x4f5   :  { %8580 = vmatpush1.bf16.msra.mxu1 %v9633_v0  ;;  %8335 = vmatprep.subr.bf16.mxu0 %v9640_v3  ;;  %v3595_v0 = vld [vmem:[#allocation13 + $0x1350] sm:$0xff] }
 0x4f6   :  { %8581 = vmatprep.subr.bf16.mxu1 %v9642_v48  ;;  %v3599_v3 = vld [vmem:[#allocation13 + $0x1370] sm:$0xff]  ;;  %v3596_v48 = vld [vmem:[#allocation13 + $0x1358] sm:$0xff] }
 0x4f7   :  { %v9704_v34 = vcombine.high %v3595_v0, %v3599_v3  ;;  %v9703_v57 = vcombine.low %v3595_v0, %v3599_v3  ;;  %v9705_v39 = vcombine.low %v3596_v48, %v3600_v26 }
 0x4f8   :  { %8336 = vmatpush1.bf16.msra.mxu0 %v9639_v35  ;;  %v9706_v35 = vcombine.high %v3596_v48, %v3600_v26  ;;  %v3659_v26 = vld [vmem:[#allocation13 + $0x1550] sm:$0xff] }
 0x4f9   :  { %8582 = vmatpush1.bf16.msra.mxu1 %v9641_v31  ;;  %8337 = vmatprep.subr.bf16.mxu0 %v9648_v61  ;;  %v3603_v31 = vld [vmem:[#allocation13 + $0x1390] sm:$0xff] }
 0x4fa   :  { %8583 = vmatprep.subr.bf16.mxu1 %v9650_v37  ;;  %v3607_v61 = vld [vmem:[#allocation13 + $0x13b0] sm:$0xff]  ;;  %v3604_v37 = vld [vmem:[#allocation13 + $0x1398] sm:$0xff] }
 0x4fb   :  { %v9712_v62 = vcombine.high %v3603_v31, %v3607_v61  ;;  %v9711_v54 = vcombine.low %v3603_v31, %v3607_v61  ;;  %v9713_v56 = vcombine.low %v3604_v37, %v3608_v38 }
 0x4fc   :  { %8338 = vmatpush1.bf16.msra.mxu0 %v9647_v40  ;;  %v9714_v40 = vcombine.high %v3604_v37, %v3608_v38  ;;  %v3667_v38 = vld [vmem:[#allocation13 + $0x1590] sm:$0xff] }
 0x4fd   :  { %8584 = vmatpush1.bf16.msra.mxu1 %v9649_v43  ;;  %8339 = vmatprep.subr.bf16.mxu0 %v9656_v44  ;;  %v3611_v43 = vld [vmem:[#allocation13 + $0x13d0] sm:$0xff] }
 0x4fe   :  { %8585 = vmatprep.subr.bf16.mxu1 %v9658_v51  ;;  %v3615_v44 = vld [vmem:[#allocation13 + $0x13f0] sm:$0xff]  ;;  %v3612_v51 = vld [vmem:[#allocation13 + $0x13d8] sm:$0xff] }
 0x4ff   :  { %v9720_v63 = vcombine.high %v3611_v43, %v3615_v44  ;;  %v9719_v12 = vcombine.low %v3611_v43, %v3615_v44  ;;  %v9721_v17 = vcombine.low %v3612_v51, %v3616_v52 }
 0x500   :  { %8340 = vmatpush1.bf16.msra.mxu0 %v9655_v1  ;;  %v9722_v1 = vcombine.high %v3612_v51, %v3616_v52  ;;  %v3675_v52 = vld [vmem:[#allocation13 + $0x15d0] sm:$0xff] }
 0x501   :  { %8586 = vmatpush1.bf16.msra.mxu1 %v9657_v50  ;;  %8341 = vmatprep.subr.bf16.mxu0 %v9664_v2  ;;  %v3619_v50 = vld [vmem:[#allocation13 + $0x1410] sm:$0xff] }
 0x502   :  { %8587 = vmatprep.subr.bf16.mxu1 %v9666_v13  ;;  %v3623_v2 = vld [vmem:[#allocation13 + $0x1430] sm:$0xff]  ;;  %v3620_v13 = vld [vmem:[#allocation13 + $0x1418] sm:$0xff] }
 0x503   :  { %v9728_v24 = vcombine.high %v3619_v50, %v3623_v2  ;;  %v9729_v7 = vcombine.low %v3620_v13, %v3624_v42 }
 0x504   :  { %8342 = vmatpush1.bf16.msra.mxu0 %v9663_v25  ;;  %v9730_v25 = vcombine.high %v3620_v13, %v3624_v42  ;;  %v3683_v42 = vld [vmem:[#allocation13 + $0x1610] sm:$0xff] }
 0x505   :  { %8588 = vmatpush1.bf16.msra.mxu1 %v9665_v19  ;;  %8343 = vmatprep.subr.bf16.mxu0 %v9672_v21  ;;  %v3627_v19 = vld [vmem:[#allocation13 + $0x1450] sm:$0xff] }
 0x506   :  { %8589 = vmatprep.subr.bf16.mxu1 %v9674_v20  ;;  %v3631_v21 = vld [vmem:[#allocation13 + $0x1470] sm:$0xff]  ;;  %v9727_v20 = vcombine.low %v3619_v50, %v3623_v2 }
 0x507   :  { %v9736_v9 = vcombine.high %v3627_v19, %v3631_v21  ;;  %v9735_v14 = vcombine.low %v3627_v19, %v3631_v21 }
 0x508   :  { %8344 = vmatpush1.bf16.msra.mxu0 %v9671_v41  ;;  %v3635_v41 = vld [vmem:[#allocation13 + $0x1490] sm:$0xff] }
 0x509   :  { %8590 = vmatpush1.bf16.msra.mxu1 %v9673_v11  ;;  %8345 = vmatprep.subr.bf16.mxu0 %v9680_v47  ;;  %v3639_v11 = vld [vmem:[#allocation13 + $0x14b0] sm:$0xff]  ;;  %v9738_v47 = vcombine.high %v3628_v27, %v3632_v8 }
 0x50a   :  { %8591 = vmatprep.subr.bf16.mxu1 %v9682_v55  ;;  %v3636_v55 = vld [vmem:[#allocation13 + $0x1498] sm:$0xff]  ;;  %v9744_v29 = vcombine.high %v3635_v41, %v3639_v11  ;;  %v9743_v36 = vcombine.low %v3635_v41, %v3639_v11  ;;  %v3691_v27 = vld [vmem:[#allocation13 + $0x1650] sm:$0xff] }
 0x50b   :  { %v3695_v8 = vld [vmem:[#allocation13 + $0x1670] sm:$0xff] }
 0x50c   :  { %8346 = vmatpush1.bf16.msra.mxu0 %v9679_v16  ;;  %v9746_v16 = vcombine.high %v3636_v55, %v3640_v60 }
 0x50d   :  { %8592 = vmatpush1.bf16.msra.mxu1 %v9681_v33  ;;  %8347 = vmatprep.subr.bf16.mxu0 %v9688_v18  ;;  %v3643_v33 = vld [vmem:[#allocation13 + $0x14d0] sm:$0xff] }
 0x50e   :  { %8593 = vmatprep.subr.bf16.mxu1 %v9690_v15  ;;  %v3647_v18 = vld [vmem:[#allocation13 + $0x14f0] sm:$0xff]  ;;  %v3644_v15 = vld [vmem:[#allocation13 + $0x14d8] sm:$0xff] }
 0x50f   :  { %v9752_v4 = vcombine.high %v3643_v33, %v3647_v18  ;;  %v9754_v23 = vcombine.high %v3644_v15, %v3648_v58  ;;  %v9753_v0 = vcombine.low %v3644_v15, %v3648_v58  ;;  %v3707_v58 = vld [vmem:[#allocation13 + $0x16d0] sm:$0xff] }
 0x510   :  { %8348 = vmatpush1.bf16.msra.mxu0 %v9687_v22  ;;  %v3651_v22 = vld [vmem:[#allocation13 + $0x1510] sm:$0xff] }
 0x511   :  { %8594 = vmatpush1.bf16.msra.mxu1 %v9689_v6  ;;  %8349 = vmatprep.subr.bf16.mxu0 %v9696_v46  ;;  %v3655_v6 = vld [vmem:[#allocation13 + $0x1530] sm:$0xff]  ;;  %v3652_v46 = vld [vmem:[#allocation13 + $0x1518] sm:$0xff] }
 0x512   :  { %8595 = vmatprep.subr.bf16.mxu1 %v9698_v30  ;;  %v3656_v30 = vld [vmem:[#allocation13 + $0x1538] sm:$0xff]  ;;  %v9760_v3 = vcombine.high %v3651_v22, %v3655_v6 }
 0x513   :  { %v9762_v48 = vcombine.high %v3652_v46, %v3656_v30  ;;  %v9761_v31 = vcombine.low %v3652_v46, %v3656_v30  ;;  %v3715_v30 = vld [vmem:[#allocation13 + $0x1710] sm:$0xff] }
 0x514   :  { %8350 = vmatpush1.bf16.msra.mxu0 %v9695_v32  ;;  %v3663_v32 = vld [vmem:[#allocation13 + $0x1570] sm:$0xff] }
 0x515   :  { %8596 = vmatpush1.bf16.msra.mxu1 %v9697_v53  ;;  %8351 = vmatprep.subr.bf16.mxu0 %v9704_v34  ;;  %v3660_v53 = vld [vmem:[#allocation13 + $0x1558] sm:$0xff]  ;;  %v9768_v61 = vcombine.high %v3659_v26, %v3663_v32 }
 0x516   :  { %8597 = vmatprep.subr.bf16.mxu1 %v9706_v35  ;;  %v3664_v34 = vld [vmem:[#allocation13 + $0x1578] sm:$0xff]  ;;  %v9759_v35 = vcombine.low %v3651_v22, %v3655_v6 }
 0x517   :  { %v9770_v37 = vcombine.high %v3660_v53, %v3664_v34  ;;  %v9769_v43 = vcombine.low %v3660_v53, %v3664_v34  ;;  %v3723_v34 = vld [vmem:[#allocation13 + $0x1750] sm:$0xff] }
 0x518   :  { %8352 = vmatpush1.bf16.msra.mxu0 %v9703_v57  ;;  %v3671_v57 = vld [vmem:[#allocation13 + $0x15b0] sm:$0xff] }
 0x519   :  { %8598 = vmatpush1.bf16.msra.mxu1 %v9705_v39  ;;  %8353 = vmatprep.subr.bf16.mxu0 %v9712_v62  ;;  %v3668_v39 = vld [vmem:[#allocation13 + $0x1598] sm:$0xff]  ;;  %v9776_v44 = vcombine.high %v3667_v38, %v3671_v57 }
 0x51a   :  { %8599 = vmatprep.subr.bf16.mxu1 %v9714_v40  ;;  %v3672_v62 = vld [vmem:[#allocation13 + $0x15b8] sm:$0xff]  ;;  %v9767_v40 = vcombine.low %v3659_v26, %v3663_v32 }
 0x51b   :  { %v9778_v51 = vcombine.high %v3668_v39, %v3672_v62  ;;  %v9777_v50 = vcombine.low %v3668_v39, %v3672_v62  ;;  %v3731_v62 = vld [vmem:[#allocation13 + $0x1790] sm:$0xff] }
 0x51c   :  { %8354 = vmatpush1.bf16.msra.mxu0 %v9711_v54  ;;  %v3679_v54 = vld [vmem:[#allocation13 + $0x15f0] sm:$0xff] }
 0x51d   :  { %8600 = vmatpush1.bf16.msra.mxu1 %v9713_v56  ;;  %8355 = vmatprep.subr.bf16.mxu0 %v9720_v63  ;;  %v3676_v56 = vld [vmem:[#allocation13 + $0x15d8] sm:$0xff]  ;;  %v9784_v2 = vcombine.high %v3675_v52, %v3679_v54 }
 0x51e   :  { %8601 = vmatprep.subr.bf16.mxu1 %v9722_v1  ;;  %v3680_v63 = vld [vmem:[#allocation13 + $0x15f8] sm:$0xff]  ;;  %v9775_v1 = vcombine.low %v3667_v38, %v3671_v57 }
 0x51f   :  { %v9786_v13 = vcombine.high %v3676_v56, %v3680_v63  ;;  %v9785_v19 = vcombine.low %v3676_v56, %v3680_v63  ;;  %v3739_v63 = vld [vmem:[#allocation13 + $0x17d0] sm:$0xff] }
 0x520   :  { %8356 = vmatpush1.bf16.msra.mxu0 %v9719_v12  ;;  %v3687_v12 = vld [vmem:[#allocation13 + $0x1630] sm:$0xff] }
 0x521   :  { %8602 = vmatpush1.bf16.msra.mxu1 %v9721_v17  ;;  %8366 = vmatprep.subr.bf16.mxu0 %v9728_v24  ;;  %v3684_v17 = vld [vmem:[#allocation13 + $0x1618] sm:$0xff]  ;;  %v9792_v21 = vcombine.high %v3683_v42, %v3687_v12  ;;  %v9791_v41 = vcombine.low %v3683_v42, %v3687_v12 }
 0x522   :  { %8612 = vmatprep.subr.bf16.mxu1 %v9730_v25  ;;  %v3688_v24 = vld [vmem:[#allocation13 + $0x1638] sm:$0xff]  ;;  %v9783_v25 = vcombine.low %v3675_v52, %v3679_v54 }
 0x523   :  { %8358 = vmatmul.mubr.bf16.vlgmr.msra.gmra.mrb[20].mxu0 %v11291_v45  ;;  %v9793_v11 = vcombine.low %v3684_v17, %v3688_v24 }
 0x524   :  { %8604 = vmatmul.mubr.bf16.vlgmr.msra.gmra.mrb[20].mxu1 %v11291_v45  ;;  %8367 = vmatpush1.bf16.msra.mxu0 %v9727_v20  ;;  %v9745_v45 = vcombine.low %v3636_v55, %v3640_v60  ;;  %v9794_v20 = vcombine.high %v3684_v17, %v3688_v24  ;;  %v3699_v60 = vld [vmem:[#allocation13 + $0x1690] sm:$0xff] }
 0x525   :  { %8398 = vmatprep.mubr.bf16.mxu0 %v11293_v59  ;;  %8613 = vmatpush1.bf16.msra.mxu1 %v9729_v7  ;;  %v3692_v7 = vld [vmem:[#allocation13 + $0x1658] sm:$0xff] }
 0x526   :  { %8644 = vmatprep.mubr.bf16.mxu1 %v11293_v59  ;;  %8368 = vmatprep.subr.bf16.mxu0 %v9736_v9  ;;  %v9751_v59 = vcombine.low %v3643_v33, %v3647_v18  ;;  %v3696_v9 = vld [vmem:[#allocation13 + $0x1678] sm:$0xff] }
 0x527   :  { %8614 = vmatprep.subr.bf16.mxu1 %v9738_v47  ;;  %v9800_v47 = vcombine.high %v3691_v27, %v3695_v8  ;;  %v9802_v55 = vcombine.high %v3692_v7, %v3696_v9  ;;  %v9801_v33 = vcombine.low %v3692_v7, %v3696_v9  ;;  %v11565_v7 = vld [vmem:[#allocation56_spill] sm:$0xff] }
 0x528   :  { %8369 = vmatpush1.bf16.msra.mxu0 %v9735_v14  ;;  %v3703_v14 = vld [vmem:[#allocation13 + $0x16b0] sm:$0xff] }
 0x529   :  { %8615 = vmatpush1.bf16.msra.mxu1 %v9737_v49  ;;  %8370 = vmatprep.subr.bf16.mxu0 %v9744_v29  ;;  %v3700_v49 = vld [vmem:[#allocation13 + $0x1698] sm:$0xff]  ;;  %v9808_v18 = vcombine.high %v3699_v60, %v3703_v14 }
 0x52a   :  { %8616 = vmatprep.subr.bf16.mxu1 %v9746_v16  ;;  %v3704_v29 = vld [vmem:[#allocation13 + $0x16b8] sm:$0xff]  ;;  %v9799_v16 = vcombine.low %v3691_v27, %v3695_v8  ;;  %v11564_v27 = vld [vmem:[#allocation77_spill] sm:$0xff] }
 0x52b   :  { %v9810_v15 = vcombine.high %v3700_v49, %v3704_v29  ;;  %v9809_v22 = vcombine.low %v3700_v49, %v3704_v29  ;;  %v10327_v49 = vld [vmem:[#allocation16] sm:$0xff] }
 0x52c   :  { %8371 = vmatpush1.bf16.msra.mxu0 %v9743_v36  ;;  %v3711_v36 = vld [vmem:[#allocation13 + $0x16f0] sm:$0xff] }
 0x52d   :  { %8617 = vmatpush1.bf16.msra.mxu1 %v9745_v45  ;;  %8372 = vmatprep.subr.bf16.mxu0 %v9752_v4  ;;  %v3708_v45 = vld [vmem:[#allocation13 + $0x16d8] sm:$0xff]  ;;  %v9816_v6 = vcombine.high %v3707_v58, %v3711_v36 }
 0x52e   :  { %8618 = vmatprep.subr.bf16.mxu1 %v9754_v23  ;;  %v3712_v4 = vld [vmem:[#allocation13 + $0x16f8] sm:$0xff]  ;;  %v9807_v23 = vcombine.low %v3699_v60, %v3703_v14 }
 0x52f   :  { %v9818_v46 = vcombine.high %v3708_v45, %v3712_v4  ;;  %v9817_v26 = vcombine.low %v3708_v45, %v3712_v4  ;;  %v8703_v4 = vrot.slane %v10327_v49, %v11565_v7 }
 0x530   :  { %8373 = vmatpush1.bf16.msra.mxu0 %v9751_v59  ;;  %v3719_v59 = vld [vmem:[#allocation13 + $0x1730] sm:$0xff] }
 0x531   :  { %8619 = vmatpush1.bf16.msra.mxu1 %v9753_v0  ;;  %8374 = vmatprep.subr.bf16.mxu0 %v9760_v3  ;;  %v3716_v0 = vld [vmem:[#allocation13 + $0x1718] sm:$0xff]  ;;  %v9824_v32 = vcombine.high %v3715_v30, %v3719_v59 }
 0x532   :  { %8620 = vmatprep.subr.bf16.mxu1 %v9762_v48  ;;  %v3720_v3 = vld [vmem:[#allocation13 + $0x1738] sm:$0xff]  ;;  %v9815_v48 = vcombine.low %v3707_v58, %v3711_v36 }
 0x533   :  { %v9826_v53 = vcombine.high %v3716_v0, %v3720_v3  ;;  %v9825_v38 = vcombine.low %v3716_v0, %v3720_v3  ;;  %v8707_v3 = vrot.slane %v10327_v49, %v11564_v27 }
 0x534   :  { %8375 = vmatpush1.bf16.msra.mxu0 %v9759_v35  ;;  %v3727_v35 = vld [vmem:[#allocation13 + $0x1770] sm:$0xff] }
 0x535   :  { %8621 = vmatpush1.bf16.msra.mxu1 %v9761_v31  ;;  %8376 = vmatprep.subr.bf16.mxu0 %v9768_v61  ;;  %v3724_v31 = vld [vmem:[#allocation13 + $0x1758] sm:$0xff]  ;;  %v9832_v57 = vcombine.high %v3723_v34, %v3727_v35 }
 0x536   :  { %8622 = vmatprep.subr.bf16.mxu1 %v9770_v37  ;;  %v3728_v61 = vld [vmem:[#allocation13 + $0x1778] sm:$0xff]  ;;  %v9823_v37 = vcombine.low %v3715_v30, %v3719_v59 }
 0x537   :  { %v9834_v39 = vcombine.high %v3724_v31, %v3728_v61  ;;  %v9833_v52 = vcombine.low %v3724_v31, %v3728_v61 }
 0x538   :  { %8377 = vmatpush1.bf16.msra.mxu0 %v9767_v40  ;;  %v3735_v40 = vld [vmem:[#allocation13 + $0x17b0] sm:$0xff] }
 0x539   :  { %8623 = vmatpush1.bf16.msra.mxu1 %v9769_v43  ;;  %8378 = vmatprep.subr.bf16.mxu0 %v9776_v44  ;;  %v3732_v43 = vld [vmem:[#allocation13 + $0x1798] sm:$0xff]  ;;  %v9840_v54 = vcombine.high %v3731_v62, %v3735_v40 }
 0x53a   :  { %8624 = vmatprep.subr.bf16.mxu1 %v9778_v51  ;;  %v3736_v44 = vld [vmem:[#allocation13 + $0x17b8] sm:$0xff]  ;;  %v9831_v51 = vcombine.low %v3723_v34, %v3727_v35 }
 0x53b   :  { %v9842_v56 = vcombine.high %v3732_v43, %v3736_v44  ;;  %v9841_v42 = vcombine.low %v3732_v43, %v3736_v44 }
 0x53c   :  { %8379 = vmatpush1.bf16.msra.mxu0 %v9775_v1  ;;  %v3743_v1 = vld [vmem:[#allocation13 + $0x17f0] sm:$0xff] }
 0x53d   :  { %8625 = vmatpush1.bf16.msra.mxu1 %v9777_v50  ;;  %8380 = vmatprep.subr.bf16.mxu0 %v9784_v2  ;;  %v3740_v50 = vld [vmem:[#allocation13 + $0x17d8] sm:$0xff]  ;;  %v9848_v12 = vcombine.high %v3739_v63, %v3743_v1  ;;  %v9847_v24 = vcombine.low %v3739_v63, %v3743_v1 }
 0x53e   :  { %8626 = vmatprep.subr.bf16.mxu1 %v9786_v13  ;;  %v3744_v2 = vld [vmem:[#allocation13 + $0x17f8] sm:$0xff]  ;;  %v9839_v13 = vcombine.low %v3731_v62, %v3735_v40 }
 0x53f   :  { %v9850_v17 = vcombine.high %v3740_v50, %v3744_v2 }
 0x540   :  { %8381 = vmatpush1.bf16.msra.mxu0 %v9783_v25  ;;  %v9849_v25 = vcombine.low %v3740_v50, %v3744_v2 }
 0x541   :  { %8627 = vmatpush1.bf16.msra.mxu1 %v9785_v19  ;;  %8382 = vmatprep.subr.bf16.mxu0 %v9792_v21  ;;  %v10326_v19 = vld [vmem:[#allocation15] sm:$0xff] }
 0x542   :  { %8628 = vmatprep.subr.bf16.mxu1 %v9794_v20  ;;  %v11563_v21 = vld [vmem:[#allocation55_spill] sm:$0xff]  ;;  %v3774_v8 = vrot.slane %v10326_v19, %v11564_v27  ;;  %v3770_v9 = vrot.slane %v10326_v19, %v11565_v7 }
 0x543   :  { %v3766_v20 = vrot.slane %v10326_v19, %v11563_v21  ;;  %v8699_v29 = vrot.slane %v10327_v49, %v11563_v21 }
 0x544   :  { %8383 = vmatpush1.bf16.msra.mxu0 %v9791_v41  ;;  %v11566_v41 = vld [vmem:[#allocation79_spill] sm:$0xff] }
 0x545   :  { %8629 = vmatpush1.bf16.msra.mxu1 %v9793_v11  ;;  %8384 = vmatprep.subr.bf16.mxu0 %v9800_v47  ;;  %v3778_v11 = vrot.slane %v10326_v19, %v11566_v41 }
 0x546   :  { %8630 = vmatprep.subr.bf16.mxu1 %v9802_v55 }
 0x548   :  { %8385 = vmatpush1.bf16.msra.mxu0 %v9799_v16 }
 0x549   :  { %8631 = vmatpush1.bf16.msra.mxu1 %v9801_v33  ;;  %8386 = vmatprep.subr.bf16.mxu0 %v9808_v18 }
 0x54a   :  { %8632 = vmatprep.subr.bf16.mxu1 %v9810_v15 }
 0x54c   :  { %8387 = vmatpush1.bf16.msra.mxu0 %v9807_v23 }
 0x54d   :  { %8633 = vmatpush1.bf16.msra.mxu1 %v9809_v22  ;;  %8388 = vmatprep.subr.bf16.mxu0 %v9816_v6 }
 0x54e   :  { %8634 = vmatprep.subr.bf16.mxu1 %v9818_v46 }
 0x550   :  { %8389 = vmatpush1.bf16.msra.mxu0 %v9815_v48 }
 0x551   :  { %8635 = vmatpush1.bf16.msra.mxu1 %v9817_v26  ;;  %8390 = vmatprep.subr.bf16.mxu0 %v9824_v32  ;;  %v8711_v32 = vrot.slane %v10327_v49, %v11566_v41 }
 0x552   :  { %8636 = vmatprep.subr.bf16.mxu1 %v9826_v53 }
 0x554   :  { %8391 = vmatpush1.bf16.msra.mxu0 %v9823_v37 }
 0x555   :  { %8637 = vmatpush1.bf16.msra.mxu1 %v9825_v38  ;;  %8392 = vmatprep.subr.bf16.mxu0 %v9832_v57 }
 0x556   :  { %8638 = vmatprep.subr.bf16.mxu1 %v9834_v39 }
 0x558   :  { %8393 = vmatpush1.bf16.msra.mxu0 %v9831_v51 }
 0x559   :  { %8639 = vmatpush1.bf16.msra.mxu1 %v9833_v52  ;;  %8394 = vmatprep.subr.bf16.mxu0 %v9840_v54 }
 0x55a   :  { %8640 = vmatprep.subr.bf16.mxu1 %v9842_v56 }
 0x55c   :  { %8395 = vmatpush1.bf16.msra.mxu0 %v9839_v13 }
 0x55d   :  { %8641 = vmatpush1.bf16.msra.mxu1 %v9841_v42  ;;  %8396 = vmatprep.subr.bf16.mxu0 %v9848_v12 }
 0x55e   :  { %8642 = vmatprep.subr.bf16.mxu1 %v9850_v17 }
 0x560   :  { %8397 = vmatpush1.bf16.msra.mxu0 %v9847_v24 }
 0x561   :  { %8643 = vmatpush1.bf16.msra.mxu1 %v9849_v25 }
 0x563   :  { %8399 = vmatmul.mubr.bf16.vlgmr.msra.gmra.mrb[20].mxu0 %v11303_v28 }
 0x564   :  { %8645 = vmatmul.mubr.bf16.vlgmr.msra.gmra.mrb[20].mxu1 %v11303_v28 }
 0x636   :  { %v8400_v47 = vpop.f32.mrb[20].mxu0 }
 0x637   :  { %v9906_v55 = vadd.f32 %v8400_v47, %v3766_v20  ;;  %v8646_v60 = vpop.f32.mrb[20].mxu1  ;;  %v8402_v14 = vpop.f32.mrb[21].mxu0 }
 0x638   :  { %v9908_v16 = vadd.f32 %v8646_v60, %v3774_v8  ;;  %v9907_v33 = vadd.f32 %v8402_v14, %v3770_v9  ;;  %v8648_v18 = vpop.f32.mrb[21].mxu1  ;;  %v8404_v28 = vpop.f32.mrb[22].mxu0 }
 0x639   :  { %vm8657_vm9 = vcmp.gt.f32.partialorder %v9906_v55, 0.0  ;;  %v8666_v15 = vmul.f32 %v9906_v55, %v11335_v10  ;;  %v9909_v58 = vadd.f32 %v8648_v18, %v3778_v11  ;;  %v8650_v36 = vpop.f32.mrb[22].mxu1  ;;  %v8405_v45 = vpop.f32.mrb[23].mxu0 }
 0x63a   :  { %vm8659_vm10 = vcmp.gt.f32.partialorder %v9908_v16, 0.0  ;;  %v8668_v23 = vmul.f32 %v9908_v16, %v11335_v10  ;;  %vm8658_vm11 = vcmp.gt.f32.partialorder %v9907_v33, 0.0  ;;  %v8667_v22 = vmul.f32 %v9907_v33, %v11335_v10  ;;  %v8651_v6 = vpop.f32.mrb[23].mxu1 }
 0x63b   :  { %v8674_v46 = vsel %vm8657_vm9, %v9906_v55, %v8666_v15  ;;  %v8669_v30 = vmul.f32 %v9909_v58, %v11335_v10  ;;  %vm8660_vm12 = vcmp.gt.f32.partialorder %v9909_v58, 0.0  ;;  %v8737_v10 = vstv %s8759_s22 }
 0x63c   :  { %v8724_v59 = vmul.f32 %v8699_v29, %v8674_v46  ;;  %v8675_v0 = vsel %vm8658_vm11, %v9907_v33, %v8667_v22  ;;  %v8676_v48 = vsel %vm8659_vm10, %v9908_v16, %v8668_v23 }
 0x63d   :  { %v8725_v26 = vmul.f32 %v8703_v4, %v8675_v0  ;;  %v8677_v34 = vsel %vm8660_vm12, %v9909_v58, %v8669_v30  ;;  %v8726_v35 = vmul.f32 %v8707_v3, %v8676_v48 }
 0x63e   :  { %v8731_v53 = vadd.f32 %v11353_v5, %v8724_v59  ;;  %v8727_v61 = vmul.f32 %v8711_v32, %v8677_v34 }
 0x640   :  { %v8732_v31 = vadd.f32 %v8731_v53, %v8725_v26 }
 0x642   :  { %v8733_v37 = vadd.f32 %v8732_v31, %v8726_v35 }
 0x644   :  { %v8734_v38 = vadd.f32 %v8733_v37, %v8727_v61 }
 0x646   :  { %8735 = vadd.xlane.f32.xlu0 %v8734_v38 }
 0x6d3   :  { %v8736_v57 = vpop.xlane.xlu0 %8735 }
 0x6d4   :  { %v8738_v39 = vadd.f32 %v8737_v10, %v8736_v57 }
 0x6d6   :  { %v9851_v62 = vmul.f32 -1.442695, %v8738_v39 }
 0x6d8   :  { %10322 = vpow2.f32 %v9851_v62 }
 0x6e2   :  { %v10323_v40 = vpop.eup %10322 }
 0x6e3   :  { %v8742_v43 = vadd.f32 1.0, %v10323_v40 }
 0x6e5   :  { %10324 = vrcp.f32 %v8742_v43 }
 0x6ef   :  { %v10325_v44 = vpop.eup %10324 }
 0x6f0   :  { %8746 = vst.msk [vmem:[%s11390_s9] sm:$0xff] %vm8745_vm13, %v10325_v44 }
 0x6f1   :  { %8751 = vsyncpa [#allocation5], 1 }
 0x6f2   :  { %8752 = vsyncpa [#allocation8], 1 }
 0x6f3   :  { %8753 = vsyncpa [#allocation11], 1 }
 0x6f4   :  { %8754 = vsyncpa [#allocation14], 1 }
 0x6f5   :  { %8755 = vsyncpa [#allocation17], 1 }
 0x6f6   :  { %8756 = vsyncpa [#allocation6], 1 }

</bundles_post_ra>
